<compile_context>
chip_gen: v7x
topology: tpu7x:2x2x1
jax: 0.10.0
libtpu: 0.0.40
codegen_flags: <defaults>
</compile_context>

<pallas_src>
import jax
import jax.numpy as jnp
from jax.experimental import pallas as pl
from jax.experimental.pallas import tpu as pltpu

EPS = 1e-5


# ----------------------------- in-kernel helpers -----------------------------
def _conv3x3_bf16(img_f32, w_slab_ref):
    """Valid 3x3 conv of one NHWC image (Hc, Wc, Ci) with w_slab_ref (3, 3*Ci, Co).

    Three MXU matmuls (one per kw column dx): the operand is the (Ho*Wo, 3*Ci)
    slab formed by concatenating the 3 dy-shifted windows along the channel
    (lane) dim.  bf16 operands, f32 accumulation.
    """
    Hc, Wc, Ci = img_f32.shape
    Ho, Wo = Hc - 2, Wc - 2
    Co = w_slab_ref.shape[-1]
    img = img_f32.astype(jnp.bfloat16)
    acc = None
    for dx in range(3):
        col = img[:, dx:dx + Wo, :]                                  # (Hc, Wo, Ci)
        op = jnp.concatenate([col[dy:dy + Ho] for dy in range(3)], axis=-1)
        op = op.reshape(Ho * Wo, 3 * Ci)                             # (Ho*Wo, 3*Ci)
        part = jnp.dot(op, w_slab_ref[dx],
                       preferred_element_type=jnp.float32)           # f32 acc
        acc = part if acc is None else acc + part
    return acc.reshape(Ho, Wo, Co)


def _moments_to(st_ref, z):
    """Write per-channel [sum, sum_sq] of f32 z (H, W, C) into st_ref (1,2,C)."""
    s = jnp.sum(z, axis=(0, 1), keepdims=True)            # (1, 1, C)
    ss = jnp.sum(z * z, axis=(0, 1), keepdims=True)       # (1, 1, C)
    st_ref[0, 0:1, :] = s[0]
    st_ref[0, 1:2, :] = ss[0]


# ------------------------- kernel 1: conv1 + moments -------------------------
def conv1_kernel(x_ref, w1_ref, z1_ref, st1_ref):
    z = _conv3x3_bf16(x_ref[0], w1_ref)                   # (H1, W1, Cout) f32
    z1_ref[0] = z.astype(z1_ref.dtype)                    # bf16 HBM intermediate
    _moments_to(st1_ref, z)                               # f32 moments


# ------------------- kernel 2: BN1 + ReLU + conv2 + moments ------------------
def bn1_conv2_kernel(z1_ref, sc1_ref, sh1_ref, w2_ref, z2_ref, st2_ref):
    a = jnp.maximum(z1_ref[0].astype(jnp.float32) * sc1_ref[...] + sh1_ref[...],
                    0.0)                                  # f32 VPU math
    z = _conv3x3_bf16(a, w2_ref)                          # (H2, W2, Cout) f32
    z2_ref[0] = z.astype(z2_ref.dtype)
    _moments_to(st2_ref, z)


# --------------------- kernel 3: BN2 + ReLU + maxpool 2x2 --------------------
def bn2_pool_kernel(z2_ref, sc2_ref, sh2_ref, o_ref):
    a = jnp.maximum(z2_ref[0].astype(jnp.float32) * sc2_ref[...] + sh2_ref[...],
                    0.0)                                  # (H2, W2, C) f32
    H2, W2, C = a.shape
    Ho, Wo = o_ref.shape[1], o_ref.shape[2]
    # rows: (2*Ho, W2, C) -> (Ho, 2, W2, C); pairwise max (last two dims intact)
    r = a[:2 * Ho].reshape(Ho, 2, W2, C)
    rmax = jnp.maximum(r[:, 0], r[:, 1])                  # (Ho, W2, C)
    # cols: (Ho, 2*Wo, C) -> (Ho, Wo, 2, C); pairwise max (lane dim intact)
    c = rmax[:, :2 * Wo, :].reshape(Ho, Wo, 2, C)
    o_ref[0] = jnp.maximum(c[:, :, 0, :], c[:, :, 1, :]).astype(o_ref.dtype)


# ------------------------------- host-side glue ------------------------------
def _bn_scale_shift(stats, gamma, beta, count):
    """Combine per-sample [sum, sum_sq] into per-channel BN scale/shift (f32)."""
    s = jnp.sum(stats[:, 0, :], axis=0)                   # (C,)
    ss = jnp.sum(stats[:, 1, :], axis=0)                  # (C,)
    mean = s / count
    var = ss / count - mean * mean                        # biased (training mode)
    scale = gamma.reshape(-1) * jax.lax.rsqrt(var + EPS)
    shift = beta.reshape(-1) - mean * scale
    return scale.reshape(1, 1, -1), shift.reshape(1, 1, -1)


def _compiler_params(block_nbytes):
    """Scoped-VMEM limit sized from the double-buffered block footprint."""
    need = 2 * int(block_nbytes) + (8 << 20)              # 2x for double buffers
    limit = int(min(max(need, 32 << 20), 64 << 20))       # stay under v7x physical
    return pltpu.CompilerParams(dimension_semantics=("parallel",),
                                vmem_limit_bytes=limit)


def encoder_block_forward(x_nchw, params):
    """Pallas forward of _EncoderBlock. Input/output are NCHW like PyTorch.

    params["b1"] / params["b2"] (conv biases) are accepted but unused: they
    cancel exactly under training-mode BatchNorm (batch statistics).
    """
    # TODO(synk): in a full UNet keep activations NHWC across encoder blocks so
    # these two HBM relayouts (and the matching one at the exit) disappear.
    x = jnp.transpose(x_nchw, (0, 2, 3, 1)).astype(jnp.float32)   # NHWC f32
    N, H, W, Cin = x.shape
    Cout = params["w1"].shape[-1]
    H1, W1 = H - 2, W - 2
    H2, W2 = H1 - 2, W1 - 2
    Ho, Wo = H2 // 2, W2 // 2
    f32, bf16 = jnp.float32, jnp.bfloat16

    def slab(w):  # (3, 3, Ci, Co) -> per-kw-column slab (3, 3*Ci, Co), bf16
        _, _, ci, co = w.shape
        return jnp.transpose(w, (1, 0, 2, 3)).reshape(3, 3 * ci, co).astype(bf16)

    w1s = slab(params["w1"])
    w2s = slab(params["w2"])

    # ---- pass 1: conv1 + per-sample moments (grid over batch) ----
    blk1 = (H * W * Cin * 4 + w1s.size * 2
            + H1 * W1 * Cout * 2 + 2 * Cout * 4)
    z1, st1 = pl.pallas_call(
        conv1_kernel,
        out_shape=(jax.ShapeDtypeStruct((N, H1, W1, Cout), bf16),
                   jax.ShapeDtypeStruct((N, 2, Cout), f32)),
        grid=(N,),
        in_specs=[pl.BlockSpec((1, H, W, Cin), lambda n: (n, 0, 0, 0)),
                  pl.BlockSpec((3, 3 * Cin, Cout), lambda n: (0, 0, 0))],
        out_specs=(pl.BlockSpec((1, H1, W1, Cout), lambda n: (n, 0, 0, 0)),
                   pl.BlockSpec((1, 2, Cout), lambda n: (n, 0, 0))),
        compiler_params=_compiler_params(blk1),
        cost_estimate=pl.CostEstimate(
            flops=int(2 * N * H1 * W1 * 9 * Cin * Cout),
            transcendentals=0,
            bytes_accessed=int(N * blk1)),
    )(x, w1s)
    sc1, sh1 = _bn_scale_shift(st1, params["g1"], params["beta1"],
                               float(N * H1 * W1))

    # ---- pass 2: BN1 + ReLU + conv2 + per-sample moments ----
    blk2 = (H1 * W1 * Cout * 2 + 2 * Cout * 4 * 2 + w2s.size * 2
            + H2 * W2 * Cout * 2 + 2 * Cout * 4)
    z2, st2 = pl.pallas_call(
        bn1_conv2_kernel,
        out_shape=(jax.ShapeDtypeStruct((N, H2, W2, Cout), bf16),
                   jax.ShapeDtypeStruct((N, 2, Cout), f32)),
        grid=(N,),
        in_specs=[pl.BlockSpec((1, H1, W1, Cout), lambda n: (n, 0, 0, 0)),
                  pl.BlockSpec((1, 1, Cout), lambda n: (0, 0, 0)),
                  pl.BlockSpec((1, 1, Cout), lambda n: (0, 0, 0)),
                  pl.BlockSpec((3, 3 * Cout, Cout), lambda n: (0, 0, 0))],
        out_specs=(pl.BlockSpec((1, H2, W2, Cout), lambda n: (n, 0, 0, 0)),
                   pl.BlockSpec((1, 2, Cout), lambda n: (n, 0, 0))),
        compiler_params=_compiler_params(blk2),
        cost_estimate=pl.CostEstimate(
            flops=int(2 * N * H2 * W2 * 9 * Cout * Cout + 3 * N * H1 * W1 * Cout),
            transcendentals=0,
            bytes_accessed=int(N * blk2)),
    )(z1, sc1, sh1, w2s)
    sc2, sh2 = _bn_scale_shift(st2, params["g2"], params["beta2"],
                               float(N * H2 * W2))

    # ---- pass 3: BN2 + ReLU + maxpool(2,2) ----
    blk3 = (H2 * W2 * Cout * 2 + 2 * Cout * 4 * 2 + Ho * Wo * Cout * 4)
    out = pl.pallas_call(
        bn2_pool_kernel,
        out_shape=jax.ShapeDtypeStruct((N, Ho, Wo, Cout), f32),
        grid=(N,),
        in_specs=[pl.BlockSpec((1, H2, W2, Cout), lambda n: (n, 0, 0, 0)),
                  pl.BlockSpec((1, 1, Cout), lambda n: (0, 0, 0)),
                  pl.BlockSpec((1, 1, Cout), lambda n: (0, 0, 0))],
        out_specs=pl.BlockSpec((1, Ho, Wo, Cout), lambda n: (n, 0, 0, 0)),
        compiler_params=_compiler_params(blk3),
        cost_estimate=pl.CostEstimate(
            flops=int(6 * N * H2 * W2 * Cout),
            transcendentals=0,
            bytes_accessed=int(N * blk3)),
    )(z2, sc2, sh2)

    return jnp.transpose(out, (0, 3, 1, 2))               # back to NCHW


# -------------------- pure-JAX reference (for validation) --------------------
def _ref_forward(x_nchw, p):
    def conv(x, w_hwio, b):
        w_oihw = jnp.transpose(w_hwio, (3, 2, 0, 1))
        z = jax.lax.conv_general_dilated(
            x, w_oihw, (1, 1), "VALID",
            dimension_numbers=("NCHW", "OIHW", "NCHW"))
        return z + b.reshape(1, -1, 1, 1)

    def bn_relu(z, g, beta):
        mean = jnp.mean(z, axis=(0, 2, 3), keepdims=True)
        var = jnp.mean((z - mean) ** 2, axis=(0, 2, 3), keepdims=True)
        z = (z - mean) * jax.lax.rsqrt(var + EPS) * g.reshape(1, -1, 1, 1) \
            + beta.reshape(1, -1, 1, 1)
        return jnp.maximum(z, 0.0)

    z = bn_relu(conv(x_nchw, p["w1"], p["b1"]), p["g1"], p["beta1"])
    z = bn_relu(conv(z, p["w2"], p["b2"]), p["g2"], p["beta2"])
    z = jax.lax.reduce_window(z, -jnp.inf, jax.lax.max,
                              (1, 1, 2, 2), (1, 1, 2, 2), "VALID")
    return z


if __name__ == "__main__":
    N, Cin, Cout, H, W = 2, 4, 8, 16, 16

    key = jax.random.PRNGKey(0)
    ks = jax.random.split(key, 9)
    params = {
        "w1":    0.1 * jax.random.normal(ks[0], (3, 3, Cin, Cout), jnp.float32),
        "b1":    0.1 * jax.random.normal(ks[1], (1, 1, Cout), jnp.float32),
        "g1":    1.0 + 0.1 * jax.random.normal(ks[2], (1, 1, Cout), jnp.float32),
        "beta1": 0.1 * jax.random.normal(ks[3], (1, 1, Cout), jnp.float32),
        "w2":    0.1 * jax.random.normal(ks[4], (3, 3, Cout, Cout), jnp.float32),
        "b2":    0.1 * jax.random.normal(ks[5], (1, 1, Cout), jnp.float32),
        "g2":    1.0 + 0.1 * jax.random.normal(ks[6], (1, 1, Cout), jnp.float32),
        "beta2": 0.1 * jax.random.normal(ks[7], (1, 1, Cout), jnp.float32),
    }
    x = jax.random.normal(ks[8], (N, Cin, H, W), jnp.float32)   # NCHW like PyTorch

    fwd = jax.jit(encoder_block_forward)
    out = jax.block_until_ready(fwd(x, params))

    ref = jax.block_until_ready(_ref_forward(x, params))
    assert out.shape == (N, Cout, (H - 4) // 2, (W - 4) // 2), out.shape
    # bf16 MXU operands + bf16 z1/z2 intermediates -> slightly looser tolerance
    # than the all-f32 variant (reference is pure f32).
    assert jnp.allclose(out, ref, atol=5e-2, rtol=5e-2), \
        float(jnp.max(jnp.abs(out - ref)))

    print("KERNEL_OK")
</pallas_src>

<mosaic_0001>
module attributes {stable_mosaic.version = 11 : i64} {
  func.func @conv1_kernel(%arg0: i32, %arg1: memref<1x16x16x4xf32, #tpu.memory_space<vmem>>, %arg2: memref<3x12x8xbf16, #tpu.memory_space<vmem>>, %arg3: memref<1x14x14x8xbf16, #tpu.memory_space<vmem>>, %arg4: memref<1x2x8xf32, #tpu.memory_space<vmem>>) attributes {dimension_semantics = [#tpu.dimension_semantics<parallel>], iteration_bounds = array<i64: 2>, scalar_prefetch = 0 : i64, scratch_operands = 0 : i64, tpu.core_type = #tpu.core_type<tc>, window_params = [{transform_indices = @transform_0, window_bounds = array<i64: 1, 16, 16, 4>}, {pipeline_mode = #tpu.pipeline_mode<synchronous>, transform_indices = @transform_1, window_bounds = array<i64: 3, 12, 8>}, {transform_indices = @transform_2, window_bounds = array<i64: 1, 14, 14, 8>}, {transform_indices = @transform_3, window_bounds = array<i64: 1, 2, 8>}]} {
    %c0 = arith.constant 0 : index
    %c0_0 = arith.constant 0 : index
    %c0_1 = arith.constant 0 : index
    %c0_2 = arith.constant 0 : index
    %0 = vector.load %arg1[%c0, %c0_0, %c0_1, %c0_2] : memref<1x16x16x4xf32, #tpu.memory_space<vmem>>, vector<1x16x16x4xf32>
    %1 = vector.shape_cast %0 : vector<1x16x16x4xf32> to vector<16x16x4xf32>
    %2 = arith.truncf %1 : vector<16x16x4xf32> to vector<16x16x4xbf16>
    %3 = vector.extract_strided_slice %2 {offsets = [0, 0, 0], sizes = [16, 14, 4], strides = [1, 1, 1]} : vector<16x16x4xbf16> to vector<16x14x4xbf16>
    %4 = vector.extract_strided_slice %3 {offsets = [0, 0, 0], sizes = [14, 14, 4], strides = [1, 1, 1]} : vector<16x14x4xbf16> to vector<14x14x4xbf16>
    %5 = vector.extract_strided_slice %3 {offsets = [1, 0, 0], sizes = [14, 14, 4], strides = [1, 1, 1]} : vector<16x14x4xbf16> to vector<14x14x4xbf16>
    %6 = vector.extract_strided_slice %3 {offsets = [2, 0, 0], sizes = [14, 14, 4], strides = [1, 1, 1]} : vector<16x14x4xbf16> to vector<14x14x4xbf16>
    %7 = tpu.concatenate %4, %5, %6 in 2 : vector<14x14x4xbf16>, vector<14x14x4xbf16>, vector<14x14x4xbf16> -> vector<14x14x12xbf16>
    %8 = vector.shape_cast %7 : vector<14x14x12xbf16> to vector<196x12xbf16>
    %c0_3 = arith.constant 0 : index
    %c0_4 = arith.constant 0 : index
    %c0_5 = arith.constant 0 : index
    %9 = vector.load %arg2[%c0_3, %c0_4, %c0_5] : memref<3x12x8xbf16, #tpu.memory_space<vmem>>, vector<1x12x8xbf16>
    %10 = vector.shape_cast %9 : vector<1x12x8xbf16> to vector<12x8xbf16>
    %cst = arith.constant dense<0.000000e+00> : vector<196x8xf32>
    %11 = tpu.matmul %8, %10, %cst {dimension_numbers = #tpu.dot_dimension_numbers<[1], [0], [0], [1], [0, 0, 1, 1], [], []>} : vector<196x12xbf16>, vector<12x8xbf16>, vector<196x8xf32> -> vector<196x8xf32>
    %12 = vector.extract_strided_slice %2 {offsets = [0, 1, 0], sizes = [16, 14, 4], strides = [1, 1, 1]} : vector<16x16x4xbf16> to vector<16x14x4xbf16>
    %13 = vector.extract_strided_slice %12 {offsets = [0, 0, 0], sizes = [14, 14, 4], strides = [1, 1, 1]} : vector<16x14x4xbf16> to vector<14x14x4xbf16>
    %14 = vector.extract_strided_slice %12 {offsets = [1, 0, 0], sizes = [14, 14, 4], strides = [1, 1, 1]} : vector<16x14x4xbf16> to vector<14x14x4xbf16>
    %15 = vector.extract_strided_slice %12 {offsets = [2, 0, 0], sizes = [14, 14, 4], strides = [1, 1, 1]} : vector<16x14x4xbf16> to vector<14x14x4xbf16>
    %16 = tpu.concatenate %13, %14, %15 in 2 : vector<14x14x4xbf16>, vector<14x14x4xbf16>, vector<14x14x4xbf16> -> vector<14x14x12xbf16>
    %17 = vector.shape_cast %16 : vector<14x14x12xbf16> to vector<196x12xbf16>
    %c1 = arith.constant 1 : index
    %c0_6 = arith.constant 0 : index
    %c0_7 = arith.constant 0 : index
    %18 = vector.load %arg2[%c1, %c0_6, %c0_7] : memref<3x12x8xbf16, #tpu.memory_space<vmem>>, vector<1x12x8xbf16>
    %19 = vector.shape_cast %18 : vector<1x12x8xbf16> to vector<12x8xbf16>
    %cst_8 = arith.constant dense<0.000000e+00> : vector<196x8xf32>
    %20 = tpu.matmul %17, %19, %cst_8 {dimension_numbers = #tpu.dot_dimension_numbers<[1], [0], [0], [1], [0, 0, 1, 1], [], []>} : vector<196x12xbf16>, vector<12x8xbf16>, vector<196x8xf32> -> vector<196x8xf32>
    %21 = arith.addf %11, %20 : vector<196x8xf32>
    %22 = vector.extract_strided_slice %2 {offsets = [0, 2, 0], sizes = [16, 14, 4], strides = [1, 1, 1]} : vector<16x16x4xbf16> to vector<16x14x4xbf16>
    %23 = vector.extract_strided_slice %22 {offsets = [0, 0, 0], sizes = [14, 14, 4], strides = [1, 1, 1]} : vector<16x14x4xbf16> to vector<14x14x4xbf16>
    %24 = vector.extract_strided_slice %22 {offsets = [1, 0, 0], sizes = [14, 14, 4], strides = [1, 1, 1]} : vector<16x14x4xbf16> to vector<14x14x4xbf16>
    %25 = vector.extract_strided_slice %22 {offsets = [2, 0, 0], sizes = [14, 14, 4], strides = [1, 1, 1]} : vector<16x14x4xbf16> to vector<14x14x4xbf16>
    %26 = tpu.concatenate %23, %24, %25 in 2 : vector<14x14x4xbf16>, vector<14x14x4xbf16>, vector<14x14x4xbf16> -> vector<14x14x12xbf16>
    %27 = vector.shape_cast %26 : vector<14x14x12xbf16> to vector<196x12xbf16>
    %c2 = arith.constant 2 : index
    %c0_9 = arith.constant 0 : index
    %c0_10 = arith.constant 0 : index
    %28 = vector.load %arg2[%c2, %c0_9, %c0_10] : memref<3x12x8xbf16, #tpu.memory_space<vmem>>, vector<1x12x8xbf16>
    %29 = vector.shape_cast %28 : vector<1x12x8xbf16> to vector<12x8xbf16>
    %cst_11 = arith.constant dense<0.000000e+00> : vector<196x8xf32>
    %30 = tpu.matmul %27, %29, %cst_11 {dimension_numbers = #tpu.dot_dimension_numbers<[1], [0], [0], [1], [0, 0, 1, 1], [], []>} : vector<196x12xbf16>, vector<12x8xbf16>, vector<196x8xf32> -> vector<196x8xf32>
    %31 = arith.addf %21, %30 : vector<196x8xf32>
    %32 = vector.shape_cast %31 : vector<196x8xf32> to vector<14x14x8xf32>
    %33 = arith.truncf %32 : vector<14x14x8xf32> to vector<14x14x8xbf16>
    %c0_12 = arith.constant 0 : index
    %c0_13 = arith.constant 0 : index
    %c0_14 = arith.constant 0 : index
    %c0_15 = arith.constant 0 : index
    %34 = vector.load %arg3[%c0_12, %c0_13, %c0_14, %c0_15] : memref<1x14x14x8xbf16, #tpu.memory_space<vmem>>, vector<1x14x14x8xbf16>
    %35 = vector.shape_cast %34 : vector<1x14x14x8xbf16> to vector<14x14x8xbf16>
    %36 = vector.shape_cast %33 : vector<14x14x8xbf16> to vector<1x14x14x8xbf16>
    tpu.vector_store %arg3[%c0_12, %c0_13, %c0_14, %c0_15], %36 {strides = array<i32>} : memref<1x14x14x8xbf16, #tpu.memory_space<vmem>>, vector<1x14x14x8xbf16>,
    %cst_16 = arith.constant dense<0.000000e+00> : vector<8xf32>
    %37 = vector.multi_reduction <add>, %32, %cst_16 [0, 1] : vector<14x14x8xf32> to vector<8xf32>
    %38 = vector.shape_cast %37 : vector<8xf32> to vector<1x1x8xf32>
    %39 = arith.mulf %32, %32 : vector<14x14x8xf32>
    %cst_17 = arith.constant dense<0.000000e+00> : vector<8xf32>
    %40 = vector.multi_reduction <add>, %39, %cst_17 [0, 1] : vector<14x14x8xf32> to vector<8xf32>
    %41 = vector.shape_cast %40 : vector<8xf32> to vector<1x1x8xf32>
    %42 = vector.shape_cast %38 : vector<1x1x8xf32> to vector<1x8xf32>
    %c0_18 = arith.constant 0 : index
    %c0_19 = arith.constant 0 : index
    %c0_20 = arith.constant 0 : index
    %43 = vector.load %arg4[%c0_18, %c0_19, %c0_20] : memref<1x2x8xf32, #tpu.memory_space<vmem>>, vector<1x1x8xf32>
    %44 = vector.shape_cast %43 : vector<1x1x8xf32> to vector<1x8xf32>
    %45 = vector.shape_cast %42 : vector<1x8xf32> to vector<1x1x8xf32>
    tpu.vector_store %arg4[%c0_18, %c0_19, %c0_20], %45 {strides = array<i32>} : memref<1x2x8xf32, #tpu.memory_space<vmem>>, vector<1x1x8xf32>,
    %46 = vector.shape_cast %41 : vector<1x1x8xf32> to vector<1x8xf32>
    %c0_21 = arith.constant 0 : index
    %c1_22 = arith.constant 1 : index
    %c0_23 = arith.constant 0 : index
    %47 = vector.load %arg4[%c0_21, %c1_22, %c0_23] : memref<1x2x8xf32, #tpu.memory_space<vmem>>, vector<1x1x8xf32>
    %48 = vector.shape_cast %47 : vector<1x1x8xf32> to vector<1x8xf32>
    %49 = vector.shape_cast %46 : vector<1x8xf32> to vector<1x1x8xf32>
    tpu.vector_store %arg4[%c0_21, %c1_22, %c0_23], %49 {strides = array<i32>} : memref<1x2x8xf32, #tpu.memory_space<vmem>>, vector<1x1x8xf32>,
    return
  }
  func.func @transform_0(%arg0: i32) -> (i32, i32, i32, i32) {
    %c0_i32 = arith.constant 0 : i32
    %c0_i32_0 = arith.constant 0 : i32
    %c0_i32_1 = arith.constant 0 : i32
    %c0_i32_2 = arith.constant 0 : i32
    return %arg0, %c0_i32, %c0_i32_0, %c0_i32_1 : i32, i32, i32, i32
  }
  func.func @transform_1(%arg0: i32) -> (i32, i32, i32) {
    %c0_i32 = arith.constant 0 : i32
    %c0_i32_0 = arith.constant 0 : i32
    %c0_i32_1 = arith.constant 0 : i32
    %c0_i32_2 = arith.constant 0 : i32
    return %c0_i32, %c0_i32_0, %c0_i32_1 : i32, i32, i32
  }
  func.func @transform_2(%arg0: i32) -> (i32, i32, i32, i32) {
    %c0_i32 = arith.constant 0 : i32
    %c0_i32_0 = arith.constant 0 : i32
    %c0_i32_1 = arith.constant 0 : i32
    %c0_i32_2 = arith.constant 0 : i32
    return %arg0, %c0_i32, %c0_i32_0, %c0_i32_1 : i32, i32, i32, i32
  }
  func.func @transform_3(%arg0: i32) -> (i32, i32, i32) {
    %c0_i32 = arith.constant 0 : i32
    %c0_i32_0 = arith.constant 0 : i32
    %c0_i32_1 = arith.constant 0 : i32
    return %arg0, %c0_i32, %c0_i32_0 : i32, i32, i32
  }
}

module attributes {stable_mosaic.version = 11 : i64} {
  func.func @bn1_conv2_kernel(%arg0: i32, %arg1: memref<1x14x14x8xbf16, #tpu.memory_space<vmem>>, %arg2: memref<1x1x8xf32, #tpu.memory_space<vmem>>, %arg3: memref<1x1x8xf32, #tpu.memory_space<vmem>>, %arg4: memref<3x24x8xbf16, #tpu.memory_space<vmem>>, %arg5: memref<1x12x12x8xbf16, #tpu.memory_space<vmem>>, %arg6: memref<1x2x8xf32, #tpu.memory_space<vmem>>) attributes {dimension_semantics = [#tpu.dimension_semantics<parallel>], iteration_bounds = array<i64: 2>, scalar_prefetch = 0 : i64, scratch_operands = 0 : i64, tpu.core_type = #tpu.core_type<tc>, window_params = [{transform_indices = @transform_0, window_bounds = array<i64: 1, 14, 14, 8>}, {pipeline_mode = #tpu.pipeline_mode<synchronous>, transform_indices = @transform_1, window_bounds = array<i64: 1, 1, 8>}, {pipeline_mode = #tpu.pipeline_mode<synchronous>, transform_indices = @transform_2, window_bounds = array<i64: 1, 1, 8>}, {pipeline_mode = #tpu.pipeline_mode<synchronous>, transform_indices = @transform_3, window_bounds = array<i64: 3, 24, 8>}, {transform_indices = @transform_4, window_bounds = array<i64: 1, 12, 12, 8>}, {transform_indices = @transform_5, window_bounds = array<i64: 1, 2, 8>}]} {
    %c0 = arith.constant 0 : index
    %c0_0 = arith.constant 0 : index
    %c0_1 = arith.constant 0 : index
    %c0_2 = arith.constant 0 : index
    %0 = vector.load %arg1[%c0, %c0_0, %c0_1, %c0_2] : memref<1x14x14x8xbf16, #tpu.memory_space<vmem>>, vector<1x14x14x8xbf16>
    %1 = vector.shape_cast %0 : vector<1x14x14x8xbf16> to vector<14x14x8xbf16>
    %2 = arith.extf %1 : vector<14x14x8xbf16> to vector<14x14x8xf32>
    %c0_3 = arith.constant 0 : index
    %c0_4 = arith.constant 0 : index
    %c0_5 = arith.constant 0 : index
    %3 = vector.load %arg2[%c0_3, %c0_4, %c0_5] : memref<1x1x8xf32, #tpu.memory_space<vmem>>, vector<1x1x8xf32>
    %4 = vector.broadcast %3 : vector<1x1x8xf32> to vector<14x14x8xf32>
    %5 = arith.mulf %2, %4 : vector<14x14x8xf32>
    %c0_6 = arith.constant 0 : index
    %c0_7 = arith.constant 0 : index
    %c0_8 = arith.constant 0 : index
    %6 = vector.load %arg3[%c0_6, %c0_7, %c0_8] : memref<1x1x8xf32, #tpu.memory_space<vmem>>, vector<1x1x8xf32>
    %7 = vector.broadcast %6 : vector<1x1x8xf32> to vector<14x14x8xf32>
    %8 = arith.addf %5, %7 : vector<14x14x8xf32>
    %cst = arith.constant 0.000000e+00 : f32
    %9 = vector.broadcast %cst : f32 to vector<14x14x8xf32>
    %10 = arith.maximumf %8, %9 : vector<14x14x8xf32>
    %11 = arith.truncf %10 : vector<14x14x8xf32> to vector<14x14x8xbf16>
    %12 = vector.extract_strided_slice %11 {offsets = [0, 0, 0], sizes = [14, 12, 8], strides = [1, 1, 1]} : vector<14x14x8xbf16> to vector<14x12x8xbf16>
    %13 = vector.extract_strided_slice %12 {offsets = [0, 0, 0], sizes = [12, 12, 8], strides = [1, 1, 1]} : vector<14x12x8xbf16> to vector<12x12x8xbf16>
    %14 = vector.extract_strided_slice %12 {offsets = [1, 0, 0], sizes = [12, 12, 8], strides = [1, 1, 1]} : vector<14x12x8xbf16> to vector<12x12x8xbf16>
    %15 = vector.extract_strided_slice %12 {offsets = [2, 0, 0], sizes = [12, 12, 8], strides = [1, 1, 1]} : vector<14x12x8xbf16> to vector<12x12x8xbf16>
    %16 = tpu.concatenate %13, %14, %15 in 2 : vector<12x12x8xbf16>, vector<12x12x8xbf16>, vector<12x12x8xbf16> -> vector<12x12x24xbf16>
    %17 = vector.shape_cast %16 : vector<12x12x24xbf16> to vector<144x24xbf16>
    %c0_9 = arith.constant 0 : index
    %c0_10 = arith.constant 0 : index
    %c0_11 = arith.constant 0 : index
    %18 = vector.load %arg4[%c0_9, %c0_10, %c0_11] : memref<3x24x8xbf16, #tpu.memory_space<vmem>>, vector<1x24x8xbf16>
    %19 = vector.shape_cast %18 : vector<1x24x8xbf16> to vector<24x8xbf16>
    %cst_12 = arith.constant dense<0.000000e+00> : vector<144x8xf32>
    %20 = tpu.matmul %17, %19, %cst_12 {dimension_numbers = #tpu.dot_dimension_numbers<[1], [0], [0], [1], [0, 0, 1, 1], [], []>} : vector<144x24xbf16>, vector<24x8xbf16>, vector<144x8xf32> -> vector<144x8xf32>
    %21 = vector.extract_strided_slice %11 {offsets = [0, 1, 0], sizes = [14, 12, 8], strides = [1, 1, 1]} : vector<14x14x8xbf16> to vector<14x12x8xbf16>
    %22 = vector.extract_strided_slice %21 {offsets = [0, 0, 0], sizes = [12, 12, 8], strides = [1, 1, 1]} : vector<14x12x8xbf16> to vector<12x12x8xbf16>
    %23 = vector.extract_strided_slice %21 {offsets = [1, 0, 0], sizes = [12, 12, 8], strides = [1, 1, 1]} : vector<14x12x8xbf16> to vector<12x12x8xbf16>
    %24 = vector.extract_strided_slice %21 {offsets = [2, 0, 0], sizes = [12, 12, 8], strides = [1, 1, 1]} : vector<14x12x8xbf16> to vector<12x12x8xbf16>
    %25 = tpu.concatenate %22, %23, %24 in 2 : vector<12x12x8xbf16>, vector<12x12x8xbf16>, vector<12x12x8xbf16> -> vector<12x12x24xbf16>
    %26 = vector.shape_cast %25 : vector<12x12x24xbf16> to vector<144x24xbf16>
    %c1 = arith.constant 1 : index
    %c0_13 = arith.constant 0 : index
    %c0_14 = arith.constant 0 : index
    %27 = vector.load %arg4[%c1, %c0_13, %c0_14] : memref<3x24x8xbf16, #tpu.memory_space<vmem>>, vector<1x24x8xbf16>
    %28 = vector.shape_cast %27 : vector<1x24x8xbf16> to vector<24x8xbf16>
    %cst_15 = arith.constant dense<0.000000e+00> : vector<144x8xf32>
    %29 = tpu.matmul %26, %28, %cst_15 {dimension_numbers = #tpu.dot_dimension_numbers<[1], [0], [0], [1], [0, 0, 1, 1], [], []>} : vector<144x24xbf16>, vector<24x8xbf16>, vector<144x8xf32> -> vector<144x8xf32>
    %30 = arith.addf %20, %29 : vector<144x8xf32>
    %31 = vector.extract_strided_slice %11 {offsets = [0, 2, 0], sizes = [14, 12, 8], strides = [1, 1, 1]} : vector<14x14x8xbf16> to vector<14x12x8xbf16>
    %32 = vector.extract_strided_slice %31 {offsets = [0, 0, 0], sizes = [12, 12, 8], strides = [1, 1, 1]} : vector<14x12x8xbf16> to vector<12x12x8xbf16>
    %33 = vector.extract_strided_slice %31 {offsets = [1, 0, 0], sizes = [12, 12, 8], strides = [1, 1, 1]} : vector<14x12x8xbf16> to vector<12x12x8xbf16>
    %34 = vector.extract_strided_slice %31 {offsets = [2, 0, 0], sizes = [12, 12, 8], strides = [1, 1, 1]} : vector<14x12x8xbf16> to vector<12x12x8xbf16>
    %35 = tpu.concatenate %32, %33, %34 in 2 : vector<12x12x8xbf16>, vector<12x12x8xbf16>, vector<12x12x8xbf16> -> vector<12x12x24xbf16>
    %36 = vector.shape_cast %35 : vector<12x12x24xbf16> to vector<144x24xbf16>
    %c2 = arith.constant 2 : index
    %c0_16 = arith.constant 0 : index
    %c0_17 = arith.constant 0 : index
    %37 = vector.load %arg4[%c2, %c0_16, %c0_17] : memref<3x24x8xbf16, #tpu.memory_space<vmem>>, vector<1x24x8xbf16>
    %38 = vector.shape_cast %37 : vector<1x24x8xbf16> to vector<24x8xbf16>
    %cst_18 = arith.constant dense<0.000000e+00> : vector<144x8xf32>
    %39 = tpu.matmul %36, %38, %cst_18 {dimension_numbers = #tpu.dot_dimension_numbers<[1], [0], [0], [1], [0, 0, 1, 1], [], []>} : vector<144x24xbf16>, vector<24x8xbf16>, vector<144x8xf32> -> vector<144x8xf32>
    %40 = arith.addf %30, %39 : vector<144x8xf32>
    %41 = vector.shape_cast %40 : vector<144x8xf32> to vector<12x12x8xf32>
    %42 = arith.truncf %41 : vector<12x12x8xf32> to vector<12x12x8xbf16>
    %c0_19 = arith.constant 0 : index
    %c0_20 = arith.constant 0 : index
    %c0_21 = arith.constant 0 : index
    %c0_22 = arith.constant 0 : index
    %43 = vector.load %arg5[%c0_19, %c0_20, %c0_21, %c0_22] : memref<1x12x12x8xbf16, #tpu.memory_space<vmem>>, vector<1x12x12x8xbf16>
    %44 = vector.shape_cast %43 : vector<1x12x12x8xbf16> to vector<12x12x8xbf16>
    %45 = vector.shape_cast %42 : vector<12x12x8xbf16> to vector<1x12x12x8xbf16>
    tpu.vector_store %arg5[%c0_19, %c0_20, %c0_21, %c0_22], %45 {strides = array<i32>} : memref<1x12x12x8xbf16, #tpu.memory_space<vmem>>, vector<1x12x12x8xbf16>,
    %cst_23 = arith.constant dense<0.000000e+00> : vector<8xf32>
    %46 = vector.multi_reduction <add>, %41, %cst_23 [0, 1] : vector<12x12x8xf32> to vector<8xf32>
    %47 = vector.shape_cast %46 : vector<8xf32> to vector<1x1x8xf32>
    %48 = arith.mulf %41, %41 : vector<12x12x8xf32>
    %cst_24 = arith.constant dense<0.000000e+00> : vector<8xf32>
    %49 = vector.multi_reduction <add>, %48, %cst_24 [0, 1] : vector<12x12x8xf32> to vector<8xf32>
    %50 = vector.shape_cast %49 : vector<8xf32> to vector<1x1x8xf32>
    %51 = vector.shape_cast %47 : vector<1x1x8xf32> to vector<1x8xf32>
    %c0_25 = arith.constant 0 : index
    %c0_26 = arith.constant 0 : index
    %c0_27 = arith.constant 0 : index
    %52 = vector.load %arg6[%c0_25, %c0_26, %c0_27] : memref<1x2x8xf32, #tpu.memory_space<vmem>>, vector<1x1x8xf32>
    %53 = vector.shape_cast %52 : vector<1x1x8xf32> to vector<1x8xf32>
    %54 = vector.shape_cast %51 : vector<1x8xf32> to vector<1x1x8xf32>
    tpu.vector_store %arg6[%c0_25, %c0_26, %c0_27], %54 {strides = array<i32>} : memref<1x2x8xf32, #tpu.memory_space<vmem>>, vector<1x1x8xf32>,
    %55 = vector.shape_cast %50 : vector<1x1x8xf32> to vector<1x8xf32>
    %c0_28 = arith.constant 0 : index
    %c1_29 = arith.constant 1 : index
    %c0_30 = arith.constant 0 : index
    %56 = vector.load %arg6[%c0_28, %c1_29, %c0_30] : memref<1x2x8xf32, #tpu.memory_space<vmem>>, vector<1x1x8xf32>
    %57 = vector.shape_cast %56 : vector<1x1x8xf32> to vector<1x8xf32>
    %58 = vector.shape_cast %55 : vector<1x8xf32> to vector<1x1x8xf32>
    tpu.vector_store %arg6[%c0_28, %c1_29, %c0_30], %58 {strides = array<i32>} : memref<1x2x8xf32, #tpu.memory_space<vmem>>, vector<1x1x8xf32>,
    return
  }
  func.func @transform_0(%arg0: i32) -> (i32, i32, i32, i32) {
    %c0_i32 = arith.constant 0 : i32
    %c0_i32_0 = arith.constant 0 : i32
    %c0_i32_1 = arith.constant 0 : i32
    %c0_i32_2 = arith.constant 0 : i32
    return %arg0, %c0_i32, %c0_i32_0, %c0_i32_1 : i32, i32, i32, i32
  }
  func.func @transform_1(%arg0: i32) -> (i32, i32, i32) {
    %c0_i32 = arith.constant 0 : i32
    %c0_i32_0 = arith.constant 0 : i32
    %c0_i32_1 = arith.constant 0 : i32
    %c0_i32_2 = arith.constant 0 : i32
    return %c0_i32, %c0_i32_0, %c0_i32_1 : i32, i32, i32
  }
  func.func @transform_2(%arg0: i32) -> (i32, i32, i32) {
    %c0_i32 = arith.constant 0 : i32
    %c0_i32_0 = arith.constant 0 : i32
    %c0_i32_1 = arith.constant 0 : i32
    %c0_i32_2 = arith.constant 0 : i32
    return %c0_i32, %c0_i32_0, %c0_i32_1 : i32, i32, i32
  }
  func.func @transform_3(%arg0: i32) -> (i32, i32, i32) {
    %c0_i32 = arith.constant 0 : i32
    %c0_i32_0 = arith.constant 0 : i32
    %c0_i32_1 = arith.constant 0 : i32
    %c0_i32_2 = arith.constant 0 : i32
    return %c0_i32, %c0_i32_0, %c0_i32_1 : i32, i32, i32
  }
  func.func @transform_4(%arg0: i32) -> (i32, i32, i32, i32) {
    %c0_i32 = arith.constant 0 : i32
    %c0_i32_0 = arith.constant 0 : i32
    %c0_i32_1 = arith.constant 0 : i32
    %c0_i32_2 = arith.constant 0 : i32
    return %arg0, %c0_i32, %c0_i32_0, %c0_i32_1 : i32, i32, i32, i32
  }
  func.func @transform_5(%arg0: i32) -> (i32, i32, i32) {
    %c0_i32 = arith.constant 0 : i32
    %c0_i32_0 = arith.constant 0 : i32
    %c0_i32_1 = arith.constant 0 : i32
    return %arg0, %c0_i32, %c0_i32_0 : i32, i32, i32
  }
}

module attributes {stable_mosaic.version = 11 : i64} {
  func.func @bn2_pool_kernel(%arg0: i32, %arg1: memref<1x12x12x8xbf16, #tpu.memory_space<vmem>>, %arg2: memref<1x1x8xf32, #tpu.memory_space<vmem>>, %arg3: memref<1x1x8xf32, #tpu.memory_space<vmem>>, %arg4: memref<1x6x6x8xf32, #tpu.memory_space<vmem>>) attributes {dimension_semantics = [#tpu.dimension_semantics<parallel>], iteration_bounds = array<i64: 2>, scalar_prefetch = 0 : i64, scratch_operands = 0 : i64, tpu.core_type = #tpu.core_type<tc>, window_params = [{transform_indices = @transform_0, window_bounds = array<i64: 1, 12, 12, 8>}, {pipeline_mode = #tpu.pipeline_mode<synchronous>, transform_indices = @transform_1, window_bounds = array<i64: 1, 1, 8>}, {pipeline_mode = #tpu.pipeline_mode<synchronous>, transform_indices = @transform_2, window_bounds = array<i64: 1, 1, 8>}, {transform_indices = @transform_3, window_bounds = array<i64: 1, 6, 6, 8>}]} {
    %c0 = arith.constant 0 : index
    %c0_0 = arith.constant 0 : index
    %c0_1 = arith.constant 0 : index
    %c0_2 = arith.constant 0 : index
    %0 = vector.load %arg1[%c0, %c0_0, %c0_1, %c0_2] : memref<1x12x12x8xbf16, #tpu.memory_space<vmem>>, vector<1x12x12x8xbf16>
    %1 = vector.shape_cast %0 : vector<1x12x12x8xbf16> to vector<12x12x8xbf16>
    %2 = arith.extf %1 : vector<12x12x8xbf16> to vector<12x12x8xf32>
    %c0_3 = arith.constant 0 : index
    %c0_4 = arith.constant 0 : index
    %c0_5 = arith.constant 0 : index
    %3 = vector.load %arg2[%c0_3, %c0_4, %c0_5] : memref<1x1x8xf32, #tpu.memory_space<vmem>>, vector<1x1x8xf32>
    %4 = vector.broadcast %3 : vector<1x1x8xf32> to vector<12x12x8xf32>
    %5 = arith.mulf %2, %4 : vector<12x12x8xf32>
    %c0_6 = arith.constant 0 : index
    %c0_7 = arith.constant 0 : index
    %c0_8 = arith.constant 0 : index
    %6 = vector.load %arg3[%c0_6, %c0_7, %c0_8] : memref<1x1x8xf32, #tpu.memory_space<vmem>>, vector<1x1x8xf32>
    %7 = vector.broadcast %6 : vector<1x1x8xf32> to vector<12x12x8xf32>
    %8 = arith.addf %5, %7 : vector<12x12x8xf32>
    %cst = arith.constant 0.000000e+00 : f32
    %9 = vector.broadcast %cst : f32 to vector<12x12x8xf32>
    %10 = arith.maximumf %8, %9 : vector<12x12x8xf32>
    %11 = vector.shape_cast %10 : vector<12x12x8xf32> to vector<6x2x12x8xf32>
    %12 = vector.extract_strided_slice %11 {offsets = [0, 0, 0, 0], sizes = [6, 1, 12, 8], strides = [1, 1, 1, 1]} : vector<6x2x12x8xf32> to vector<6x1x12x8xf32>
    %13 = vector.shape_cast %12 : vector<6x1x12x8xf32> to vector<6x12x8xf32>
    %14 = vector.extract_strided_slice %11 {offsets = [0, 1, 0, 0], sizes = [6, 1, 12, 8], strides = [1, 1, 1, 1]} : vector<6x2x12x8xf32> to vector<6x1x12x8xf32>
    %15 = vector.shape_cast %14 : vector<6x1x12x8xf32> to vector<6x12x8xf32>
    %16 = arith.maximumf %13, %15 : vector<6x12x8xf32>
    %17 = vector.shape_cast %16 : vector<6x12x8xf32> to vector<6x6x2x8xf32>
    %18 = vector.extract_strided_slice %17 {offsets = [0, 0, 0, 0], sizes = [6, 6, 1, 8], strides = [1, 1, 1, 1]} : vector<6x6x2x8xf32> to vector<6x6x1x8xf32>
    %19 = vector.shape_cast %18 : vector<6x6x1x8xf32> to vector<6x6x8xf32>
    %20 = vector.extract_strided_slice %17 {offsets = [0, 0, 1, 0], sizes = [6, 6, 1, 8], strides = [1, 1, 1, 1]} : vector<6x6x2x8xf32> to vector<6x6x1x8xf32>
    %21 = vector.shape_cast %20 : vector<6x6x1x8xf32> to vector<6x6x8xf32>
    %22 = arith.maximumf %19, %21 : vector<6x6x8xf32>
    %c0_9 = arith.constant 0 : index
    %c0_10 = arith.constant 0 : index
    %c0_11 = arith.constant 0 : index
    %c0_12 = arith.constant 0 : index
    %23 = vector.load %arg4[%c0_9, %c0_10, %c0_11, %c0_12] : memref<1x6x6x8xf32, #tpu.memory_space<vmem>>, vector<1x6x6x8xf32>
    %24 = vector.shape_cast %23 : vector<1x6x6x8xf32> to vector<6x6x8xf32>
    %25 = vector.shape_cast %22 : vector<6x6x8xf32> to vector<1x6x6x8xf32>
    tpu.vector_store %arg4[%c0_9, %c0_10, %c0_11, %c0_12], %25 {strides = array<i32>} : memref<1x6x6x8xf32, #tpu.memory_space<vmem>>, vector<1x6x6x8xf32>,
    return
  }
  func.func @transform_0(%arg0: i32) -> (i32, i32, i32, i32) {
    %c0_i32 = arith.constant 0 : i32
    %c0_i32_0 = arith.constant 0 : i32
    %c0_i32_1 = arith.constant 0 : i32
    %c0_i32_2 = arith.constant 0 : i32
    return %arg0, %c0_i32, %c0_i32_0, %c0_i32_1 : i32, i32, i32, i32
  }
  func.func @transform_1(%arg0: i32) -> (i32, i32, i32) {
    %c0_i32 = arith.constant 0 : i32
    %c0_i32_0 = arith.constant 0 : i32
    %c0_i32_1 = arith.constant 0 : i32
    %c0_i32_2 = arith.constant 0 : i32
    return %c0_i32, %c0_i32_0, %c0_i32_1 : i32, i32, i32
  }
  func.func @transform_2(%arg0: i32) -> (i32, i32, i32) {
    %c0_i32 = arith.constant 0 : i32
    %c0_i32_0 = arith.constant 0 : i32
    %c0_i32_1 = arith.constant 0 : i32
    %c0_i32_2 = arith.constant 0 : i32
    return %c0_i32, %c0_i32_0, %c0_i32_1 : i32, i32, i32
  }
  func.func @transform_3(%arg0: i32) -> (i32, i32, i32, i32) {
    %c0_i32 = arith.constant 0 : i32
    %c0_i32_0 = arith.constant 0 : i32
    %c0_i32_1 = arith.constant 0 : i32
    %c0_i32_2 = arith.constant 0 : i32
    return %arg0, %c0_i32, %c0_i32_0, %c0_i32_1 : i32, i32, i32, i32
  }
}

</mosaic_0001>

<bundles_post_ra>
// kernel: encoder_block_forward.5
= control target key start
LH: loop header
LB: loop body
LE: loop exit
PB: predicated region body
PF: predicated region fallthrough
CT: control target
= control target key end

     0   :  { %s1029_s12 = smov 0   ;;  %s1259_s0 = inlined_call_operand.vmem [shape: bf16[2,12,12,8], index: 0, kind: input, shape index: {}]   ;;  %s1260_s1 = inlined_call_operand.vmem [shape: f32[1,1,8], index: 1, kind: input, shape index: {}]   ;;  %s1261_s2 = inlined_call_operand.vmem [shape: f32[1,1,8], index: 2, kind: input, shape index: {}]   ;;  %s1262_s3 = inlined_call_operand.vmem [shape: f32[2,6,6,8], index: 3, kind: output, shape index: {}]  }
   0x1 LB: > { %s942_s13 = sadd.s32 4294967295, %s1006_s12   ;;  %p946_p0 = scmp.ge.s32.totalorder %s1006_s12, 1  ;;  %s1006_s12 = sphi %s1029_s12, %s13_s12  }
   0x2   : > { %p137_p1 = scmp.lt.s32.totalorder %s1006_s12, 3 }
   0x4   : > { %p138_p2 = pnand %p946_p0, %p137_p1 }
   0x5   : > { %p161_p3 = scmp.lt.s32.totalorder (!%p138_p2), %s942_s13, 1  ;;  %v333_v0 = vlaneseq (!%p138_p2)  ;;  %v1008_v1 = vmov (!%p138_p2), 1983009808   ;;  %v1048_v5 = vld [vmem:[%s1260_s1] ss:$0 sm:$0xff] (!%p138_p2)  ;;  %vm839_vm0 = vcmask (!%p138_p2), 1041409  }
   0x6   : > { %141 = sbr.rel (%p138_p2) target bundleno = 96 (0x60), region = 32  ;;  %v331_v2 = vunpack.c.l.s4 (!%p138_p2), %v1008_v1  ;;  %v1063_v18 = vld [vmem:[%s1261_s2] ss:$0 sm:$0xff] (!%p138_p2)  ;;  %vm841_vm1 = vcmask (!%p138_p2), 1042434   ;;  %vm843_vm2 = vcmask (!%p138_p2), 1043459   ;;  %vm845_vm3 = vcmask (!%p138_p2), 1044484  }
   0x7   : > { %v334_v3 = vshrl.u32 (!%p138_p2), %v333_v0, 7  ;;  %vm847_vm4 = vcmask (!%p138_p2), 1045509   ;;  %vm880_vm5 = vcmask (!%p138_p2), 62464  }
   0x8   : > { %v332_v4 = vunpack.c.0.s8 (!%p138_p2), %v331_v2 }
   0x9   : > { %v1050_v6 = vsub.s32 (!%p138_p2), 0, %v334_v3 }
   0xa   : > { %v1055_v10 = vsub.s32 (!%p138_p2), %v332_v4, %v334_v3 }
   0xd   : > { %s1264_s13 = smov (!%p161_p3, %s942_s13), 1 }
   0xe   : > { %s989_s14 = smul.u32 96, %s1264_s13 }
   0xf   : > { %s990_s22 = smul.u32 48, %s1264_s13 }
  0x10   : > { %s1043_s17 = scalar_lea.vmem %s1259_s0, %s989_s14 }
  0x11   : > { %v171_v7 = vld [vmem:[%s1043_s17] ss:$8 sps:$4 sm:$0xff]   ;;  %v172_v8 = vld [vmem:[%s1043_s17 + $0x4] sm:$0x3]  ;;  %v174_v9 = vld [vmem:[%s1043_s17 + $0xc] sm:$0x3]  ;;  %s1115_s25 = scalar_lea.vmem %s1262_s3, %s990_s22 }
  0x12   : > { %v195_v11 = vunpack.c.l.bf16 %v171_v7  ;;  %v196_v12 = vunpack.c.l.bf16 %v172_v8  ;;  %v197_v13 = vunpack.c.h.bf16 %v171_v7  ;;  %v198_v14 = vunpack.c.l.bf16 %v174_v9  ;;  %v175_v15 = vld [vmem:[%s1043_s17 + $0x10] ss:$8 sps:$4 sm:$0xff]   ;;  %v176_v16 = vld [vmem:[%s1043_s17 + $0x14] sm:$0x3]  ;;  %v178_v17 = vld [vmem:[%s1043_s17 + $0x1c] sm:$0x3] }
  0x13   : > { %v199_v19 = vunpack.c.l.bf16 %v175_v15  ;;  %v200_v20 = vunpack.c.l.bf16 %v176_v16  ;;  %v201_v21 = vunpack.c.h.bf16 %v175_v15  ;;  %v202_v22 = vunpack.c.l.bf16 %v178_v17  ;;  %v1082_v39 = vld [vmem:[%s1043_s17 + $0x20] ss:$8 sps:$4 sm:$0xff]   ;;  %v180_v40 = vld [vmem:[%s1043_s17 + $0x24] sm:$0x3]  ;;  %v1086_v45 = vld [vmem:[%s1043_s17 + $0x2c] sm:$0x3] }
  0x14   : > { %v226_v23 = vmul.f32 %v1048_v5, %v195_v11  ;;  %v227_v24 = vmul.f32 %v1048_v5, %v196_v12  ;;  %v228_v25 = vmul.f32 %v1048_v5, %v197_v13  ;;  %v229_v26 = vmul.f32 %v1048_v5, %v198_v14 }
  0x15   : > { %v230_v27 = vmul.f32 %v1048_v5, %v199_v19  ;;  %v231_v28 = vmul.f32 %v1048_v5, %v200_v20  ;;  %v232_v29 = vmul.f32 %v1048_v5, %v201_v21  ;;  %v233_v30 = vmul.f32 %v1048_v5, %v202_v22 }
  0x16   : > { %v257_v31 = vadd.f32 %v1063_v18, %v226_v23  ;;  %v258_v32 = vadd.f32 %v1063_v18, %v227_v24  ;;  %v259_v33 = vadd.f32 %v1063_v18, %v228_v25  ;;  %v260_v34 = vadd.f32 %v1063_v18, %v229_v26 }
  0x17   : > { %v261_v35 = vadd.f32 %v1063_v18, %v230_v27  ;;  %v262_v36 = vadd.f32 %v1063_v18, %v231_v28  ;;  %v263_v37 = vadd.f32 %v1063_v18, %v232_v29  ;;  %v264_v38 = vadd.f32 %v1063_v18, %v233_v30 }
  0x18   : > { %v281_v41 = vmax.f32 %v257_v31, 0.0  ;;  %v282_v42 = vmax.f32 %v258_v32, 0.0  ;;  %v283_v43 = vmax.f32 %v259_v33, 0.0  ;;  %v284_v44 = vmax.f32 %v260_v34, 0.0 }
  0x19   : > { %v285_v46 = vmax.f32 %v261_v35, 0.0  ;;  %v286_v47 = vmax.f32 %v262_v36, 0.0  ;;  %v287_v48 = vmax.f32 %v263_v37, 0.0  ;;  %v288_v49 = vmax.f32 %v264_v38, 0.0 }
  0x1a   : > { %v305_v50 = vmax.f32 %v281_v41, %v283_v43  ;;  %v306_v51 = vmax.f32 %v282_v42, %v284_v44  ;;  %v203_v52 = vunpack.c.l.bf16 %v1082_v39  ;;  %v204_v53 = vunpack.c.l.bf16 %v180_v40 }
  0x1b   : > { %v307_v54 = vmax.f32 %v285_v46, %v287_v48  ;;  %v308_v55 = vmax.f32 %v286_v47, %v288_v49  ;;  %v205_v56 = vunpack.c.h.bf16 %v1082_v39  ;;  %v206_v57 = vunpack.c.l.bf16 %v1086_v45 }
  0x1c   : > { %v329_v58 = vcombine.high %v305_v50, %v305_v50  ;;  %v336_v59 = vrot.slane %v305_v50, %v1055_v10  ;;  %v352_v60 = vrot.slane %v306_v51, %v1055_v10  ;;  %v1094_v61 = vmul.f32 %v1048_v5, %v203_v52  ;;  %v183_v52 = vld [vmem:[%s1043_s17 + $0x30] ss:$8 sps:$4 sm:$0xff]  }
  0x1d   : > { %v354_v62 = vcombine.high %v307_v54, %v307_v54  ;;  %v361_v63 = vrot.slane %v307_v54, %v1055_v10  ;;  %v377_v0 = vrot.slane %v308_v55, %v1055_v10  ;;  %v1099_v1 = vmul.f32 %v1048_v5, %v204_v53 }
  0x1e   : > { %v343_v2 = vrot.slane %v329_v58, %v1055_v10  ;;  %v344_v3 = vcombine.high %v336_v59, %v336_v59  ;;  %v353_v4 = vcombine.high %v352_v60, %v352_v60  ;;  %v951_v7 = vrot.slane %v336_v59, 9 }
  0x1f   : > { %v955_v8 = vrot.slane %v352_v60, 9  ;;  %v368_v9 = vrot.slane %v354_v62, %v1055_v10  ;;  %v369_v11 = vcombine.high %v361_v63, %v361_v63  ;;  %v378_v12 = vcombine.high %v377_v0, %v377_v0 }
  0x20   : > { %v345_v13 = vcombine.high %v343_v2, %v343_v2  ;;  %v952_v14 = vrot.slane %v344_v3, 9  ;;  %v953_v15 = vrot.slane %v343_v2, 9  ;;  %v956_v16 = vrot.slane %v353_v4, 9 }
  0x21   : > { %v623_v17 = vmax.f32 %v336_v59, %v951_v7  ;;  %v627_v19 = vmax.f32 %v352_v60, %v955_v8  ;;  %v370_v20 = vcombine.high %v368_v9, %v368_v9  ;;  %v957_v21 = vrot.slane %v361_v63, 9  ;;  %v184_v59 = vld [vmem:[%s1043_s17 + $0x34] sm:$0x3]  ;;  %v186_v7 = vld [vmem:[%s1043_s17 + $0x3c] sm:$0x3] }
  0x22   : > { %v954_v22 = vrot.slane %v345_v13, 9  ;;  %v624_v23 = vmax.f32 %v344_v3, %v952_v14  ;;  %v625_v24 = vmax.f32 %v343_v2, %v953_v15  ;;  %v628_v25 = vmax.f32 %v353_v4, %v956_v16  ;;  %v1151_v14 = vld [vmem:[%s1043_s17 + $0x44] sm:$0x3] }
  0x23   : > { %v698_v26 = vrot.slane %v623_v17, %v1050_v6  ;;  %v714_v27 = vrot.slane %v627_v19, %v1050_v6  ;;  %v958_v28 = vrot.slane %v369_v11, 9  ;;  %v959_v29 = vrot.slane %v368_v9, 9 }
  0x24   : > { %v626_v30 = vmax.f32 %v345_v13, %v954_v22  ;;  %v702_v31 = vrot.slane %v624_v23, %v1050_v6  ;;  %v706_v32 = vrot.slane %v625_v24, %v1050_v6  ;;  %v718_v33 = vrot.slane %v628_v25, %v1050_v6 }
  0x25   : > { %v960_v34 = vrot.slane %v370_v20, 9  ;;  %v961_v35 = vrot.slane %v377_v0, 9  ;;  %v962_v36 = vrot.slane %v378_v12, 9  ;;  %v629_v37 = vmax.f32 %v361_v63, %v957_v21 }
  0x26   : > { %v710_v38 = vrot.slane %v626_v30, %v1050_v6  ;;  %v840_v40 = vsel %vm839_vm0, %v702_v31, %v698_v26  ;;  %v630_v41 = vmax.f32 %v369_v11, %v958_v28  ;;  %v631_v42 = vmax.f32 %v368_v9, %v959_v29  ;;  %v1147_v9 = vld [vmem:[%s1043_s17 + $0x40] ss:$8 sps:$4 sm:$0xff]   ;;  %v1162_v26 = vld [vmem:[%s1043_s17 + $0x4c] sm:$0x3] }
  0x27   : > { %v842_v43 = vsel %vm841_vm1, %v706_v32, %v840_v40  ;;  %v632_v44 = vmax.f32 %v370_v20, %v960_v34  ;;  %v633_v46 = vmax.f32 %v377_v0, %v961_v35  ;;  %v634_v47 = vmax.f32 %v378_v12, %v962_v36 }
  0x28   : > { %v844_v48 = vsel %vm843_vm2, %v710_v38, %v842_v43  ;;  %v722_v49 = vrot.slane %v629_v37, %v1050_v6  ;;  %v726_v50 = vrot.slane %v630_v41, %v1050_v6  ;;  %v730_v51 = vrot.slane %v631_v42, %v1050_v6 }
  0x29   : > { %v846_v53 = vsel %vm845_vm3, %v714_v27, %v844_v48  ;;  %v734_v54 = vrot.slane %v632_v44, %v1050_v6  ;;  %v738_v55 = vrot.slane %v633_v46, %v1050_v6  ;;  %v742_v58 = vrot.slane %v634_v47, %v1050_v6 }
  0x2a   : > { %v848_v60 = vsel %vm847_vm4, %v718_v33, %v846_v53  ;;  %v849_v62 = vsel %vm839_vm0, %v726_v50, %v722_v49  ;;  %v236_v63 = vmul.f32 %v1048_v5, %v205_v56  ;;  %v237_v0 = vmul.f32 %v1048_v5, %v206_v57 }
  0x2b   : > { %881 = vst.msk [vmem:[%s1115_s25] sm:$0x3f] %vm880_vm5, %v848_v60  ;;  %v850_v2 = vsel %vm841_vm1, %v730_v51, %v849_v62  ;;  %v265_v3 = vadd.f32 %v1063_v18, %v1094_v61  ;;  %v266_v4 = vadd.f32 %v1063_v18, %v1099_v1  ;;  %v207_v39 = vunpack.c.l.bf16 %v183_v52 }
  0x2c   : > { %v851_v56 = vsel %vm843_vm2, %v734_v54, %v850_v2  ;;  %v267_v45 = vadd.f32 %v1063_v18, %v236_v63  ;;  %v268_v57 = vadd.f32 %v1063_v18, %v237_v0  ;;  %v208_v8 = vunpack.c.l.bf16 %v184_v59 }
  0x2d   : > { %v852_v11 = vsel %vm845_vm3, %v738_v55, %v851_v56  ;;  %v289_v12 = vmax.f32 %v265_v3, 0.0  ;;  %v290_v61 = vmax.f32 %v266_v4, 0.0  ;;  %v209_v13 = vunpack.c.h.bf16 %v183_v52 }
  0x2e   : > { %v853_v1 = vsel %vm847_vm4, %v742_v58, %v852_v11  ;;  %v291_v15 = vmax.f32 %v267_v45, 0.0  ;;  %v292_v16 = vmax.f32 %v268_v57, 0.0  ;;  %v210_v17 = vunpack.c.l.bf16 %v186_v7 }
  0x2f   : > { %882 = vst.msk [vmem:[%s1115_s25 + $0x8] sm:$0x3f] %vm880_vm5, %v853_v1  ;;  %v238_v19 = vmul.f32 %v1048_v5, %v207_v39  ;;  %v239_v20 = vmul.f32 %v1048_v5, %v208_v8  ;;  %v240_v21 = vmul.f32 %v1048_v5, %v209_v13  ;;  %v211_v22 = vunpack.c.l.bf16 %v1147_v9 }
  0x30   : > { %v309_v23 = vmax.f32 %v289_v12, %v291_v15  ;;  %v310_v24 = vmax.f32 %v290_v61, %v292_v16  ;;  %v241_v25 = vmul.f32 %v1048_v5, %v210_v17  ;;  %v212_v27 = vunpack.c.l.bf16 %v1151_v14 }
  0x31   : > { %v269_v28 = vadd.f32 %v1063_v18, %v238_v19  ;;  %v270_v29 = vadd.f32 %v1063_v18, %v239_v20  ;;  %v271_v30 = vadd.f32 %v1063_v18, %v240_v21  ;;  %v213_v31 = vunpack.c.h.bf16 %v1147_v9 }
  0x32   : > { %v379_v32 = vcombine.high %v309_v23, %v309_v23  ;;  %v386_v33 = vrot.slane %v309_v23, %v1055_v10  ;;  %v402_v34 = vrot.slane %v310_v24, %v1055_v10  ;;  %v272_v35 = vadd.f32 %v1063_v18, %v241_v25 }
  0x33   : > { %v293_v36 = vmax.f32 %v269_v28, 0.0  ;;  %v294_v37 = vmax.f32 %v270_v29, 0.0  ;;  %v295_v38 = vmax.f32 %v271_v30, 0.0  ;;  %v214_v40 = vunpack.c.l.bf16 %v1162_v26 }
  0x34   : > { %v393_v41 = vrot.slane %v379_v32, %v1055_v10  ;;  %v394_v42 = vcombine.high %v386_v33, %v386_v33  ;;  %v403_v43 = vcombine.high %v402_v34, %v402_v34  ;;  %v963_v44 = vrot.slane %v386_v33, 9 }
  0x35   : > { %v967_v46 = vrot.slane %v402_v34, 9  ;;  %v296_v47 = vmax.f32 %v272_v35, 0.0  ;;  %v311_v48 = vmax.f32 %v293_v36, %v295_v38  ;;  %v242_v49 = vmul.f32 %v1048_v5, %v211_v22 }
  0x36   : > { %v395_v50 = vcombine.high %v393_v41, %v393_v41  ;;  %v964_v51 = vrot.slane %v394_v42, 9  ;;  %v965_v52 = vrot.slane %v393_v41, 9  ;;  %v968_v53 = vrot.slane %v403_v43, 9 }
  0x37   : > { %v635_v54 = vmax.f32 %v386_v33, %v963_v44  ;;  %v639_v55 = vmax.f32 %v402_v34, %v967_v46  ;;  %v312_v58 = vmax.f32 %v294_v37, %v296_v47  ;;  %v404_v59 = vcombine.high %v311_v48, %v311_v48  ;;  %v191_v34 = vld [vmem:[%s1043_s17 + $0x50] ss:$8 sps:$4 sm:$0xff]   ;;  %v192_v46 = vld [vmem:[%s1043_s17 + $0x54] sm:$0x3] }
  0x38   : > { %v966_v60 = vrot.slane %v395_v50, 9  ;;  %v636_v62 = vmax.f32 %v394_v42, %v964_v51  ;;  %v637_v63 = vmax.f32 %v393_v41, %v965_v52  ;;  %v640_v0 = vmax.f32 %v403_v43, %v968_v53  ;;  %v194_v51 = vld [vmem:[%s1043_s17 + $0x5c] sm:$0x3] }
  0x39   : > { %v746_v2 = vrot.slane %v635_v54, %v1050_v6  ;;  %v762_v3 = vrot.slane %v639_v55, %v1050_v6  ;;  %v411_v4 = vrot.slane %v311_v48, %v1055_v10  ;;  %v418_v7 = vrot.slane %v404_v59, %v1055_v10 }
  0x3a   : > { %v638_v39 = vmax.f32 %v395_v50, %v966_v60  ;;  %v750_v56 = vrot.slane %v636_v62, %v1050_v6  ;;  %v754_v45 = vrot.slane %v637_v63, %v1050_v6  ;;  %v766_v57 = vrot.slane %v640_v0, %v1050_v6 }
  0x3b   : > { %v419_v8 = vcombine.high %v411_v4, %v411_v4  ;;  %v420_v11 = vcombine.high %v418_v7, %v418_v7  ;;  %v427_v12 = vrot.slane %v312_v58, %v1055_v10  ;;  %v969_v61 = vrot.slane %v411_v4, 9 }
  0x3c   : > { %v758_v13 = vrot.slane %v638_v39, %v1050_v6  ;;  %v854_v14 = vsel %vm839_vm0, %v750_v56, %v746_v2  ;;  %v971_v1 = vrot.slane %v418_v7, 9  ;;  %v243_v15 = vmul.f32 %v1048_v5, %v212_v27 }
  0x3d   : > { %v855_v16 = vsel %vm841_vm1, %v754_v45, %v854_v14  ;;  %v428_v17 = vcombine.high %v427_v12, %v427_v12  ;;  %v970_v19 = vrot.slane %v419_v8, 9  ;;  %v972_v20 = vrot.slane %v420_v11, 9 }
  0x3e   : > { %v856_v21 = vsel %vm843_vm2, %v758_v13, %v855_v16  ;;  %v973_v22 = vrot.slane %v427_v12, 9  ;;  %v641_v23 = vmax.f32 %v411_v4, %v969_v61  ;;  %v643_v24 = vmax.f32 %v418_v7, %v971_v1 }
  0x3f   : > { %v857_v25 = vsel %vm845_vm3, %v762_v3, %v856_v21  ;;  %v974_v26 = vrot.slane %v428_v17, 9  ;;  %v642_v28 = vmax.f32 %v419_v8, %v970_v19  ;;  %v644_v29 = vmax.f32 %v420_v11, %v972_v20 }
  0x40   : > { %v858_v27 = vsel %vm847_vm4, %v766_v57, %v857_v25  ;;  %v645_v30 = vmax.f32 %v427_v12, %v973_v22  ;;  %v770_v32 = vrot.slane %v641_v23, %v1050_v6  ;;  %v778_v33 = vrot.slane %v643_v24, %v1050_v6 }
  0x41   : > { %883 = vst.msk [vmem:[%s1115_s25 + $0x10] sm:$0x3f] %vm880_vm5, %v858_v27  ;;  %v646_v35 = vmax.f32 %v428_v17, %v974_v26  ;;  %v774_v36 = vrot.slane %v642_v28, %v1050_v6  ;;  %v782_v37 = vrot.slane %v644_v29, %v1050_v6  ;;  %v244_v38 = vmul.f32 %v1048_v5, %v213_v31 }
  0x42   : > { %v786_v41 = vrot.slane %v645_v30, %v1050_v6  ;;  %v245_v42 = vmul.f32 %v1048_v5, %v214_v40  ;;  %v273_v43 = vadd.f32 %v1063_v18, %v242_v49  ;;  %v274_v44 = vadd.f32 %v1063_v18, %v243_v15 }
  0x43   : > { %v790_v47 = vrot.slane %v646_v35, %v1050_v6  ;;  %v859_v48 = vsel %vm839_vm0, %v774_v36, %v770_v32  ;;  %v275_v50 = vadd.f32 %v1063_v18, %v244_v38  ;;  %v215_v52 = vunpack.c.l.bf16 %v191_v34 }
  0x44   : > { %v860_v9 = vsel %vm841_vm1, %v778_v33, %v859_v48  ;;  %v276_v31 = vadd.f32 %v1063_v18, %v245_v42  ;;  %v297_v53 = vmax.f32 %v273_v43, 0.0  ;;  %v298_v40 = vmax.f32 %v274_v44, 0.0 }
  0x45   : > { %v861_v49 = vsel %vm843_vm2, %v782_v37, %v860_v9  ;;  %v299_v54 = vmax.f32 %v275_v50, 0.0  ;;  %v216_v55 = vunpack.c.l.bf16 %v192_v46  ;;  %v217_v58 = vunpack.c.h.bf16 %v191_v34 }
  0x46   : > { %v862_v59 = vsel %vm845_vm3, %v786_v41, %v861_v49  ;;  %v300_v60 = vmax.f32 %v276_v31, 0.0  ;;  %v218_v62 = vunpack.c.l.bf16 %v194_v51  ;;  %v246_v63 = vmul.f32 %v1048_v5, %v215_v52 }
  0x47   : > { %v863_v0 = vsel %vm847_vm4, %v790_v47, %v862_v59  ;;  %v313_v2 = vmax.f32 %v297_v53, %v299_v54  ;;  %v247_v3 = vmul.f32 %v1048_v5, %v216_v55  ;;  %v248_v4 = vmul.f32 %v1048_v5, %v217_v58 }
  0x48   : > { %884 = vst.msk [vmem:[%s1115_s25 + $0x18] sm:$0x3f] %vm880_vm5, %v863_v0  ;;  %v314_v7 = vmax.f32 %v298_v40, %v300_v60  ;;  %v249_v39 = vmul.f32 %v1048_v5, %v218_v62  ;;  %v277_v56 = vadd.f32 %v1063_v18, %v246_v63 }
  0x49   : > { %v429_v45 = vcombine.high %v313_v2, %v313_v2  ;;  %v436_v57 = vrot.slane %v313_v2, %v1055_v10  ;;  %v278_v8 = vadd.f32 %v1063_v18, %v247_v3  ;;  %v279_v11 = vadd.f32 %v1063_v18, %v248_v4 }
  0x4a   : > { %v452_v12 = vrot.slane %v314_v7, %v1055_v10  ;;  %v280_v61 = vadd.f32 %v1063_v18, %v249_v39  ;;  %v301_v13 = vmax.f32 %v277_v56, 0.0 }
  0x4b   : > { %v443_v14 = vrot.slane %v429_v45, %v1055_v10  ;;  %v444_v1 = vcombine.high %v436_v57, %v436_v57  ;;  %v975_v15 = vrot.slane %v436_v57, 9  ;;  %v302_v16 = vmax.f32 %v278_v8, 0.0 }
  0x4c   : > { %v453_v5 = vcombine.high %v452_v12, %v452_v12  ;;  %v979_v17 = vrot.slane %v452_v12, 9  ;;  %v303_v19 = vmax.f32 %v279_v11, 0.0  ;;  %v304_v20 = vmax.f32 %v280_v61, 0.0 }
  0x4d   : > { %v445_v21 = vcombine.high %v443_v14, %v443_v14  ;;  %v976_v22 = vrot.slane %v444_v1, 9  ;;  %v977_v23 = vrot.slane %v443_v14, 9  ;;  %v647_v24 = vmax.f32 %v436_v57, %v975_v15 }
  0x4e   : > { %v980_v25 = vrot.slane %v453_v5, 9  ;;  %v651_v26 = vmax.f32 %v452_v12, %v979_v17  ;;  %v315_v28 = vmax.f32 %v301_v13, %v303_v19  ;;  %v316_v29 = vmax.f32 %v302_v16, %v304_v20 }
  0x4f   : > { %v978_v27 = vrot.slane %v445_v21, 9  ;;  %v648_v18 = vmax.f32 %v444_v1, %v976_v22  ;;  %v649_v30 = vmax.f32 %v443_v14, %v977_v23  ;;  %v794_v32 = vrot.slane %v647_v24, %v1050_v6 }
  0x50   : > { %v652_v33 = vmax.f32 %v453_v5, %v980_v25  ;;  %v810_v34 = vrot.slane %v651_v26, %v1050_v6  ;;  %v454_v35 = vcombine.high %v315_v28, %v315_v28  ;;  %v461_v36 = vrot.slane %v315_v28, %v1055_v10 }
  0x51   : > { %v650_v37 = vmax.f32 %v445_v21, %v978_v27  ;;  %v798_v38 = vrot.slane %v648_v18, %v1050_v6  ;;  %v802_v41 = vrot.slane %v649_v30, %v1050_v6  ;;  %v477_v42 = vrot.slane %v316_v29, %v1055_v10 }
  0x52   : > { %v814_v43 = vrot.slane %v652_v33, %v1050_v6  ;;  %v468_v44 = vrot.slane %v454_v35, %v1055_v10  ;;  %v469_v46 = vcombine.high %v461_v36, %v461_v36  ;;  %v981_v47 = vrot.slane %v461_v36, 9 }
  0x53   : > { %v806_v48 = vrot.slane %v650_v37, %v1050_v6  ;;  %v864_v50 = vsel %vm839_vm0, %v798_v38, %v794_v32  ;;  %v478_v51 = vcombine.high %v477_v42, %v477_v42  ;;  %v985_v52 = vrot.slane %v477_v42, 9 }
  0x54   : > { %v865_v9 = vsel %vm841_vm1, %v802_v41, %v864_v50  ;;  %v470_v31 = vcombine.high %v468_v44, %v468_v44  ;;  %v982_v53 = vrot.slane %v469_v46, 9  ;;  %v983_v40 = vrot.slane %v468_v44, 9 }
  0x55   : > { %v866_v49 = vsel %vm843_vm2, %v806_v48, %v865_v9  ;;  %v986_v54 = vrot.slane %v478_v51, 9  ;;  %v653_v55 = vmax.f32 %v461_v36, %v981_v47  ;;  %v657_v58 = vmax.f32 %v477_v42, %v985_v52 }
  0x56   : > { %v867_v10 = vsel %vm845_vm3, %v810_v34, %v866_v49  ;;  %v984_v59 = vrot.slane %v470_v31, 9  ;;  %v654_v60 = vmax.f32 %v469_v46, %v982_v53  ;;  %v655_v62 = vmax.f32 %v468_v44, %v983_v40 }
  0x57   : > { %v868_v63 = vsel %vm847_vm4, %v814_v43, %v867_v10  ;;  %v658_v0 = vmax.f32 %v478_v51, %v986_v54  ;;  %v818_v2 = vrot.slane %v653_v55, %v1050_v6  ;;  %v834_v39 = vrot.slane %v657_v58, %v1050_v6 }
  0x58   : > { %885 = vst.msk [vmem:[%s1115_s25 + $0x20] sm:$0x3f] %vm880_vm5, %v868_v63  ;;  %v656_v3 = vmax.f32 %v470_v31, %v984_v59  ;;  %v822_v4 = vrot.slane %v654_v60, %v1050_v6  ;;  %v826_v7 = vrot.slane %v655_v62, %v1050_v6 }
  0x59   : > { %v838_v45 = vrot.slane %v658_v0, %v1050_v6 }
  0x5a   : > { %v830_v56 = vrot.slane %v656_v3, %v1050_v6  ;;  %v869_v57 = vsel %vm839_vm0, %v822_v4, %v818_v2 }
  0x5b   : > { %v870_v8 = vsel %vm841_vm1, %v826_v7, %v869_v57 }
  0x5c   : > { %v871_v11 = vsel %vm843_vm2, %v830_v56, %v870_v8 }
  0x5d   : > { %v872_v12 = vsel %vm845_vm3, %v834_v39, %v871_v11 }
  0x5e   : > { %v873_v61 = vsel %vm847_vm4, %v838_v45, %v872_v12 }
  0x5f   : > { %886 = vst.msk [vmem:[%s1115_s25 + $0x28] sm:$0x3f] %vm880_vm5, %v873_v61 }
  0x60 PF: > { %s13_s12 = sadd.s32 1, %s1006_s12  }
  0x61   : > { %p10_p4 = scmp.ge.s32.totalorder %s13_s12, 4  }
  0x63   :  { %12 = sbr.rel (!%p10_p4) target bundleno = 1 (0x1), region = 62 }

// kernel: encoder_block_forward.4
= control target key start
LH: loop header
LB: loop body
LE: loop exit
PB: predicated region body
PF: predicated region fallthrough
CT: control target
= control target key end

     0   :  { %s3073_s18 = smov 0   ;;  %s4253_s0 = inlined_call_operand.vmem [shape: bf16[2,14,14,8], index: 0, kind: input, shape index: {}]   ;;  %s4254_s1 = inlined_call_operand.vmem [shape: f32[1,1,8], index: 1, kind: input, shape index: {}]   ;;  %s4255_s2 = inlined_call_operand.vmem [shape: f32[1,1,8], index: 2, kind: input, shape index: {}]   ;;  %s4256_s3 = inlined_call_operand.vmem [shape: bf16[3,24,8], index: 3, kind: input, shape index: {}]   ;;  %s4257_s4 = inlined_call_operand.vmem [shape: bf16[2,12,12,8], index: 4, kind: output, shape index: {0}]   ;;  %s4258_s5 = inlined_call_operand.vmem [shape: f32[2,2,8], index: 5, kind: output, shape index: {1}]  }
   0x1 LB: > { %s2687_s19 = sadd.s32 4294967295, %s3036_s18   ;;  %p2691_p0 = scmp.ge.s32.totalorder %s3036_s18, 1  ;;  %s3036_s18 = sphi %s3073_s18, %s16_s18  }
   0x2   : > { %p190_p1 = scmp.lt.s32.totalorder %s3036_s18, 3 }
   0x4   : > { %p191_p2 = pnand %p2691_p0, %p190_p1 }
   0x6   : > { %194 = sbr.rel (%p191_p2) target bundleno = 561 (0x231), region = 36 }
   0xd   : > { %p222_p3 = scmp.lt.s32.totalorder %s2687_s19, 1  ;;  %v3092_v0 = vld [vmem:[%s4254_s1] ss:$0 sm:$0xff]  ;;  %s3038_s28 = smov 8   ;;  %vm1356_vm0 = vcmask 1043456   ;;  %vm3041_vm1 = vmmov 0  }
   0xe   : > { %v3103_v11 = vld [vmem:[%s4255_s2] ss:$0 sm:$0xff]  ;;  %s3039_s29 = smov 16   ;;  %vm466_vm2 = vcmask 64512   ;;  %vm503_vm3 = vcmask 130048   ;;  %vm1762_vm4 = vcmask 1040384  }
   0xf   : > { %s4366_s19 = smov (!%p222_p3, %s2687_s19), 1  ;;  %vm1763_vm5 = vcmask 1042434   ;;  %vm1765_vm7 = vcmask 1044484   ;;  %vm1767_vm9 = vcmask 1046534   ;;  %vm1328_vm11 = vcmask 195584  }
  0x10   : > { %s3009_s20 = smul.u32 112, %s4366_s19  ;;  %vm1764_vm6 = vmor %vm1762_vm4, %vm1763_vm5  ;;  %vm747_vm12 = vsmask.f32 1280  ;;  %vm748_vm13 = vsmask.f32 3336 }
  0x11   : > { %vm3306_vm8 = vmor %vm1764_vm6, %vm1765_vm7  ;;  %vm750_vm14 = vsmask.f32 5392  ;;  %vm752_vm15 = vsmask.f32 7448  ;;  %s3010_s17 = smul.u32 96, %s4366_s19  ;;  %vm2598_vm6 = vcmask 57344  }
  0x12   : > { %s3087_s23 = scalar_lea.vmem %s4253_s0, %s3009_s20  ;;  %vm3330_vm10 = vmor %vm3306_vm8, %vm1767_vm9 }
  0x13   : > { %v241_v1 = vld [vmem:[%s3087_s23 + $0x8] ss:$8 sps:$4 sm:$0xff]   ;;  %v242_v2 = vld [vmem:[%s3087_s23 + $0x14] sm:$0x7]  ;;  %v240_v3 = vld [vmem:[%s3087_s23 + $0xc] sm:$0x7]  ;;  %s4138_s22 = scalar_lea.vmem %s4257_s4, %s3010_s17 }
  0x14   : > { %v269_v4 = vunpack.c.h.bf16 %v241_v1  ;;  %v270_v5 = vunpack.c.l.bf16 %v242_v2  ;;  %v267_v6 = vunpack.c.l.bf16 %v241_v1  ;;  %v268_v7 = vunpack.c.l.bf16 %v240_v3  ;;  %v243_v8 = vld [vmem:[%s3087_s23 + $0x18] ss:$8 sps:$4 sm:$0xff]   ;;  %v244_v9 = vld [vmem:[%s3087_s23 + $0x1c] sm:$0x7]  ;;  %v246_v10 = vld [vmem:[%s3087_s23 + $0x24] sm:$0x7] }
  0x15   : > { %v271_v12 = vunpack.c.l.bf16 %v243_v8  ;;  %v272_v13 = vunpack.c.l.bf16 %v244_v9  ;;  %v273_v14 = vunpack.c.h.bf16 %v243_v8  ;;  %v274_v15 = vunpack.c.l.bf16 %v246_v10  ;;  %v247_v32 = vld [vmem:[%s3087_s23 + $0x28] ss:$8 sps:$4 sm:$0xff]   ;;  %v248_v33 = vld [vmem:[%s3087_s23 + $0x2c] sm:$0x7]  ;;  %v250_v34 = vld [vmem:[%s3087_s23 + $0x34] sm:$0x7] }
  0x16   : > { %v304_v16 = vmul.f32 %v3092_v0, %v269_v4  ;;  %v305_v17 = vmul.f32 %v3092_v0, %v270_v5  ;;  %v302_v18 = vmul.f32 %v3092_v0, %v267_v6  ;;  %v303_v19 = vmul.f32 %v3092_v0, %v268_v7  ;;  %v251_v39 = vld [vmem:[%s3087_s23 + $0x38] ss:$8 sps:$4 sm:$0xff]   ;;  %v252_v43 = vld [vmem:[%s3087_s23 + $0x3c] sm:$0x7]  ;;  %v254_v48 = vld [vmem:[%s3087_s23 + $0x44] sm:$0x7] }
  0x17   : > { %v306_v20 = vmul.f32 %v3092_v0, %v271_v12  ;;  %v307_v21 = vmul.f32 %v3092_v0, %v272_v13  ;;  %v308_v22 = vmul.f32 %v3092_v0, %v273_v14  ;;  %v309_v23 = vmul.f32 %v3092_v0, %v274_v15  ;;  %v255_v9 = vld [vmem:[%s3087_s23 + $0x48] ss:$8 sps:$4 sm:$0xff]   ;;  %v256_v10 = vld [vmem:[%s3087_s23 + $0x4c] sm:$0x7] }
  0x18   : > { %v339_v24 = vadd.f32 %v3103_v11, %v304_v16  ;;  %v340_v25 = vadd.f32 %v3103_v11, %v305_v17  ;;  %v337_v26 = vadd.f32 %v3103_v11, %v302_v18  ;;  %v338_v27 = vadd.f32 %v3103_v11, %v303_v19 }
  0x19   : > { %v341_v28 = vadd.f32 %v3103_v11, %v306_v20  ;;  %v342_v29 = vadd.f32 %v3103_v11, %v307_v21  ;;  %v343_v30 = vadd.f32 %v3103_v11, %v308_v22  ;;  %v344_v31 = vadd.f32 %v3103_v11, %v309_v23  ;;  %v258_v21 = vld [vmem:[%s3087_s23 + $0x54] sm:$0x7] }
  0x1a   : > { %v367_v35 = vmax.f32 %v339_v24, 0.0  ;;  %v368_v36 = vmax.f32 %v340_v25, 0.0  ;;  %v365_v37 = vmax.f32 %v337_v26, 0.0  ;;  %v366_v38 = vmax.f32 %v338_v27, 0.0  ;;  %v259_v25 = vld [vmem:[%s3087_s23 + $0x58] ss:$8 sps:$4 sm:$0xff]  }
  0x1b   : > { %v369_v40 = vmax.f32 %v341_v28, 0.0  ;;  %v370_v41 = vmax.f32 %v342_v29, 0.0  ;;  %v371_v42 = vmax.f32 %v343_v30, 0.0  ;;  %v275_v46 = vunpack.c.l.bf16 %v247_v32  ;;  %v260_v26 = vld [vmem:[%s3087_s23 + $0x5c] sm:$0x7] }
  0x1c   : > { %v3126_v44 = vpack.c.bf16 %v368_v36, %v367_v35  ;;  %v3128_v45 = vpack.c.bf16 %v366_v38, %v365_v37  ;;  %v276_v47 = vunpack.c.l.bf16 %v248_v33  ;;  %v372_v50 = vmax.f32 %v344_v31, 0.0  ;;  %v238_v35 = vld [vmem:[%s3087_s23 + $0x4] sm:$0x7] }
  0x1d   : > { %v3131_v49 = vpack.c.bf16 %v370_v41, %v369_v40  ;;  %v277_v51 = vunpack.c.h.bf16 %v247_v32  ;;  %v278_v52 = vunpack.c.l.bf16 %v250_v34  ;;  %v310_v53 = vmul.f32 %v3092_v0, %v275_v46  ;;  %v262_v38 = vld [vmem:[%s3087_s23 + $0x64] sm:$0x7] }
  0x1e   : > { %419 = vrot.lane.b32.xlu1 %v3126_v44, %s3038_s28  ;;  %417 = vrot.lane.b32.xlu0 %v3128_v45, %s3038_s28  ;;  %v311_v54 = vmul.f32 %v3092_v0, %v276_v47  ;;  %v279_v55 = vunpack.c.l.bf16 %v251_v39  ;;  %v280_v56 = vunpack.c.l.bf16 %v252_v43  ;;  %v281_v59 = vunpack.c.h.bf16 %v251_v39 }
  0x1f   : > { %v312_v57 = vmul.f32 %v3092_v0, %v277_v51  ;;  %v313_v58 = vmul.f32 %v3092_v0, %v278_v52  ;;  %v282_v60 = vunpack.c.l.bf16 %v254_v48  ;;  %v345_v61 = vadd.f32 %v3103_v11, %v310_v53 }
  0x20   : > { %v346_v62 = vadd.f32 %v3103_v11, %v311_v54  ;;  %v314_v1 = vmul.f32 %v3092_v0, %v279_v55  ;;  %v315_v2 = vmul.f32 %v3092_v0, %v280_v56  ;;  %v3150_v3 = vpack.c.bf16 %v372_v50, %v371_v42  ;;  %v263_v42 = vld [vmem:[%s3087_s23] ss:$104 sps:$4 sm:$0xff]   ;;  %v3026_v55 = vld [vmem:[%s4256_s3 + $0xc] sm:$0xff]  }
  0x21   : > { %v347_v63 = vadd.f32 %v3103_v11, %v312_v57  ;;  %v373_v4 = vmax.f32 %v345_v61, 0.0  ;;  %v348_v6 = vadd.f32 %v3103_v11, %v313_v58  ;;  %v316_v7 = vmul.f32 %v3092_v0, %v281_v59  ;;  %v3196_v50 = vld [vmem:[%s4256_s3] sm:$0xff]   ;;  %v3025_v54 = vld [vmem:[%s4256_s3 + $0x8] ss:$0 sps:$4 sm:$0xff]  }
  0x22   : > { %444 = vrot.lane.b32.xlu1 %v3131_v49, %s3039_s29  ;;  %442 = vrot.lane.b32.xlu0 %v3126_v44, %s3039_s29  ;;  %v374_v5 = vmax.f32 %v346_v62, 0.0  ;;  %v317_v8 = vmul.f32 %v3092_v0, %v282_v60  ;;  %v349_v13 = vadd.f32 %v3103_v11, %v314_v1  ;;  %v350_v14 = vadd.f32 %v3103_v11, %v315_v2  ;;  %v3028_v60 = vld [vmem:[%s4256_s3 + $0x14] ss:$0 sps:$4 sm:$0xff]   ;;  %v264_v2 = vld [vmem:[%s3087_s23 + $0x6c] sm:$0x7]  ;;  %s2694_s23 = sshll.u32 %s4366_s19, 1 }
  0x23   : > { %v375_v12 = vmax.f32 %v347_v63, 0.0  ;;  %v376_v16 = vmax.f32 %v348_v6, 0.0  ;;  %v283_v17 = vunpack.c.l.bf16 %v255_v9  ;;  %v284_v18 = vunpack.c.l.bf16 %v256_v10  ;;  %s235_s26 = scalar_lea.vmem %s4258_s5, %s2694_s23 }
  0x24   : > { %v3163_v15 = vpack.c.bf16 %v374_v5, %v373_v4  ;;  %v351_v19 = vadd.f32 %v3103_v11, %v316_v7  ;;  %v352_v20 = vadd.f32 %v3103_v11, %v317_v8  ;;  %v377_v22 = vmax.f32 %v349_v13, 0.0 }
  0x25   : > { %v378_v23 = vmax.f32 %v350_v14, 0.0  ;;  %v285_v24 = vunpack.c.h.bf16 %v255_v9  ;;  %v3174_v27 = vpack.c.bf16 %v376_v16, %v375_v12  ;;  %v318_v28 = vmul.f32 %v3092_v0, %v283_v17 }
  0x26   : > { %421 = vrot.lane.b32.xlu0 %v3131_v49, %s3038_s28  ;;  %446 = vrot.lane.b32.xlu1 %v3150_v3, %s3039_s29  ;;  %v319_v29 = vmul.f32 %v3092_v0, %v284_v18  ;;  %v286_v30 = vunpack.c.l.bf16 %v258_v21  ;;  %v379_v31 = vmax.f32 %v351_v19, 0.0  ;;  %v380_v32 = vmax.f32 %v352_v20, 0.0 }
  0x27   : > { %v287_v33 = vunpack.c.l.bf16 %v259_v25  ;;  %v288_v34 = vunpack.c.l.bf16 %v260_v26  ;;  %v3179_v36 = vpack.c.bf16 %v378_v23, %v377_v22  ;;  %v320_v37 = vmul.f32 %v3092_v0, %v285_v24 }
  0x28   : > { %v353_v39 = vadd.f32 %v3103_v11, %v318_v28  ;;  %v354_v40 = vadd.f32 %v3103_v11, %v319_v29  ;;  %v321_v41 = vmul.f32 %v3092_v0, %v286_v30  ;;  %v3191_v43 = vpack.c.bf16 %v380_v32, %v379_v31 }
  0x29   : > { %v289_v46 = vunpack.c.h.bf16 %v259_v25  ;;  %v265_v47 = vunpack.c.l.bf16 %v263_v42  ;;  %v266_v48 = vunpack.c.l.bf16 %v238_v35  ;;  %v322_v51 = vmul.f32 %v3092_v0, %v287_v33 }
  0x2a   : > { %423 = vrot.lane.b32.xlu0 %v3150_v3, %s3038_s28  ;;  %448 = vrot.lane.b32.xlu1 %v3163_v15, %s3039_s29  ;;  %v323_v52 = vmul.f32 %v3092_v0, %v288_v34  ;;  %v290_v53 = vunpack.c.l.bf16 %v262_v38  ;;  %v355_v56 = vadd.f32 %v3103_v11, %v320_v37  ;;  %v4260_v59 = vmov 0.0  }
  0x2b   : > { %v300_v57 = vmul.f32 %v3092_v0, %v265_v47  ;;  %v301_v58 = vmul.f32 %v3092_v0, %v266_v48  ;;  %2871 = vmatprep.subr.bf16.mxu0 %v4260_v59  ;;  %2831 = vmatprep.subr.bf16.mxu1 %v4260_v59  ;;  %v381_v61 = vmax.f32 %v353_v39, 0.0  ;;  %v382_v62 = vmax.f32 %v354_v40, 0.0 }
  0x2c   : > { %v356_v63 = vadd.f32 %v3103_v11, %v321_v41  ;;  %v324_v1 = vmul.f32 %v3092_v0, %v289_v46  ;;  %2872 = vmatpush3.bf16.msra.mxu0 %v3196_v50  ;;  %2875 = vmatprep.mubr.msk.bf16.mxu0 %vm3041_vm1, %v4260_v59  ;;  %v357_v6 = vadd.f32 %v3103_v11, %v322_v51  ;;  %v3231_v9 = vsel %vm1356_vm0, %v3025_v54, 0 }
  0x2d   : > { %v335_v4 = vadd.f32 %v3103_v11, %v300_v57  ;;  %v336_v5 = vadd.f32 %v3103_v11, %v301_v58  ;;  %v358_v7 = vadd.f32 %v3103_v11, %v323_v52  ;;  %v325_v8 = vmul.f32 %v3092_v0, %v290_v53  ;;  %2873 = vmatprep.subr.bf16.mxu0 %v4260_v59 }
  0x2e   : > { %425 = vrot.lane.b32.xlu0 %v3163_v15, %s3038_s28  ;;  %450 = vrot.lane.b32.xlu1 %v3174_v27, %s3039_s29  ;;  %v383_v10 = vmax.f32 %v355_v56, 0.0  ;;  %v1358_v14 = vsel %vm1356_vm0, %v3028_v60, 0  ;;  %v3241_v16 = vpack.c.bf16 %v382_v62, %v381_v61  ;;  %v384_v17 = vmax.f32 %v356_v63, 0.0  ;;  %v3029_v60 = vld [vmem:[%s4256_s3 + $0x20] ss:$0 sps:$4 sm:$0xff]  }
  0x2f   : > { %2832 = vmatpush3.bf16.msra.mxu1 %v3026_v55  ;;  %v363_v12 = vmax.f32 %v335_v4, 0.0  ;;  %v364_v13 = vmax.f32 %v336_v5, 0.0  ;;  %2835 = vmatprep.mubr.msk.bf16.mxu1 %vm3041_vm1, %v4260_v59  ;;  %v291_v18 = vunpack.c.h.bf16 %v263_v42  ;;  %v292_v19 = vunpack.c.l.bf16 %v264_v2 }
  0x30   : > { %2833 = vmatprep.subr.bf16.mxu1 %v4260_v59  ;;  %2874 = vmatpush3.bf16.msra.mxu0 %v3231_v9  ;;  %v385_v21 = vmax.f32 %v357_v6, 0.0  ;;  %v359_v22 = vadd.f32 %v3103_v11, %v324_v1  ;;  %v360_v23 = vadd.f32 %v3103_v11, %v325_v8  ;;  %v3252_v24 = vpack.c.bf16 %v384_v17, %v383_v10 }
  0x31   : > { %v391_v20 = vpack.c.bf16 %v364_v13, %v363_v12  ;;  %2911 = vmatprep.subr.bf16.mxu0 %v4260_v59  ;;  %v386_v25 = vmax.f32 %v358_v7, 0.0  ;;  %v326_v26 = vmul.f32 %v3092_v0, %v291_v18  ;;  %v327_v28 = vmul.f32 %v3092_v0, %v292_v19 }
  0x32   : > { %427 = vrot.lane.b32.xlu0 %v3174_v27, %s3038_s28  ;;  %452 = vrot.lane.b32.xlu1 %v3179_v36, %s3039_s29  ;;  %v387_v29 = vmax.f32 %v359_v22, 0.0  ;;  %v388_v31 = vmax.f32 %v360_v23, 0.0  ;;  %v544_v39 = vlaneseq  ;;  %v3313_v13 = vsel %vm1356_vm0, %v3029_v60, 0  ;;  %vm749_vm0 = vmor %vm747_vm12, %vm748_vm13 }
  0x33   : > { %2834 = vmatpush3.bf16.msra.mxu1 %v1358_v14  ;;  %v3260_v30 = vpack.c.bf16 %v386_v25, %v385_v21  ;;  %v361_v32 = vadd.f32 %v3103_v11, %v326_v26  ;;  %v362_v33 = vadd.f32 %v3103_v11, %v327_v28  ;;  %v3042_v11 = vmov 1983009808   ;;  %vm3498_vm4 = vmor %vm749_vm0, %vm750_vm14 }
  0x34   : > { %2951 = vmatprep.subr.bf16.mxu1 %v4260_v59  ;;  %v403_v0 = vpack.c.bf16 %v388_v31, %v387_v29  ;;  %v542_v38 = vunpack.c.l.s4 %v3042_v11  ;;  %v545_v41 = vshrl.u32 %v544_v39, 7  ;;  %vm3516_vm5 = vmor %vm3498_vm4, %vm752_vm15 }
  0x35   : > { %4288 = vst [vmem:[#allocation2_spill] sm:$0xff] %v3260_v30  ;;  %v389_v34 = vmax.f32 %v361_v32, 0.0  ;;  %v390_v35 = vmax.f32 %v362_v33, 0.0 }
  0x36   : > { %429 = vrot.lane.b32.xlu0 %v3179_v36, %s3038_s28  ;;  %454 = vrot.lane.b32.xlu1 %v3191_v43, %s3039_s29  ;;  %v543_v40 = vunpack.c.0.s8 %v542_v38 }
  0x37   : > { %v404_v37 = vpack.c.bf16 %v390_v35, %v389_v34 }
  0x38   : > { %v3275_v48 = vsub.s32 %v543_v40, %v545_v41 }
  0x3a   : > { %431 = vrot.lane.b32.xlu0 %v3191_v43, %s3038_s28  ;;  %456 = vrot.lane.b32.xlu1 %v3241_v16, %s3039_s29 }
  0x3e   : > { %433 = vrot.lane.b32.xlu0 %v3241_v16, %s3038_s28  ;;  %458 = vrot.lane.b32.xlu1 %v3252_v24, %s3039_s29 }
  0x42   : > { %435 = vrot.lane.b32.xlu0 %v3252_v24, %s3038_s28  ;;  %460 = vrot.lane.b32.xlu1 %v3260_v30, %s3039_s29 }
  0x46   : > { %437 = vrot.lane.b32.xlu0 %v3260_v30, %s3038_s28  ;;  %462 = vrot.lane.b32.xlu1 %v403_v0, %s3039_s29 }
  0x4a   : > { %439 = vrot.lane.b32.xlu0 %v403_v0, %s3038_s28  ;;  %464 = vrot.lane.b32.xlu1 %v404_v37, %s3039_s29 }
  0x90   : > { %v420_v42 = vpop.permute.xlu1 %419  ;;  %v418_v46 = vpop.permute.xlu0 %417 }
  0x91   : > { %v472_v47 = vsel %vm466_vm2, %v3128_v45, %v420_v42  ;;  %v469_v51 = vsel %vm466_vm2, %v391_v20, %v418_v46 }
  0x94   : > { %v445_v52 = vpop.permute.xlu1 %444  ;;  %v443_v53 = vpop.permute.xlu0 %442 }
  0x95   : > { %v507_v54 = vsel %vm503_vm3, %v472_v47, %v445_v52  ;;  %v505_v55 = vsel %vm503_vm3, %v469_v51, %v443_v53 }
  0x96   : > { %v556_v56 = vcombine.high %v507_v54, %v507_v54  ;;  %v3281_v57 = vrot.slane %v507_v54, %v3275_v48  ;;  %v540_v58 = vcombine.high %v505_v55, %v505_v55  ;;  %v3284_v45 = vrot.slane %v505_v55, %v3275_v48 }
  0x98   : > { %v3290_v61 = vrot.slane %v556_v56, %v3275_v48  ;;  %v789_v62 = vshrl.u32 %v3281_v57, 16  ;;  %v792_v63 = vshll.u32 %v3281_v57, 16  ;;  %v422_v1 = vpop.permute.xlu0 %421  ;;  %v447_v2 = vpop.permute.xlu1 %446  ;;  %v3296_v4 = vcombine.high %v3281_v57, %v3281_v57 }
  0x99   : > { %v3299_v5 = vrot.slane %v540_v58, %v3275_v48  ;;  %v3303_v6 = vcombine.high %v3284_v45, %v3284_v45  ;;  %v755_v7 = vshrl.u32 %v3284_v45, 16  ;;  %v2723_v12 = vrot.slane %v3281_v57, 9 }
  0x9a   : > { %4289 = vst [vmem:[#allocation3_spill] sm:$0xff] %v3290_v61  ;;  %4290 = vst [vmem:[#allocation4_spill] sm:$0xff] %v3296_v4  ;;  %v812_v10 = vshrl.u32 %v3290_v61, 16  ;;  %v3317_v14 = vcombine.high %v3290_v61, %v3290_v61  ;;  %v3319_v17 = vrot.slane %v789_v62, 6  ;;  %v3321_v18 = vrot.slane %v792_v63, 7 }
  0x9b   : > { %v4259_v22 = vrot.slane %v3296_v4, 7  ;;  %v758_v23 = vshll.u32 %v3284_v45, 16  ;;  %v778_v25 = vshrl.u32 %v3299_v5, 16  ;;  %v1771_v26 = vrot.slane %v3303_v6, 7 }
  0x9c   : > { %4293 = vst [vmem:[#allocation5_spill] sm:$0xff] %v3317_v14  ;;  %v424_v20 = vpop.permute.xlu0 %423  ;;  %v449_v21 = vpop.permute.xlu1 %448  ;;  %v3336_v29 = vcombine.high %v3299_v5, %v3299_v5  ;;  %v3338_v31 = vrot.slane %v755_v7, 6  ;;  %v774_v32 = vshll.u32 %v3299_v5, 16  ;;  %v475_v33 = vsel %vm466_vm2, %v3126_v44, %v422_v1 }
  0x9d   : > { %v3343_v0 = vrot.slane %v812_v10, 6  ;;  %v2722_v34 = vrot.slane %v3284_v45, 9  ;;  %v1773_v35 = vrot.slane %v1771_v26, 2  ;;  %v509_v37 = vsel %vm503_vm3, %v475_v33, %v447_v2 }
  0x9e   : > { %v1774_v11 = vrot.slane %v3299_v5, 7  ;;  %v572_v38 = vcombine.high %v509_v37, %v509_v37  ;;  %v3349_v39 = vrot.slane %v509_v37, %v3275_v48  ;;  %v478_v40 = vsel %vm466_vm2, %v3131_v49, %v424_v20 }
  0x9f   : > { %v3357_v44 = vsel %vm3330_vm10, %v2723_v12, %v4259_v22  ;;  %v3359_v41 = vrot.slane %v758_v23, 7  ;;  %v3361_v42 = vrot.slane %v778_v25, 6  ;;  %v511_v46 = vsel %vm503_vm3, %v478_v40, %v449_v21 }
  0xa0   : > { %4296 = vst [vmem:[#allocation6_spill] sm:$0xff] %v3349_v39  ;;  %4297 = vst [vmem:[#allocation7_spill] sm:$0xff] %v3357_v44  ;;  %v426_v47 = vpop.permute.xlu0 %425  ;;  %v3366_v51 = vsel %vm3330_vm10, %v1773_v35, %v1774_v11  ;;  %v3369_v49 = vrot.slane %v572_v38, %v3275_v48  ;;  %v823_v52 = vshrl.u32 %v3349_v39, 16  ;;  %v1465_v53 = vcombine.low %v3284_v45, %v3303_v6  ;;  %v451_v54 = vpop.permute.xlu1 %450 }
  0xa1   : > { %4298 = vst [vmem:[#allocation8_spill] sm:$0xff] %v3366_v51  ;;  %v826_v56 = vshll.u32 %v3349_v39, 16  ;;  %v588_v58 = vcombine.high %v511_v46, %v511_v46  ;;  %v3377_v60 = vrot.slane %v511_v46, %v3275_v48  ;;  %v3381_v62 = vsel %vm3330_vm10, %v2722_v34, %v1771_v26  ;;  %v3027_v46 = vld [vmem:[%s4256_s3 + $0x18] sm:$0xff]  }
  0xa2   : > { %4300 = vst [vmem:[#allocation10_spill] sm:$0xff] %v3381_v62  ;;  %v3383_v63 = vrot.slane %v1774_v11, 2  ;;  %v1466_v1 = vcombine.low %v3299_v5, %v3281_v57  ;;  %v481_v45 = vsel %vm466_vm2, %v3150_v3, %v426_v47  ;;  %v3393_v7 = vcombine.high %v3349_v39, %v3349_v39 }
  0xa3   : > { %4299 = vst [vmem:[#allocation9_spill] sm:$0xff] %v3377_v60  ;;  %v3397_v10 = vrot.slane %v588_v58, %v3275_v48  ;;  %v3401_v57 = vcombine.high %v3369_v49, %v3369_v49  ;;  %v3403_v12 = vrot.slane %v823_v52, 6  ;;  %v846_v3 = vshrl.u32 %v3369_v49, 16 }
  0xa4   : > { %v1473_v20 = vrot.slane %v1465_v53, %v3275_v48  ;;  %v3407_v21 = vrot.slane %v826_v56, 7  ;;  %v3412_v25 = vcombine.high %v3377_v60, %v3377_v60  ;;  %v857_v26 = vshrl.u32 %v3377_v60, 16  ;;  %v428_v33 = vpop.permute.xlu0 %427  ;;  %v453_v38 = vpop.permute.xlu1 %452 }
  0xa5   : > { %v860_v34 = vshll.u32 %v3377_v60, 16  ;;  %v1480_v35 = vrot.slane %v1466_v1, %v3275_v48  ;;  %v513_v37 = vsel %vm503_vm3, %v481_v45, %v451_v54  ;;  %v484_v11 = vsel %vm466_vm2, %v3163_v15, %v428_v33 }
  0xa6   : > { %v880_v40 = vshrl.u32 %v3397_v10, 16  ;;  %v604_v47 = vcombine.high %v513_v37, %v513_v37  ;;  %v3425_v52 = vrot.slane %v513_v37, %v3275_v48  ;;  %v515_v53 = vsel %vm503_vm3, %v484_v11, %v453_v38 }
  0xa7   : > { %v3428_v56 = vrot.slane %v846_v3, 6  ;;  %v1481_v58 = vcombine.low %v1473_v20, %v1480_v35  ;;  %v620_v54 = vcombine.high %v515_v53, %v515_v53  ;;  %v3431_v1 = vrot.slane %v515_v53, %v3275_v48 }
  0xa8   : > { %4301 = vst [vmem:[#allocation11_spill] sm:$0xff] %v3425_v52  ;;  %v3435_v45 = vrot.slane %v604_v47, %v3275_v48  ;;  %v891_v33 = vshrl.u32 %v3425_v52, 16  ;;  %v894_v37 = vshll.u32 %v3425_v52, 16  ;;  %v3441_v11 = vcombine.high %v3397_v10, %v3397_v10 }
  0xa9   : > { %4302 = vst [vmem:[#allocation12_spill] sm:$0xff] %v3431_v1  ;;  %v3443_v3 = vrot.slane %v857_v26, 6  ;;  %2876 = vmatmul.mubr.msk.bf16.vlgmr.msra.gmra.mrb[0].mxu0 %vm1328_vm11, %v1481_v58  ;;  %v925_v20 = vshrl.u32 %v3431_v1, 16  ;;  %v1482_v35 = vcombine.low %v3296_v4, %v3290_v61  ;;  %v3449_v38 = vrot.slane %v860_v34, 7 }
  0xaa   : > { %v3452_v53 = vrot.slane %v880_v40, 6  ;;  %2912 = vmatpush3.bf16.msra.mxu0 %v3027_v46  ;;  %v3456_v15 = vcombine.high %v3425_v52, %v3425_v52  ;;  %2879 = vmatprep.mubr.msk.bf16.mxu0 %vm3041_vm1, %v4260_v59  ;;  %v3462_v26 = vcombine.high %v3435_v45, %v3435_v45  ;;  %v3466_v34 = vrot.slane %v620_v54, %v3275_v48  ;;  %v430_v46 = vpop.permute.xlu0 %429 }
  0xab   : > { %v3470_v40 = vcombine.high %v3431_v1, %v3431_v1  ;;  %2913 = vmatprep.subr.bf16.mxu0 %v4260_v59  ;;  %v3473_v8 = vrot.slane %v891_v33, 6  ;;  %v3475_v22 = vrot.slane %v894_v37, 7  ;;  %v1483_v55 = vcombine.low %v3349_v39, %v3393_v7 }
  0xac   : > { %v914_v54 = vshrl.u32 %v3435_v45, 16  ;;  %v3485_v58 = vcombine.high %v3466_v34, %v3466_v34  ;;  %v3487_v47 = vrot.slane %v925_v20, 6  ;;  %v1490_v33 = vrot.slane %v1482_v35, %v3275_v48 }
  0xad   : > { %v1497_v37 = vrot.slane %v1483_v55, %v3275_v48  ;;  %v487_v2 = vsel %vm466_vm2, %v3174_v27, %v430_v46  ;;  %v761_v23 = vor.u32 %v3359_v41, %v3338_v31  ;;  %v764_v19 = vshll.u32 %v3303_v6, 16  ;;  %v455_v31 = vpop.permute.xlu1 %454 }
  0xae   : > { %4303 = vst [vmem:[#allocation13_spill] sm:$0xff] %v3485_v58  ;;  %2914 = vmatpush3.bf16.msra.mxu0 %v3313_v13  ;;  %v768_v20 = vshrl.u32 %v3303_v6, 16  ;;  %v776_v55 = vrot.slane %v774_v32, 7  ;;  %v784_v35 = vshll.u32 %v3336_v29, 16  ;;  %v795_v27 = vor.u32 %v3321_v18, %v3319_v17 }
  0xaf   : > { %v928_v41 = vshll.u32 %v3431_v1, 16  ;;  %v1498_v46 = vcombine.low %v1490_v33, %v1497_v37  ;;  %v766_v13 = vrot.slane %v764_v19, 7  ;;  %v798_v39 = vshll.u32 %v3296_v4, 16 }
  0xb0   : > { %v948_v58 = vshrl.u32 %v3466_v34, 16  ;;  %v770_v30 = vrot.slane %v768_v20, 6  ;;  %v781_v6 = vor.u32 %v3361_v42, %v776_v55  ;;  %v796_v51 = vrot.slane %v795_v27, 2 }
  0xb1   : > { %2880 = vmatmul.mubr.msk.bf16.gmra.mrb[4].mxu0 %vm1328_vm11, %v1498_v46  ;;  %v762_v17 = vrot.slane %v761_v23, 2  ;;  %v786_v18 = vrot.slane %v784_v35, 7  ;;  %v800_v19 = vrot.slane %v798_v39, 7  ;;  %v517_v32 = vsel %vm503_vm3, %v487_v2, %v455_v31  ;;  %v432_v39 = vpop.permute.xlu0 %431 }
  0xb2   : > { %v771_v33 = vor.u32 %v770_v30, %v766_v13  ;;  %v782_v37 = vrot.slane %v781_v6, 2  ;;  %v636_v20 = vcombine.high %v517_v32, %v517_v32  ;;  %v4308_v62 = vmov 0.0  }
  0xb3   : > { %2883 = vmatprep.mubr.msk.bf16.mxu0 %vm3041_vm1, %v4308_v62  ;;  %v1499_v42 = vcombine.low %v3369_v49, %v3377_v60  ;;  %v3525_v27 = vrot.slane %v914_v54, 6  ;;  %v3530_v23 = vrot.slane %v517_v32, %v3275_v48  ;;  %v801_v35 = vsel %vm3516_vm5, %v796_v51, %v800_v19  ;;  %v457_v60 = vpop.permute.xlu1 %456 }
  0xb4   : > { %v772_v2 = vrot.slane %v771_v33, 2  ;;  %v787_v30 = vsel %vm3516_vm5, %v782_v37, %v786_v18  ;;  %v1500_v31 = vcombine.low %v3412_v25, %v3397_v10  ;;  %v3538_v54 = vrot.slane %v928_v41, 7 }
  0xb5   : > { %4309 = vst [vmem:[#allocation14_spill] sm:$0xff] %v3530_v23  ;;  %v3540_v6 = vrot.slane %v948_v58, 6  ;;  %v767_v46 = vsel %vm3516_vm5, %v762_v17, %v766_v13  ;;  %v1167_v32 = vcombine.low %v787_v30, %v801_v35  ;;  %v3547_v59 = vrot.slane %v636_v20, %v3275_v48 }
  0xb6   : > { %v777_v33 = vsel %vm3516_vm5, %v772_v2, %v776_v55  ;;  %v1507_v18 = vrot.slane %v1499_v42, %v3275_v48  ;;  %v490_v51 = vsel %vm466_vm2, %v3179_v36, %v432_v39  ;;  %v3555_v58 = vcombine.high %v3530_v23, %v3530_v23 }
  0xb7   : > { %4310 = vst [vmem:[#allocation15_spill] sm:$0xff] %v3540_v6  ;;  %v1166_v37 = vcombine.low %v767_v46, %v777_v33  ;;  %v1181_v41 = vrot.slane %v1167_v32, %v3275_v48  ;;  %v959_v13 = vshrl.u32 %v3530_v23, 16  ;;  %v962_v17 = vshll.u32 %v3530_v23, 16 }
  0xb8   : > { %v1514_v55 = vrot.slane %v1500_v31, %v3275_v48  ;;  %v802_v20 = vshrl.u32 %v3296_v4, 16  ;;  %v4311_v42 = vshll.u32 %v3290_v61, 16  ;;  %v818_v46 = vshll.u32 %v3317_v14, 16 }
  0xb9   : > { %v1174_v36 = vrot.slane %v1166_v37, %v3275_v48  ;;  %v829_v39 = vor.u32 %v3407_v21, %v3403_v12  ;;  %v832_v30 = vshll.u32 %v3393_v7, 16  ;;  %v836_v31 = vshrl.u32 %v3393_v7, 16 }
  0xba   : > { %v810_v2 = vrot.slane %v4311_v42, 7  ;;  %v1515_v35 = vcombine.low %v1507_v18, %v1514_v55  ;;  %v804_v32 = vrot.slane %v802_v20, 6  ;;  %v820_v42 = vrot.slane %v818_v46, 7 }
  0xbb   : > { %v1182_v4 = vcombine.low %v1174_v36, %v1181_v41  ;;  %v834_v6 = vrot.slane %v832_v30, 7  ;;  %v830_v44 = vrot.slane %v829_v39, 2  ;;  %v838_v12 = vrot.slane %v836_v31, 6 }
  0xbc   : > { %v815_v33 = vor.u32 %v3343_v0, %v810_v2  ;;  %2884 = vmatmul.mubr.msk.bf16.gmra.mrb[8].mxu0 %vm1328_vm11, %v1515_v35  ;;  %v805_v37 = vor.u32 %v804_v32, %v800_v19  ;;  %v3575_v21 = vcombine.high %v3547_v59, %v3547_v59  ;;  %v982_v0 = vshrl.u32 %v3547_v59, 16 }
  0xbd   : > { %2836 = vmatmul.mubr.msk.bf16.vlgmr.msra.gmra.mrb[0].mxu1 %vm1328_vm11, %v1182_v4  ;;  %v4312_v18 = vshll.u32 %v3369_v49, 16  ;;  %v519_v55 = vsel %vm503_vm3, %v490_v51, %v457_v60  ;;  %2887 = vmatprep.mubr.msk.bf16.mxu0 %vm3041_vm1, %v4308_v62  ;;  %v839_v20 = vor.u32 %v838_v12, %v834_v6  ;;  %v3588_v46 = vrot.slane %v959_v13, 6 }
  0xbe   : > { %v816_v14 = vrot.slane %v815_v33, 2  ;;  %2953 = vmatpush3.bf16.msra.mxu1 %v3196_v50  ;;  %2839 = vmatprep.mubr.msk.bf16.mxu1 %vm3041_vm1, %v4308_v62  ;;  %v806_v4 = vrot.slane %v805_v37, 2  ;;  %v652_v36 = vcombine.high %v519_v55, %v519_v55  ;;  %v3592_v60 = vrot.slane %v519_v55, %v3275_v48 }
  0xbf   : > { %v844_v41 = vrot.slane %v4312_v18, 7  ;;  %v1516_v51 = vcombine.low %v3425_v52, %v3456_v15  ;;  %2952 = vmatprep.subr.bf16.mxu1 %v4308_v62  ;;  %v840_v30 = vrot.slane %v839_v20, 2  ;;  %v1517_v32 = vcombine.low %v3435_v45, %v3431_v1 }
  0xc0   : > { %v821_v19 = vsel %vm3516_vm5, %v816_v14, %v820_v42  ;;  %4313 = vst [vmem:[#allocation16_spill] sm:$0xff] %v3592_v60  ;;  %v811_v50 = vsel %vm3516_vm5, %v806_v4, %v810_v2  ;;  %v835_v14 = vsel %vm3516_vm5, %v830_v44, %v834_v6  ;;  %v3602_v13 = vrot.slane %v652_v36, %v3275_v48  ;;  %v434_v6 = vpop.permute.xlu0 %433  ;;  %v459_v4 = vpop.permute.xlu1 %458 }
  0xc1   : > { %v1183_v35 = vcombine.low %v811_v50, %v821_v19  ;;  %v849_v33 = vor.u32 %v3428_v56, %v844_v41  ;;  %v852_v31 = vshll.u32 %v3401_v57, 16  ;;  %v3608_v42 = vrot.slane %v962_v17, 7 }
  0xc2   : > { %v3610_v37 = vrot.slane %v982_v0, 6  ;;  %v845_v2 = vsel %vm3516_vm5, %v840_v30, %v844_v41  ;;  %v993_v44 = vshrl.u32 %v3592_v60, 16  ;;  %2954 = vmatpush3.bf16.msra.mxu1 %v3231_v9  ;;  %v3618_v18 = vcombine.high %v3592_v60, %v3592_v60 }
  0xc3   : > { %v1184_v12 = vcombine.low %v835_v14, %v845_v2  ;;  %v1524_v56 = vrot.slane %v1516_v51, %v3275_v48  ;;  %v493_v17 = vsel %vm466_vm2, %v3191_v43, %v434_v6  ;;  %v1191_v0 = vrot.slane %v1183_v35, %v3275_v48 }
  0xc4   : > { %v3626_v41 = vcombine.high %v3602_v13, %v3602_v13  ;;  %v996_v55 = vshll.u32 %v3592_v60, 16  ;;  %v1531_v20 = vrot.slane %v1517_v32, %v3275_v48  ;;  %v850_v36 = vrot.slane %v849_v33, 2  ;;  %v436_v9 = vpop.permute.xlu0 %435 }
  0xc5   : > { %v1198_v19 = vrot.slane %v1184_v12, %v3275_v48  ;;  %v854_v51 = vrot.slane %v852_v31, 7  ;;  %v3632_v50 = vrot.slane %v993_v44, 6  ;;  %v1016_v43 = vshrl.u32 %v3602_v13, 16 }
  0xc6   : > { %v863_v14 = vor.u32 %v3449_v38, %v3443_v3  ;;  %v866_v30 = vshll.u32 %v3412_v25, 16  ;;  %v1532_v2 = vcombine.low %v1524_v56, %v1531_v20  ;;  %v870_v12 = vshrl.u32 %v3412_v25, 16 }
  0xc7   : > { %v1199_v35 = vcombine.low %v1191_v0, %v1198_v19  ;;  %v855_v6 = vsel %vm3516_vm5, %v850_v36, %v854_v51  ;;  %v4314_v33 = vshll.u32 %v3397_v10, 16  ;;  %v886_v44 = vshll.u32 %v3441_v11, 16 }
  0xc8   : > { %v864_v61 = vrot.slane %v863_v14, 2  ;;  %v868_v32 = vrot.slane %v866_v30, 7  ;;  %v3645_v3 = vrot.slane %v996_v55, 7  ;;  %2888 = vmatmul.mubr.msk.bf16.gmra.mrb[12].mxu0 %vm1328_vm11, %v1532_v2  ;;  %v872_v38 = vrot.slane %v870_v12, 6  ;;  %v461_v55 = vpop.permute.xlu1 %460 }
  0xc9   : > { %v878_v31 = vrot.slane %v4314_v33, 7  ;;  %2840 = vmatmul.mubr.msk.bf16.gmra.mrb[4].mxu1 %vm1328_vm11, %v1199_v35  ;;  %v521_v56 = vsel %vm503_vm3, %v493_v17, %v459_v4  ;;  %v496_v0 = vsel %vm466_vm2, %v3241_v16, %v436_v9  ;;  %v888_v36 = vrot.slane %v886_v44, 7  ;;  %2891 = vmatprep.mubr.msk.bf16.mxu0 %vm3041_vm1, %v4308_v62 }
  0xca   : > { %2843 = vmatprep.mubr.msk.bf16.mxu1 %vm3041_vm1, %v4308_v62  ;;  %v869_v19 = vsel %vm3516_vm5, %v864_v61, %v868_v32  ;;  %v668_v51 = vcombine.high %v521_v56, %v521_v56  ;;  %v873_v14 = vor.u32 %v872_v38, %v868_v32  ;;  %v3659_v17 = vrot.slane %v521_v56, %v3275_v48 }
  0xcb   : > { %v883_v20 = vor.u32 %v3452_v53, %v878_v31  ;;  %v1200_v30 = vcombine.low %v855_v6, %v869_v19  ;;  %v523_v16 = vsel %vm503_vm3, %v496_v0, %v461_v55  ;;  %v3662_v9 = vrot.slane %v1016_v43, 6 }
  0xcc   : > { %4315 = vst [vmem:[#allocation17_spill] sm:$0xff] %v3659_v17  ;;  %v3665_v61 = vrot.slane %v668_v51, %v3275_v48  ;;  %v684_v53 = vcombine.high %v523_v16, %v523_v16  ;;  %v874_v2 = vrot.slane %v873_v14, 2  ;;  %v1027_v12 = vshrl.u32 %v3659_v17, 16 }
  0xcd   : > { %v884_v4 = vrot.slane %v883_v20, 2  ;;  %v3670_v32 = vrot.slane %v523_v16, %v3275_v48  ;;  %v1208_v33 = vrot.slane %v1200_v30, %v3275_v48  ;;  %v1030_v43 = vshll.u32 %v3659_v17, 16 }
  0xce   : > { %v1533_v44 = vcombine.low %v3470_v40, %v3466_v34  ;;  %v879_v38 = vsel %vm3516_vm5, %v874_v2, %v878_v31  ;;  %v3682_v56 = vcombine.high %v3659_v17, %v3659_v17  ;;  %v3686_v0 = vcombine.high %v3665_v61, %v3665_v61 }
  0xcf   : > { %4316 = vst [vmem:[#allocation18_spill] sm:$0xff] %v3670_v32  ;;  %v889_v6 = vsel %vm3516_vm5, %v884_v4, %v888_v36  ;;  %v1050_v19 = vshrl.u32 %v3665_v61, 16  ;;  %v3689_v36 = vrot.slane %v1027_v12, 6  ;;  %v3693_v55 = vrot.slane %v684_v53, %v3275_v48  ;;  %v438_v4 = vpop.permute.xlu0 %437 }
  0xd0   : > { %v1201_v20 = vcombine.low %v879_v38, %v889_v6  ;;  %v3695_v14 = vrot.slane %v1030_v43, 7  ;;  %v3700_v30 = vcombine.high %v3670_v32, %v3670_v32  ;;  %v1061_v16 = vshrl.u32 %v3670_v32, 16 }
  0xd1   : > { %4317 = vst [vmem:[#allocation19_spill] sm:$0xff] %v3693_v55  ;;  %v3704_v12 = vrot.slane %v1050_v19, 6  ;;  %v3708_v6 = vcombine.high %v3693_v55, %v3693_v55  ;;  %v1064_v53 = vshll.u32 %v3670_v32, 16  ;;  %v1084_v38 = vshrl.u32 %v3693_v55, 16 }
  0xd2   : > { %v1215_v2 = vrot.slane %v1201_v20, %v3275_v48  ;;  %v1534_v31 = vcombine.low %v3530_v23, %v3555_v58  ;;  %v1541_v35 = vrot.slane %v1533_v44, %v3275_v48  ;;  %v3716_v39 = vrot.slane %v1061_v16, 6 }
  0xd3   : > { %4318 = vst [vmem:[#allocation20_spill] sm:$0xff] %v3708_v6  ;;  %v499_v19 = vsel %vm466_vm2, %v3252_v24, %v438_v4  ;;  %v897_v20 = vor.u32 %v3475_v22, %v3473_v8  ;;  %v900_v43 = vshll.u32 %v3456_v15, 16  ;;  %v904_v60 = vshrl.u32 %v3456_v15, 16  ;;  %v463_v6 = vpop.permute.xlu1 %462 }
  0xd4   : > { %v1216_v51 = vcombine.low %v1208_v33, %v1215_v2  ;;  %v1548_v17 = vrot.slane %v1534_v31, %v3275_v48  ;;  %v4319_v32 = vshll.u32 %v3435_v45, 16  ;;  %v920_v44 = vshll.u32 %v3462_v26, 16 }
  0xd5   : > { %v898_v33 = vrot.slane %v897_v20, 2  ;;  %v931_v24 = vor.u32 %v3538_v54, %v3487_v47  ;;  %v934_v22 = vshll.u32 %v3470_v40, 16  ;;  %v902_v31 = vrot.slane %v900_v43, 7 }
  0xd6   : > { %v912_v23 = vrot.slane %v4319_v32, 7  ;;  %2844 = vmatmul.mubr.msk.bf16.gmra.mrb[8].mxu1 %vm1328_vm11, %v1216_v51  ;;  %v1549_v8 = vcombine.low %v1541_v35, %v1548_v17  ;;  %v906_v16 = vrot.slane %v904_v60, 6  ;;  %v922_v32 = vrot.slane %v920_v44, 7 }
  0xd7   : > { %2847 = vmatprep.mubr.msk.bf16.mxu1 %vm3041_vm1, %v4308_v62  ;;  %v932_v2 = vrot.slane %v931_v24, 2  ;;  %v936_v55 = vrot.slane %v934_v22, 7  ;;  %v525_v51 = vsel %vm503_vm3, %v499_v19, %v463_v6  ;;  %v3736_v20 = vrot.slane %v1064_v53, 7  ;;  %v4322_v19 = vld [vmem:[#allocation7_spill] sm:$0xff] }
  0xd8   : > { %v917_v4 = vor.u32 %v3525_v27, %v912_v23  ;;  %2892 = vmatmul.mubr.msk.bf16.gmra.mrb[16].mxu0 %vm1328_vm11, %v1549_v8  ;;  %v907_v47 = vor.u32 %v906_v16, %v902_v31  ;;  %v700_v1 = vcombine.high %v525_v51, %v525_v51  ;;  %v903_v52 = vsel %vm3516_vm5, %v898_v33, %v902_v31  ;;  %v440_v8 = vpop.permute.xlu0 %439  ;;  %v4325_v16 = vld [vmem:[#allocation8_spill] sm:$0xff] }
  0xd9   : > { %v937_v60 = vsel %vm3516_vm5, %v932_v2, %v936_v55  ;;  %v3744_v27 = vrot.slane %v525_v51, %v3275_v48  ;;  %2915 = vmatprep.mubr.msk.bf16.mxu0 %vm3041_vm1, %v4308_v62  ;;  %v4321_v17 = vrot.slane %v3336_v29, 7  ;;  %v3759_v44 = vrot.slane %v1084_v38, 6  ;;  %v4324_v38 = vld [vmem:[#allocation10_spill] sm:$0xff] }
  0xda   : > { %v918_v54 = vrot.slane %v917_v4, 2  ;;  %v908_v6 = vrot.slane %v907_v47, 2  ;;  %v3756_v43 = vrot.slane %v700_v1, %v3275_v48  ;;  %v4326_v4 = vcombine.low %v4324_v38, %v4325_v16 }
  0xdb   : > { %4320 = vst [vmem:[#allocation21_spill] sm:$0xff] %v3744_v27  ;;  %v1778_v35 = vsel %vm3330_vm10, %v3383_v63, %v4321_v17  ;;  %v1095_v22 = vshrl.u32 %v3744_v27, 16  ;;  %v1098_v29 = vshll.u32 %v3744_v27, 16  ;;  %v3767_v31 = vcombine.high %v3744_v27, %v3744_v27 }
  0xdc   : > { %v923_v53 = vsel %vm3516_vm5, %v918_v54, %v922_v32  ;;  %v1894_v33 = vcombine.low %v1778_v35, %v4322_v19  ;;  %v913_v63 = vsel %vm3516_vm5, %v908_v6, %v912_v23  ;;  %v3771_v1 = vcombine.high %v3756_v43, %v3756_v43  ;;  %v4327_v35 = vld [vmem:[#allocation2_spill] sm:$0xff] }
  0xdd   : > { %v1218_v24 = vcombine.low %v923_v53, %v937_v60  ;;  %v1901_v32 = vrot.slane %v4326_v4, %v3275_v48  ;;  %v1217_v2 = vcombine.low %v903_v52, %v913_v63  ;;  %v1118_v23 = vshrl.u32 %v3756_v43, 16  ;;  %v4329_v63 = vld [vmem:[#allocation13_spill] sm:$0xff]  ;;  %v465_v4 = vpop.permute.xlu1 %464 }
  0xde   : > { %4323 = vst [vmem:[#allocation7_spill] sm:$0xff] %v3771_v1  ;;  %v3780_v54 = vrot.slane %v1095_v22, 6  ;;  %v3782_v60 = vrot.slane %v1098_v29, 7  ;;  %v1908_v17 = vrot.slane %v1894_v33, %v3275_v48  ;;  %v502_v6 = vsel %vm466_vm2, %v4327_v35, %v440_v8  ;;  %v4330_v35 = vld [vmem:[#allocation15_spill] sm:$0xff] }
  0xdf   : > { %v1232_v51 = vrot.slane %v1218_v24, %v3275_v48  ;;  %v1225_v53 = vrot.slane %v1217_v2, %v3275_v48  ;;  %v938_v19 = vshrl.u32 %v3470_v40, 16  ;;  %v4328_v52 = vshll.u32 %v3466_v34, 16 }
  0xe0   : > { %v954_v38 = vshll.u32 %v4329_v63, 16  ;;  %v1909_v16 = vcombine.low %v1901_v32, %v1908_v17  ;;  %v965_v22 = vor.u32 %v3608_v42, %v3588_v46  ;;  %v968_v29 = vshll.u32 %v3555_v58, 16 }
  0xe1   : > { %v946_v24 = vrot.slane %v4328_v52, 7  ;;  %v972_v33 = vshrl.u32 %v3555_v58, 16  ;;  %v1233_v47 = vcombine.low %v1225_v53, %v1232_v51  ;;  %v940_v8 = vrot.slane %v938_v19, 6  ;;  %v4331_v51 = vld [vmem:[#allocation4_spill] sm:$0xff] }
  0xe2   : > { %v956_v27 = vrot.slane %v954_v38, 7  ;;  %v3797_v1 = vrot.slane %v1118_v23, 6  ;;  %2916 = vmatmul.mubr.msk.bf16.vlgmr.msra.gmra.mrb[0].mxu0 %vm1328_vm11, %v1909_v16  ;;  %v966_v52 = vrot.slane %v965_v22, 2  ;;  %v970_v63 = vrot.slane %v968_v29, 7 }
  0xe3   : > { %v951_v2 = vor.u32 %v4330_v35, %v946_v24  ;;  %v974_v32 = vrot.slane %v972_v33, 6  ;;  %2848 = vmatmul.mubr.msk.bf16.gmra.mrb[12].mxu1 %vm1328_vm11, %v1233_v47  ;;  %v941_v46 = vor.u32 %v940_v8, %v936_v55  ;;  %v527_v17 = vsel %vm503_vm3, %v502_v6, %v465_v4  ;;  %2919 = vmatprep.mubr.msk.bf16.mxu0 %vm3041_vm1, %v4308_v62  ;;  %v4335_v33 = vld [vmem:[#allocation3_spill] sm:$0xff] }
  0xe4   : > { %v4332_v53 = vrot.slane %v4331_v51, 7  ;;  %2851 = vmatprep.mubr.msk.bf16.mxu1 %vm3041_vm1, %v4308_v62  ;;  %v4333_v38 = vshll.u32 %v3547_v59, 16  ;;  %v716_v22 = vcombine.high %v527_v17, %v527_v17  ;;  %v3811_v47 = vrot.slane %v527_v17, %v3275_v48 }
  0xe5   : > { %v952_v42 = vrot.slane %v951_v2, 2  ;;  %v975_v23 = vor.u32 %v974_v32, %v970_v63  ;;  %v942_v55 = vrot.slane %v941_v46, 2  ;;  %v971_v29 = vsel %vm3516_vm5, %v966_v52, %v970_v63  ;;  %v4336_v32 = vld [vmem:[#allocation5_spill] sm:$0xff] }
  0xe6   : > { %v1783_v19 = vrot.slane %v4332_v53, 2  ;;  %v980_v16 = vrot.slane %v4333_v38, 7  ;;  %4334 = vst [vmem:[#allocation10_spill] sm:$0xff] %v3811_v47  ;;  %v1784_v4 = vrot.slane %v4335_v33, 7  ;;  %v3819_v35 = vrot.slane %v716_v22, %v3275_v48 }
  0xe7   : > { %v957_v6 = vsel %vm3516_vm5, %v952_v42, %v956_v27  ;;  %v976_v8 = vrot.slane %v975_v23, 2  ;;  %v1129_v2 = vshrl.u32 %v3811_v47, 16  ;;  %v1787_v51 = vrot.slane %v4336_v32, 7 }
  0xe8   : > { %v947_v17 = vsel %vm3516_vm5, %v942_v55, %v946_v24  ;;  %v3827_v46 = vcombine.high %v3811_v47, %v3811_v47  ;;  %v1132_v27 = vshll.u32 %v3811_v47, 16  ;;  %v1785_v63 = vsel %vm3330_vm10, %v1783_v19, %v1784_v4 }
  0xe9   : > { %v981_v52 = vsel %vm3516_vm5, %v976_v8, %v980_v16  ;;  %v1234_v42 = vcombine.low %v947_v17, %v957_v6  ;;  %v3836_v53 = vcombine.high %v3819_v35, %v3819_v35  ;;  %v3838_v23 = vrot.slane %v1129_v2, 6 }
  0xea   : > { %v1235_v24 = vcombine.low %v971_v29, %v981_v52  ;;  %v3840_v38 = vrot.slane %v1132_v27, 7  ;;  %v1152_v55 = vshrl.u32 %v3819_v35, 16  ;;  %v1786_v19 = vrot.slane %v1784_v4, 2  ;;  %v4338_v52 = vld [vmem:[#allocation6_spill] sm:$0xff] }
  0xeb   : > { %v1242_v33 = vrot.slane %v1234_v42, %v3275_v48  ;;  %v1791_v32 = vrot.slane %v3393_v7, 7  ;;  %v1794_v6 = vrot.slane %v3369_v49, 7  ;;  %v985_v2 = vor.u32 %v3610_v37, %v980_v16 }
  0xec   : > { %v1249_v8 = vrot.slane %v1235_v24, %v3275_v48  ;;  %v3848_v17 = vrot.slane %v1152_v55, 6  ;;  %v988_v29 = vshll.u32 %v3575_v21, 16  ;;  %v1788_v27 = vsel %vm3330_vm10, %v1786_v19, %v1787_v51 }
  0xed   : > { %v4339_v22 = vrot.slane %v4338_v52, 9  ;;  %v1793_v42 = vrot.slane %v1791_v32, 2  ;;  %v999_v49 = vor.u32 %v3645_v3, %v3632_v50  ;;  %v1910_v24 = vcombine.low %v1785_v63, %v1788_v27 }
  0xee   : > { %4337 = vst [vmem:[#allocation8_spill] sm:$0xff] %v3848_v17  ;;  %v1250_v7 = vcombine.low %v1242_v33, %v1249_v8  ;;  %v986_v55 = vrot.slane %v985_v2, 2  ;;  %v990_v47 = vrot.slane %v988_v29, 7  ;;  %v1002_v17 = vshll.u32 %v3618_v18, 16 }
  0xef   : > { %v1792_v4 = vsel %vm3330_vm10, %v4339_v22, %v1791_v32  ;;  %v1795_v37 = vsel %vm3330_vm10, %v1793_v42, %v1794_v6  ;;  %v1000_v16 = vrot.slane %v999_v49, 2  ;;  %v1006_v51 = vshrl.u32 %v3618_v18, 16 }
  0xf0   : > { %2852 = vmatmul.mubr.msk.bf16.gmra.mrb[16].mxu1 %vm1328_vm11, %v1250_v7  ;;  %v1911_v19 = vcombine.low %v1792_v4, %v1795_v37  ;;  %v1918_v22 = vrot.slane %v1910_v24, %v3275_v48  ;;  %v991_v50 = vsel %vm3516_vm5, %v986_v55, %v990_v47  ;;  %v4340_v3 = vshll.u32 %v3602_v13, 16 }
  0xf1   : > { %2855 = vmatprep.mubr.msk.bf16.mxu1 %vm3041_vm1, %v4308_v62  ;;  %v1004_v33 = vrot.slane %v1002_v17, 7  ;;  %v1008_v32 = vrot.slane %v1006_v51, 6  ;;  %v1022_v8 = vshll.u32 %v3626_v41, 16  ;;  %v1796_v2 = vrot.slane %v1794_v6, 2  ;;  %v4341_v51 = vld [vmem:[#allocation9_spill] sm:$0xff] }
  0xf2   : > { %v1014_v63 = vrot.slane %v4340_v3, 7  ;;  %v1925_v29 = vrot.slane %v1911_v19, %v3275_v48  ;;  %v1797_v52 = vrot.slane %v3401_v57, 7  ;;  %v1801_v4 = vrot.slane %v3412_v25, 7 }
  0xf3   : > { %v1005_v47 = vsel %vm3516_vm5, %v1000_v16, %v1004_v33  ;;  %v1009_v42 = vor.u32 %v1008_v32, %v1004_v33  ;;  %v1024_v49 = vrot.slane %v1022_v8, 7  ;;  %v1804_v7 = vrot.slane %v3397_v10, 7 }
  0xf4   : > { %v1019_v27 = vor.u32 %v3662_v9, %v1014_v63  ;;  %v1926_v17 = vcombine.low %v1918_v22, %v1925_v29  ;;  %v1251_v55 = vcombine.low %v991_v50, %v1005_v47  ;;  %v1798_v6 = vsel %vm3330_vm10, %v1796_v2, %v1797_v52 }
  0xf5   : > { %v1010_v37 = vrot.slane %v1009_v42, 2  ;;  %v4342_v9 = vrot.slane %v4341_v51, 9  ;;  %v1803_v25 = vrot.slane %v1801_v4, 2  ;;  %v1806_v19 = vrot.slane %v1804_v7, 2 }
  0xf6   : > { %v1020_v24 = vrot.slane %v1019_v27, 2  ;;  %2920 = vmatmul.mubr.msk.bf16.gmra.mrb[4].mxu0 %vm1328_vm11, %v1926_v17  ;;  %v1259_v10 = vrot.slane %v1251_v55, %v3275_v48  ;;  %v1807_v22 = vrot.slane %v3441_v11, 7  ;;  %v1033_v32 = vor.u32 %v3695_v14, %v3689_v36 }
  0xf7   : > { %v1802_v57 = vsel %vm3330_vm10, %v4342_v9, %v1801_v4  ;;  %v1015_v3 = vsel %vm3516_vm5, %v1010_v37, %v1014_v63  ;;  %2923 = vmatprep.mubr.msk.bf16.mxu0 %vm3041_vm1, %v4308_v62  ;;  %v1805_v33 = vsel %vm3330_vm10, %v1803_v25, %v1804_v7  ;;  %v1036_v8 = vshll.u32 %v3682_v56, 16 }
  0xf8   : > { %v1025_v16 = vsel %vm3516_vm5, %v1020_v24, %v1024_v49  ;;  %v1927_v50 = vcombine.low %v1798_v6, %v1802_v57  ;;  %v1808_v29 = vsel %vm3330_vm10, %v1806_v19, %v1807_v22  ;;  %v1040_v27 = vshrl.u32 %v3682_v56, 16 }
  0xf9   : > { %v1252_v2 = vcombine.low %v1015_v3, %v1025_v16  ;;  %v1928_v63 = vcombine.low %v1805_v33, %v1808_v29  ;;  %v1034_v52 = vrot.slane %v1033_v32, 2  ;;  %v1038_v4 = vrot.slane %v1036_v8, 7  ;;  %v4344_v3 = vld [vmem:[#allocation11_spill] sm:$0xff] }
  0xfa   : > { %v1935_v11 = vrot.slane %v1927_v50, %v3275_v48  ;;  %v4343_v47 = vshll.u32 %v3665_v61, 16  ;;  %v1042_v7 = vrot.slane %v1040_v27, 6  ;;  %v1056_v36 = vshll.u32 %v3686_v0, 16 }
  0xfb   : > { %v1266_v49 = vrot.slane %v1252_v2, %v3275_v48  ;;  %v1067_v14 = vor.u32 %v3736_v20, %v3716_v39  ;;  %v1942_v17 = vrot.slane %v1928_v63, %v3275_v48  ;;  %v1039_v24 = vsel %vm3516_vm5, %v1034_v52, %v1038_v4  ;;  %v4346_v2 = vld [vmem:[#allocation12_spill] sm:$0xff] }
  0xfc   : > { %v1048_v42 = vrot.slane %v4343_v47, 7  ;;  %v1070_v6 = vshll.u32 %v3700_v30, 16  ;;  %v1043_v51 = vor.u32 %v1042_v7, %v1038_v4  ;;  %v1058_v9 = vrot.slane %v1056_v36, 7  ;;  %v4348_v4 = vld [vmem:[#allocation19_spill] sm:$0xff] }
  0xfd   : > { %v1267_v37 = vcombine.low %v1259_v10, %v1266_v49  ;;  %v1068_v57 = vrot.slane %v1067_v14, 2  ;;  %v1943_v25 = vcombine.low %v1935_v11, %v1942_v17  ;;  %v1811_v22 = vrot.slane %v3456_v15, 7  ;;  %v4350_v14 = vld [vmem:[#allocation20_spill] sm:$0xff] }
  0xfe   : > { %v1053_v55 = vor.u32 %v3704_v12, %v1048_v42  ;;  %v1072_v16 = vrot.slane %v1070_v6, 7  ;;  %v1044_v39 = vrot.slane %v1043_v51, 2  ;;  %v1814_v20 = vrot.slane %v3435_v45, 7 }
  0xff   : > { %2856 = vmatmul.mubr.msk.bf16.gmra.mrb[20].mxu1 %vm1328_vm11, %v1267_v37  ;;  %v1817_v50 = vrot.slane %v3462_v26, 7  ;;  %v1821_v12 = vrot.slane %v3470_v40, 7  ;;  %2924 = vmatmul.mubr.msk.bf16.gmra.mrb[8].mxu0 %vm1328_vm11, %v1943_v25  ;;  %v4345_v33 = vrot.slane %v4344_v3, 9  ;;  %v1813_v32 = vrot.slane %v1811_v22, 2 }
 0x100   : > { %v1054_v19 = vrot.slane %v1053_v55, 2  ;;  %2859 = vmatprep.mubr.msk.bf16.mxu1 %vm3041_vm1, %v4308_v62  ;;  %v1073_v15 = vsel %vm3516_vm5, %v1068_v57, %v1072_v16  ;;  %v1049_v26 = vsel %vm3516_vm5, %v1044_v39, %v1048_v42  ;;  %2927 = vmatprep.mubr.msk.bf16.mxu0 %vm3041_vm1, %v4308_v62  ;;  %v1816_v8 = vrot.slane %v1814_v20, 2 }
 0x101   : > { %v1812_v45 = vsel %vm3330_vm10, %v4345_v33, %v1811_v22  ;;  %v4347_v29 = vrot.slane %v4346_v2, 9  ;;  %v1268_v27 = vcombine.low %v1039_v24, %v1049_v26  ;;  %v1815_v63 = vsel %vm3330_vm10, %v1813_v32, %v1814_v20 }
 0x102   : > { %v1059_v10 = vsel %vm3516_vm5, %v1054_v19, %v1058_v9  ;;  %v1074_v52 = vshrl.u32 %v3700_v30, 16  ;;  %v4349_v47 = vshll.u32 %v4348_v4, 16  ;;  %v1818_v7 = vsel %vm3330_vm10, %v1816_v8, %v1817_v50 }
 0x103   : > { %v1269_v40 = vcombine.low %v1059_v10, %v1073_v15  ;;  %v1822_v11 = vsel %vm3330_vm10, %v4347_v29, %v1821_v12  ;;  %v1944_v36 = vcombine.low %v1812_v45, %v1815_v63  ;;  %v1090_v17 = vshll.u32 %v4350_v14, 16 }
 0x104   : > { %v1082_v49 = vrot.slane %v4349_v47, 7  ;;  %v1276_v55 = vrot.slane %v1268_v27, %v3275_v48  ;;  %v1945_v6 = vcombine.low %v1818_v7, %v1822_v11  ;;  %v1076_v24 = vrot.slane %v1074_v52, 6  ;;  %v4353_v47 = vld [vmem:[#allocation14_spill] sm:$0xff] }
 0x105   : > { %v1283_v42 = vrot.slane %v1269_v40, %v3275_v48  ;;  %v1952_v51 = vrot.slane %v1944_v36, %v3275_v48  ;;  %v1092_v9 = vrot.slane %v1090_v17, 7  ;;  %v1101_v57 = vor.u32 %v3782_v60, %v3780_v54  ;;  %v4352_v40 = vld [vmem:[#allocation13_spill] sm:$0xff]  ;;  %v4355_v36 = vld [vmem:[#allocation7_spill] sm:$0xff] }
 0x106   : > { %v1087_v37 = vor.u32 %v3759_v44, %v1082_v49  ;;  %v1104_v25 = vshll.u32 %v3767_v31, 16  ;;  %v1959_v22 = vrot.slane %v1945_v6, %v3275_v48  ;;  %v1077_v39 = vor.u32 %v1076_v24, %v1072_v16 }
 0x107   : > { %v1284_v19 = vcombine.low %v1276_v55, %v1283_v42  ;;  %v1102_v50 = vrot.slane %v1101_v57, 2  ;;  %v1108_v15 = vshrl.u32 %v3767_v31, 16  ;;  %v4351_v3 = vshll.u32 %v3756_v43, 16 }
 0x108   : > { %v1088_v20 = vrot.slane %v1087_v37, 2  ;;  %v1106_v10 = vrot.slane %v1104_v25, 7  ;;  %v1960_v33 = vcombine.low %v1952_v51, %v1959_v22  ;;  %v1078_v45 = vrot.slane %v1077_v39, 2 }
 0x109   : > { %v1116_v44 = vrot.slane %v4351_v3, 7  ;;  %2860 = vmatmul.mubr.msk.bf16.gmra.mrb[24].mxu1 %vm1328_vm11, %v1284_v19  ;;  %v1823_v60 = vrot.slane %v1821_v12, 2  ;;  %v1110_v32 = vrot.slane %v1108_v15, 6  ;;  %v1824_v26 = vrot.slane %v3466_v34, 7 }
 0x10a   : > { %v1093_v54 = vsel %vm3516_vm5, %v1088_v20, %v1092_v9  ;;  %2863 = vmatprep.mubr.msk.bf16.mxu1 %vm3041_vm1, %v4308_v62  ;;  %v1107_v16 = vsel %vm3516_vm5, %v1102_v50, %v1106_v10  ;;  %v1827_v8 = vrot.slane %v4352_v40, 7  ;;  %2928 = vmatmul.mubr.msk.bf16.gmra.mrb[12].mxu0 %vm1328_vm11, %v1960_v33  ;;  %v1083_v2 = vsel %vm3516_vm5, %v1078_v45, %v1082_v49  ;;  %v4357_v40 = vld [vmem:[#allocation8_spill] sm:$0xff] }
 0x10b   : > { %v1831_v29 = vrot.slane %v3555_v58, 7  ;;  %v1834_v12 = vrot.slane %v3547_v59, 7  ;;  %v1121_v11 = vor.u32 %v3797_v1, %v1116_v44  ;;  %v1111_v27 = vor.u32 %v1110_v32, %v1106_v10  ;;  %2931 = vmatprep.mubr.msk.bf16.mxu0 %vm3041_vm1, %v4308_v62 }
 0x10c   : > { %v1285_v63 = vcombine.low %v1083_v2, %v1093_v54  ;;  %v1825_v34 = vsel %vm3330_vm10, %v1823_v60, %v1824_v26  ;;  %v1826_v52 = vrot.slane %v1824_v26, 2  ;;  %v4354_v42 = vrot.slane %v4353_v47, 9  ;;  %v4358_v47 = vld [vmem:[#allocation18_spill] sm:$0xff] }
 0x10d   : > { %v1833_v7 = vrot.slane %v1831_v29, 2  ;;  %v1122_v58 = vrot.slane %v1121_v11, 2  ;;  %v1124_v17 = vshll.u32 %v4355_v36, 16  ;;  %v1112_v55 = vrot.slane %v1111_v27, 2 }
 0x10e   : > { %v1832_v49 = vsel %vm3330_vm10, %v4354_v42, %v1831_v29  ;;  %v1293_v1 = vrot.slane %v1285_v63, %v3275_v48  ;;  %v1828_v6 = vsel %vm3330_vm10, %v1826_v52, %v1827_v8  ;;  %v1135_v24 = vor.u32 %v3840_v38, %v3838_v23 }
 0x10f   : > { %v1835_v37 = vsel %vm3330_vm10, %v1833_v7, %v1834_v12  ;;  %v1961_v51 = vcombine.low %v1825_v34, %v1828_v6  ;;  %v1126_v9 = vrot.slane %v1124_v17, 7  ;;  %v1138_v57 = vshll.u32 %v3827_v46, 16  ;;  %v4359_v7 = vld [vmem:[#allocation16_spill] sm:$0xff] }
 0x110   : > { %v1117_v25 = vsel %vm3516_vm5, %v1112_v55, %v1116_v44  ;;  %v1962_v19 = vcombine.low %v1832_v49, %v1835_v37  ;;  %v1136_v22 = vrot.slane %v1135_v24, 2  ;;  %v1142_v39 = vshrl.u32 %v3827_v46, 16 }
 0x111   : > { %v1286_v20 = vcombine.low %v1107_v16, %v1117_v25  ;;  %v1969_v50 = vrot.slane %v1961_v51, %v3275_v48  ;;  %v1127_v23 = vsel %vm3516_vm5, %v1122_v58, %v1126_v9  ;;  %v1140_v38 = vrot.slane %v1138_v57, 7 }
 0x112   : > { %v1976_v10 = vrot.slane %v1962_v19, %v3275_v48  ;;  %v1144_v15 = vrot.slane %v1142_v39, 6  ;;  %v4356_v3 = vshll.u32 %v3819_v35, 16  ;;  %v1158_v45 = vshll.u32 %v3836_v53, 16 }
 0x113   : > { %v1300_v44 = vrot.slane %v1286_v20, %v3275_v48  ;;  %v1141_v54 = vsel %vm3516_vm5, %v1136_v22, %v1140_v38  ;;  %v1836_v60 = vrot.slane %v1834_v12, 2  ;;  %v1837_v16 = vrot.slane %v3575_v21, 7 }
 0x114   : > { %v1150_v33 = vrot.slane %v4356_v3, 7  ;;  %v1977_v32 = vcombine.low %v1969_v50, %v1976_v10  ;;  %v1145_v26 = vor.u32 %v1144_v15, %v1140_v38  ;;  %v1160_v2 = vrot.slane %v1158_v45, 7  ;;  %v4361_v38 = vld [vmem:[#allocation17_spill] sm:$0xff] }
 0x115   : > { %v1301_v29 = vcombine.low %v1293_v1, %v1300_v44  ;;  %v1302_v11 = vcombine.low %v1127_v23, %v1141_v54  ;;  %v1838_v27 = vsel %vm3330_vm10, %v1836_v60, %v1837_v16  ;;  %v1841_v63 = vrot.slane %v3618_v18, 7 }
 0x116   : > { %v1155_v8 = vor.u32 %v4357_v40, %v1150_v33  ;;  %2932 = vmatmul.mubr.msk.bf16.gmra.mrb[16].mxu0 %vm1328_vm11, %v1977_v32  ;;  %v1146_v34 = vrot.slane %v1145_v26, 2  ;;  %v1844_v12 = vrot.slane %v3602_v13, 7  ;;  %v1847_v21 = vrot.slane %v3626_v41, 7 }
 0x117   : > { %v2731_v42 = vrot.slane %v4358_v47, 9  ;;  %2864 = vmatmul.mubr.msk.bf16.gmra.mrb[28].mxu1 %vm1328_vm11, %v1301_v29  ;;  %v1310_v49 = vrot.slane %v1302_v11, %v3275_v48  ;;  %2935 = vmatprep.mubr.msk.bf16.mxu0 %vm3041_vm1, %v4308_v62  ;;  %v4360_v58 = vrot.slane %v4359_v7, 9  ;;  %v1843_v55 = vrot.slane %v1841_v63, 2 }
 0x118   : > { %v1156_v52 = vrot.slane %v1155_v8, 2  ;;  %2867 = vmatprep.mubr.msk.bf16.mxu1 %vm3041_vm1, %v4308_v62  ;;  %v1151_v41 = vsel %vm3516_vm5, %v1146_v34, %v1150_v33  ;;  %v1846_v6 = vrot.slane %v1844_v12, 2  ;;  %v1851_v9 = vrot.slane %v3682_v56, 7  ;;  %v4363_v8 = vld [vmem:[#allocation21_spill] sm:$0xff] }
 0x119   : > { %v1842_v17 = vsel %vm3330_vm10, %v4360_v58, %v1841_v63  ;;  %v1845_v51 = vsel %vm3330_vm10, %v1843_v55, %v1844_v12  ;;  %v1854_v57 = vrot.slane %v3665_v61, 7  ;;  %v1857_v19 = vrot.slane %v3686_v0, 7 }
 0x11a   : > { %v1161_v1 = vsel %vm3516_vm5, %v1156_v52, %v1160_v2  ;;  %v1978_v24 = vcombine.low %v1838_v27, %v1842_v17  ;;  %v1848_v25 = vsel %vm3330_vm10, %v1846_v6, %v1847_v21  ;;  %v1861_v22 = vrot.slane %v3700_v30, 7 }
 0x11b   : > { %v1303_v37 = vcombine.low %v1151_v41, %v1161_v1  ;;  %v1979_v39 = vcombine.low %v1845_v51, %v1848_v25  ;;  %v1853_v50 = vrot.slane %v1851_v9, 2  ;;  %v1550_v23 = vcombine.low %v3547_v59, %v4359_v7  ;;  %v4364_v1 = vld [vmem:[#allocation10_spill] sm:$0xff] }
 0x11c   : > { %v1986_v20 = vrot.slane %v1978_v24, %v3275_v48  ;;  %v4362_v10 = vrot.slane %v4361_v38, 9  ;;  %v1856_v3 = vrot.slane %v1854_v57, 2  ;;  %v1862_v0 = vsel %vm3330_vm10, %v2731_v42, %v1861_v22 }
 0x11d   : > { %v1317_v5 = vrot.slane %v1303_v37, %v3275_v48  ;;  %v1551_v33 = vcombine.low %v3618_v18, %v3602_v13  ;;  %v1993_v44 = vrot.slane %v1979_v39, %v3275_v48  ;;  %v1855_v54 = vsel %vm3330_vm10, %v1853_v50, %v1854_v57 }
 0x11e   : > { %v1852_v15 = vsel %vm3330_vm10, %v4362_v10, %v1851_v9  ;;  %v1858_v59 = vsel %vm3330_vm10, %v1856_v3, %v1857_v19  ;;  %v1863_v60 = vrot.slane %v1861_v22, 2  ;;  %v1864_v40 = vrot.slane %v4348_v4, 7 }
 0x11f   : > { %v1318_v45 = vcombine.low %v1310_v49, %v1317_v5  ;;  %v1994_v16 = vcombine.low %v1986_v20, %v1993_v44  ;;  %v1995_v32 = vcombine.low %v1852_v15, %v1855_v54  ;;  %v1996_v26 = vcombine.low %v1858_v59, %v1862_v0 }
 0x120   : > { %v2732_v2 = vrot.slane %v4363_v8, 9  ;;  %v1867_v13 = vrot.slane %v4350_v14, 7  ;;  %v1871_v18 = vrot.slane %v3767_v31, 7  ;;  %v1874_v29 = vrot.slane %v3756_v43, 7 }
 0x121   : > { %2868 = vmatmul.mubr.msk.bf16.gmra.mrb[32].mxu1 %vm1328_vm11, %v1318_v45  ;;  %v1558_v11 = vrot.slane %v1550_v23, %v3275_v48  ;;  %v1565_v27 = vrot.slane %v1551_v33, %v3275_v48  ;;  %2936 = vmatmul.mubr.msk.bf16.gmra.mrb[20].mxu0 %vm1328_vm11, %v1994_v16  ;;  %v1866_v63 = vrot.slane %v1864_v40, 2  ;;  %v2003_v52 = vrot.slane %v1995_v32, %v3275_v48 }
 0x122   : > { %2895 = vmatprep.mubr.msk.bf16.mxu1 %vm3041_vm1, %v4308_v62  ;;  %2939 = vmatprep.mubr.msk.bf16.mxu0 %vm3041_vm1, %v4308_v62  ;;  %v1873_v34 = vrot.slane %v1871_v18, 2  ;;  %v2010_v12 = vrot.slane %v1996_v26, %v3275_v48  ;;  %v1865_v14 = vsel %vm3330_vm10, %v1863_v60, %v1864_v40  ;;  %v1872_v42 = vsel %vm3330_vm10, %v2732_v2, %v1871_v18 }
 0x123   : > { %v1868_v21 = vsel %vm3330_vm10, %v1866_v63, %v1867_v13  ;;  %v1881_v7 = vrot.slane %v3827_v46, 7  ;;  %v1566_v58 = vcombine.low %v1558_v11, %v1565_v27  ;;  %v1567_v17 = vcombine.low %v4361_v38, %v3682_v56 }
 0x124   : > { %v1875_v49 = vsel %vm3330_vm10, %v1873_v34, %v1874_v29  ;;  %v1568_v55 = vcombine.low %v3665_v61, %v4358_v47  ;;  %v1884_v41 = vrot.slane %v3819_v35, 7  ;;  %v2733_v6 = vrot.slane %v4364_v1, 9 }
 0x125   : > { %v2011_v24 = vcombine.low %v2003_v52, %v2010_v12  ;;  %v2012_v37 = vcombine.low %v1865_v14, %v1868_v21  ;;  %v2013_v51 = vcombine.low %v1872_v42, %v1875_v49  ;;  %v1876_v9 = vrot.slane %v1874_v29, 2 }
 0x126   : > { %v1877_v57 = vrot.slane %v4355_v36, 7  ;;  %v1883_v25 = vrot.slane %v1881_v7, 2  ;;  %v1886_v56 = vrot.slane %v1884_v41, 2  ;;  %v1887_v19 = vrot.slane %v3836_v53, 7 }
 0x127   : > { %v1575_v61 = vrot.slane %v1567_v17, %v3275_v48  ;;  %v1582_v47 = vrot.slane %v1568_v55, %v3275_v48  ;;  %v2020_v22 = vrot.slane %v2012_v37, %v3275_v48  ;;  %v2027_v5 = vrot.slane %v2013_v51, %v3275_v48 }
 0x128   : > { %v1878_v36 = vsel %vm3330_vm10, %v1876_v9, %v1877_v57  ;;  %v1882_v39 = vsel %vm3330_vm10, %v2733_v6, %v1881_v7  ;;  %v1885_v53 = vsel %vm3330_vm10, %v1883_v25, %v1884_v41  ;;  %v1888_v20 = vsel %vm3330_vm10, %v1886_v56, %v1887_v19 }
 0x129   : > { %2896 = vmatmul.mubr.msk.bf16.vlgmr.msra.gmra.mrb[20].mxu1 %vm1328_vm11, %v1566_v58  ;;  %2940 = vmatmul.mubr.msk.bf16.gmra.mrb[24].mxu0 %vm1328_vm11, %v2011_v24  ;;  %v1583_v50 = vcombine.low %v1575_v61, %v1582_v47  ;;  %v1584_v23 = vcombine.low %v3700_v30, %v4348_v4  ;;  %v1585_v38 = vcombine.low %v4363_v8, %v3767_v31  ;;  %vm2384_vm3 = vcmask 58368  }
 0x12a   : > { %2899 = vmatprep.mubr.msk.bf16.mxu1 %vm3041_vm1, %v4308_v62  ;;  %2943 = vmatprep.mubr.msk.bf16.mxu0 %vm3041_vm1, %v4308_v62  ;;  %v2028_v10 = vcombine.low %v2020_v22, %v2027_v5  ;;  %v2029_v15 = vcombine.low %v1878_v36, %v1882_v39  ;;  %v2030_v3 = vcombine.low %v1885_v53, %v1888_v20 }
 0x12b   : > { %v1592_v28 = vrot.slane %v1584_v23, %v3275_v48  ;;  %v1599_v0 = vrot.slane %v1585_v38, %v3275_v48  ;;  %v1601_v33 = vcombine.low %v3756_v43, %v4364_v1  ;;  %v1602_v45 = vcombine.low %v3827_v46, %v3819_v35 }
 0x12c   : > { %v2037_v30 = vrot.slane %v2029_v15, %v3275_v48  ;;  %v2044_v31 = vrot.slane %v2030_v3, %v3275_v48 }
 0x12d   : > { %v1600_v4 = vcombine.low %v1592_v28, %v1599_v0  ;;  %v1609_v54 = vrot.slane %v1601_v33, %v3275_v48  ;;  %v1616_v59 = vrot.slane %v1602_v45, %v3275_v48 }
 0x12e   : > { %v2045_v44 = vcombine.low %v2037_v30, %v2044_v31 }
 0x12f   : > { %v1617_v60 = vcombine.low %v1609_v54, %v1616_v59 }
 0x131   : > { %2900 = vmatmul.mubr.msk.bf16.gmra.mrb[24].mxu1 %vm1328_vm11, %v1583_v50  ;;  %2944 = vmatmul.mubr.msk.bf16.gmra.mrb[28].mxu0 %vm1328_vm11, %v2028_v10 }
 0x132   : > { %2903 = vmatprep.mubr.msk.bf16.mxu1 %vm3041_vm1, %v4308_v62  ;;  %2947 = vmatprep.mubr.msk.bf16.mxu0 %vm3041_vm1, %v4308_v62 }
 0x139   : > { %2904 = vmatmul.mubr.msk.bf16.gmra.mrb[28].mxu1 %vm1328_vm11, %v1600_v4  ;;  %2948 = vmatmul.mubr.msk.bf16.gmra.mrb[32].mxu0 %vm1328_vm11, %v2045_v44 }
 0x13a   : > { %2907 = vmatprep.mubr.msk.bf16.mxu1 %vm3041_vm1, %v4308_v62  ;;  %vm2382_vm1 = vcmask 60416  }
 0x141   : > { %2908 = vmatmul.mubr.msk.bf16.gmra.mrb[32].mxu1 %vm1328_vm11, %v1617_v60 }
 0x190   : > { %v1394_v43 = vpop.f32.mrb[0].mxu1 }
 0x191   : > { %v2837_v16 = vpop.f32.mrb[1].mxu1 }
 0x192   : > { %v1397_v32 = vpop.f32.mrb[2].mxu1 }
 0x193   : > { %v2838_v35 = vpop.f32.mrb[3].mxu1 }
 0x19c   : > { %v1402_v46 = vpop.f32.mrb[4].mxu1 }
 0x19d   : > { %v2841_v26 = vpop.f32.mrb[5].mxu1 }
 0x19e   : > { %v1405_v40 = vpop.f32.mrb[6].mxu1 }
 0x19f   : > { %v2842_v8 = vpop.f32.mrb[7].mxu1 }
 0x1a9   : > { %v4126_v2 = vpop.f32.mrb[8].mxu1 }
 0x1aa   : > { %v2845_v62 = vpop.f32.mrb[9].mxu1 }
 0x1ab   : > { %v4128_v13 = vpop.f32.mrb[10].mxu1 }
 0x1ac   : > { %v2846_v18 = vpop.f32.mrb[11].mxu1 }
 0x1b5   : > { %v2119_v29 = vpop.f32.mrb[0].mxu0 }
 0x1b6   : > { %v4131_v48 = vpop.f32.mrb[12].mxu1  ;;  %v2955_v11 = vadd.f32 %v2119_v29, %v1394_v43  ;;  %v2917_v27 = vpop.f32.mrb[1].mxu0 }
 0x1b7   : > { %v2849_v63 = vpop.f32.mrb[13].mxu1  ;;  %v2122_v34 = vpop.f32.mrb[2].mxu0 }
 0x1b8   : > { %v4133_v52 = vpop.f32.mrb[14].mxu1  ;;  %v2226_v12 = vcombine.high %v2955_v11, %v2955_v11  ;;  %v2956_v14 = vadd.f32 %v2122_v34, %v1397_v32  ;;  %v2918_v21 = vpop.f32.mrb[3].mxu0  ;;  %v2461_v7 = vmul.f32 %v2955_v11, %v2955_v11 }
 0x1b9   : > { %v2850_v42 = vpop.f32.mrb[15].mxu1 }
 0x1ba   : > { %v2262_v49 = vcombine.low %v2955_v11, %v2226_v12  ;;  %v2462_v58 = vmul.f32 %v2226_v12, %v2226_v12  ;;  %v2775_v17 = vpack.c.bf16 %v2956_v14, %v2956_v14  ;;  %v2463_v55 = vmul.f32 %v2956_v14, %v2956_v14 }
 0x1bb   : > { %v2409_v24 = vsel %vm2382_vm1, %v2956_v14, 0.0  ;;  %v2227_v22 = vcombine.high %v2956_v14, %v2956_v14 }
 0x1bc   : > { %v2774_v41 = vpack.c.bf16 %v2262_v49, %v2262_v49  ;;  %v2408_v1 = vsel %vm466_vm2, %v2262_v49, 0.0  ;;  %v2521_v6 = vcombine.low %v2461_v7, %v2462_v58  ;;  %2385 = vst.msk [vmem:[%s4138_s22 + $0x4] sm:$0x3] %vm2384_vm3, %v2775_v17  ;;  %v2546_v9 = vsel %vm2382_vm1, %v2463_v55, 0.0 }
 0x1bd   : > { %v2410_v37 = vadd.f32 %v2409_v24, %v2408_v1  ;;  %v2464_v10 = vmul.f32 %v2227_v22, %v2227_v22 }
 0x1be   : > { %2383 = vst.msk [vmem:[%s4138_s22] sm:$0xf] %vm2382_vm1, %v2774_v41  ;;  %v2545_v51 = vsel %vm466_vm2, %v2521_v6, 0.0 }
 0x1bf   : > { %v2547_v57 = vadd.f32 %v2546_v9, %v2545_v51 }
 0x1c3   : > { %v4148_v25 = vpop.f32.mrb[16].mxu1 }
 0x1c4   : > { %v2853_v56 = vpop.f32.mrb[17].mxu1 }
 0x1c5   : > { %v4150_v19 = vpop.f32.mrb[18].mxu1 }
 0x1c6   : > { %v2854_v61 = vpop.f32.mrb[19].mxu1 }
 0x1c9   : > { %v2127_v47 = vpop.f32.mrb[4].mxu0 }
 0x1ca   : > { %v2957_v5 = vadd.f32 %v2127_v47, %v1402_v46  ;;  %v2921_v36 = vpop.f32.mrb[5].mxu0 }
 0x1cb   : > { %v2130_v39 = vpop.f32.mrb[6].mxu0 }
 0x1cc   : > { %v2228_v53 = vcombine.high %v2957_v5, %v2957_v5  ;;  %v2263_v20 = vcombine.low %v2227_v22, %v2957_v5  ;;  %v2465_v50 = vmul.f32 %v2957_v5, %v2957_v5  ;;  %v2958_v23 = vadd.f32 %v2130_v39, %v1405_v40  ;;  %v2922_v38 = vpop.f32.mrb[7].mxu0 }
 0x1ce   : > { %v2776_v15 = vpack.c.bf16 %v2263_v20, %v2263_v20  ;;  %v2777_v3 = vpack.c.bf16 %v2228_v53, %v2228_v53  ;;  %v2411_v28 = vsel %vm466_vm2, %v2263_v20, 0.0  ;;  %v2466_v30 = vmul.f32 %v2228_v53, %v2228_v53 }
 0x1cf   : > { %v2412_v0 = vadd.f32 %v2411_v28, %v2410_v37  ;;  %v2522_v31 = vcombine.low %v2464_v10, %v2465_v50  ;;  %v2229_v4 = vcombine.high %v2958_v23, %v2958_v23  ;;  %v2413_v33 = vsel %vm2382_vm1, %v2228_v53, 0.0 }
 0x1d0   : > { %2386 = vst.msk [vmem:[%s4138_s22 + $0x8] sm:$0xf] %vm2382_vm1, %v2776_v15  ;;  %v2467_v60 = vmul.f32 %v2958_v23, %v2958_v23  ;;  %v2550_v32 = vsel %vm2382_vm1, %v2466_v30, 0.0 }
 0x1d1   : > { %2387 = vst.msk [vmem:[%s4138_s22 + $0xc] sm:$0x3] %vm2384_vm3, %v2777_v3  ;;  %v2548_v45 = vsel %vm466_vm2, %v2522_v31, 0.0  ;;  %v2264_v44 = vcombine.low %v2958_v23, %v2229_v4  ;;  %v2414_v54 = vadd.f32 %v2413_v33, %v2412_v0  ;;  %v2468_v43 = vmul.f32 %v2229_v4, %v2229_v4 }
 0x1d2   : > { %v2549_v59 = vadd.f32 %v2548_v45, %v2547_v57  ;;  %v2135_v16 = vpop.f32.mrb[8].mxu0 }
 0x1d3   : > { %v2778_v35 = vpack.c.bf16 %v2264_v44, %v2264_v44  ;;  %v2415_v46 = vsel %vm466_vm2, %v2264_v44, 0.0  ;;  %v2959_v26 = vadd.f32 %v2135_v16, %v4126_v2  ;;  %v2925_v40 = vpop.f32.mrb[9].mxu0  ;;  %v2523_v62 = vcombine.low %v2467_v60, %v2468_v43 }
 0x1d4   : > { %v2416_v8 = vadd.f32 %v2415_v46, %v2414_v54  ;;  %v2551_v18 = vadd.f32 %v2550_v32, %v2549_v59  ;;  %v2138_v29 = vpop.f32.mrb[10].mxu0 }
 0x1d5   : > { %2388 = vst.msk [vmem:[%s4138_s22 + $0x10] sm:$0xf] %vm2382_vm1, %v2778_v35  ;;  %v2779_v11 = vpack.c.bf16 %v2959_v26, %v2959_v26  ;;  %v2417_v27 = vsel %vm2382_vm1, %v2959_v26, 0.0  ;;  %v2469_v63 = vmul.f32 %v2959_v26, %v2959_v26  ;;  %v2960_v34 = vadd.f32 %v2138_v29, %v4128_v13  ;;  %v2926_v12 = vpop.f32.mrb[11].mxu0 }
 0x1d6   : > { %v2552_v14 = vsel %vm466_vm2, %v2523_v62, 0.0  ;;  %v2418_v21 = vadd.f32 %v2417_v27, %v2416_v8  ;;  %v2230_v2 = vcombine.high %v2959_v26, %v2959_v26 }
 0x1d7   : > { %v2553_v42 = vadd.f32 %v2552_v14, %v2551_v18  ;;  %2389 = vst.msk [vmem:[%s4138_s22 + $0x14] sm:$0x3] %vm2384_vm3, %v2779_v11  ;;  %v2554_v49 = vsel %vm2382_vm1, %v2469_v63, 0.0  ;;  %v2231_v7 = vcombine.high %v2960_v34, %v2960_v34  ;;  %v2471_v58 = vmul.f32 %v2960_v34, %v2960_v34 }
 0x1d8   : > { %v2265_v17 = vcombine.low %v2230_v2, %v2960_v34  ;;  %v2470_v55 = vmul.f32 %v2230_v2, %v2230_v2 }
 0x1d9   : > { %v2555_v41 = vadd.f32 %v2554_v49, %v2553_v42  ;;  %v2781_v1 = vpack.c.bf16 %v2231_v7, %v2231_v7  ;;  %v2472_v24 = vmul.f32 %v2231_v7, %v2231_v7  ;;  %v2421_v9 = vsel %vm2382_vm1, %v2231_v7, 0.0 }
 0x1da   : > { %v2780_v6 = vpack.c.bf16 %v2265_v17, %v2265_v17  ;;  %v2419_v13 = vsel %vm466_vm2, %v2265_v17, 0.0  ;;  %v2524_v37 = vcombine.low %v2470_v55, %v2471_v58 }
 0x1db   : > { %2391 = vst.msk [vmem:[%s4138_s22 + $0x1c] sm:$0x3] %vm2384_vm3, %v2781_v1  ;;  %v2420_v51 = vadd.f32 %v2419_v13, %v2418_v21  ;;  %v2558_v36 = vsel %vm2382_vm1, %v2472_v24, 0.0 }
 0x1dc   : > { %2390 = vst.msk [vmem:[%s4138_s22 + $0x18] sm:$0xf] %vm2382_vm1, %v2780_v6  ;;  %v2556_v57 = vsel %vm466_vm2, %v2524_v37, 0.0 }
 0x1dd   : > { %v2143_v56 = vpop.f32.mrb[12].mxu0  ;;  %v2557_v61 = vadd.f32 %v2556_v57, %v2555_v41  ;;  %v2422_v22 = vadd.f32 %v2421_v9, %v2420_v51 }
 0x1de   : > { %v2961_v47 = vadd.f32 %v2143_v56, %v4131_v48  ;;  %v2929_v5 = vpop.f32.mrb[13].mxu0 }
 0x1df   : > { %v2146_v39 = vpop.f32.mrb[14].mxu0  ;;  %v2559_v20 = vadd.f32 %v2558_v36, %v2557_v61 }
 0x1e0   : > { %v2232_v53 = vcombine.high %v2961_v47, %v2961_v47  ;;  %v2962_v50 = vadd.f32 %v2146_v39, %v4133_v52  ;;  %v2930_v23 = vpop.f32.mrb[15].mxu0  ;;  %v2473_v10 = vmul.f32 %v2961_v47, %v2961_v47 }
 0x1e2   : > { %v2266_v38 = vcombine.low %v2961_v47, %v2232_v53  ;;  %v2474_v15 = vmul.f32 %v2232_v53, %v2232_v53  ;;  %v2783_v3 = vpack.c.bf16 %v2962_v50, %v2962_v50  ;;  %v2475_v30 = vmul.f32 %v2962_v50, %v2962_v50 }
 0x1e3   : > { %v2425_v33 = vsel %vm2382_vm1, %v2962_v50, 0.0  ;;  %v2233_v59 = vcombine.high %v2962_v50, %v2962_v50 }
 0x1e4   : > { %v2782_v28 = vpack.c.bf16 %v2266_v38, %v2266_v38  ;;  %v2423_v0 = vsel %vm466_vm2, %v2266_v38, 0.0  ;;  %v2525_v48 = vcombine.low %v2473_v10, %v2474_v15  ;;  %2393 = vst.msk [vmem:[%s4138_s22 + $0x24] sm:$0x3] %vm2384_vm3, %v2783_v3  ;;  %v2562_v44 = vsel %vm2382_vm1, %v2475_v30, 0.0 }
 0x1e5   : > { %v2424_v31 = vadd.f32 %v2423_v0, %v2422_v22  ;;  %v2476_v62 = vmul.f32 %v2233_v59, %v2233_v59 }
 0x1e6   : > { %2392 = vst.msk [vmem:[%s4138_s22 + $0x20] sm:$0xf] %vm2382_vm1, %v2782_v28  ;;  %v2560_v4 = vsel %vm466_vm2, %v2525_v48, 0.0 }
 0x1e7   : > { %v2561_v52 = vadd.f32 %v2560_v4, %v2559_v20  ;;  %v2426_v45 = vadd.f32 %v2425_v33, %v2424_v31 }
 0x1e9   : > { %v2151_v54 = vpop.f32.mrb[16].mxu0  ;;  %v2563_v60 = vadd.f32 %v2562_v44, %v2561_v52 }
 0x1ea   : > { %v2963_v43 = vadd.f32 %v2151_v54, %v4148_v25  ;;  %v2933_v16 = vpop.f32.mrb[17].mxu0 }
 0x1eb   : > { %v2154_v32 = vpop.f32.mrb[18].mxu0 }
 0x1ec   : > { %v2234_v35 = vcombine.high %v2963_v43, %v2963_v43  ;;  %v2267_v46 = vcombine.low %v2233_v59, %v2963_v43  ;;  %v2477_v26 = vmul.f32 %v2963_v43, %v2963_v43  ;;  %v2964_v40 = vadd.f32 %v2154_v32, %v4150_v19  ;;  %v2934_v8 = vpop.f32.mrb[19].mxu0 }
 0x1ee   : > { %v2784_v18 = vpack.c.bf16 %v2267_v46, %v2267_v46  ;;  %v2785_v29 = vpack.c.bf16 %v2234_v35, %v2234_v35  ;;  %v2427_v11 = vsel %vm466_vm2, %v2267_v46, 0.0  ;;  %v2478_v63 = vmul.f32 %v2234_v35, %v2234_v35 }
 0x1ef   : > { %v2428_v27 = vadd.f32 %v2427_v11, %v2426_v45  ;;  %v2526_v34 = vcombine.low %v2476_v62, %v2477_v26  ;;  %v2235_v12 = vcombine.high %v2964_v40, %v2964_v40  ;;  %v2429_v25 = vsel %vm2382_vm1, %v2234_v35, 0.0 }
 0x1f0   : > { %2394 = vst.msk [vmem:[%s4138_s22 + $0x28] sm:$0xf] %vm2382_vm1, %v2784_v18  ;;  %v2479_v42 = vmul.f32 %v2964_v40, %v2964_v40  ;;  %v2566_v7 = vsel %vm2382_vm1, %v2478_v63, 0.0 }
 0x1f1   : > { %2395 = vst.msk [vmem:[%s4138_s22 + $0x2c] sm:$0x3] %vm2384_vm3, %v2785_v29  ;;  %v2564_v14 = vsel %vm466_vm2, %v2526_v34, 0.0  ;;  %v2268_v19 = vcombine.low %v2964_v40, %v2235_v12  ;;  %v2430_v21 = vadd.f32 %v2429_v25, %v2428_v27  ;;  %v2480_v49 = vmul.f32 %v2235_v12, %v2235_v12 }
 0x1f2   : > { %v2565_v2 = vadd.f32 %v2564_v14, %v2563_v60 }
 0x1f3   : > { %v2786_v58 = vpack.c.bf16 %v2268_v19, %v2268_v19  ;;  %v2431_v17 = vsel %vm466_vm2, %v2268_v19, 0.0  ;;  %v2527_v41 = vcombine.low %v2479_v42, %v2480_v49 }
 0x1f4   : > { %v2432_v55 = vadd.f32 %v2431_v17, %v2430_v21  ;;  %v2567_v1 = vadd.f32 %v2566_v7, %v2565_v2  ;;  %v2159_v6 = vpop.f32.mrb[20].mxu0 }
 0x1f5   : > { %2396 = vst.msk [vmem:[%s4138_s22 + $0x30] sm:$0xf] %vm2382_vm1, %v2786_v58  ;;  %v2937_v13 = vpop.f32.mrb[21].mxu0  ;;  %v2568_v24 = vsel %vm466_vm2, %v2527_v41, 0.0 }
 0x1f6   : > { %v2162_v37 = vpop.f32.mrb[22].mxu0  ;;  %v2569_v51 = vadd.f32 %v2568_v24, %v2567_v1 }
 0x1f7   : > { %v2938_v9 = vpop.f32.mrb[23].mxu0 }
 0x1fc   : > { %v1731_v57 = vpop.f32.mrb[20].mxu1  ;;  %v2167_v22 = vpop.f32.mrb[24].mxu0 }
 0x1fd   : > { %v2965_v56 = vadd.f32 %v2159_v6, %v1731_v57  ;;  %v2897_v61 = vpop.f32.mrb[21].mxu1  ;;  %v2941_v50 = vpop.f32.mrb[25].mxu0 }
 0x1fe   : > { %v1734_v47 = vpop.f32.mrb[22].mxu1  ;;  %v2170_v10 = vpop.f32.mrb[26].mxu0 }
 0x1ff   : > { %v2787_v5 = vpack.c.bf16 %v2965_v56, %v2965_v56  ;;  %v2433_v36 = vsel %vm2382_vm1, %v2965_v56, 0.0  ;;  %v2481_v39 = vmul.f32 %v2965_v56, %v2965_v56  ;;  %v2966_v53 = vadd.f32 %v2162_v37, %v1734_v47  ;;  %v2898_v20 = vpop.f32.mrb[23].mxu1  ;;  %v2942_v0 = vpop.f32.mrb[27].mxu0 }
 0x200   : > { %v2434_v23 = vadd.f32 %v2433_v36, %v2432_v55  ;;  %v2236_v38 = vcombine.high %v2965_v56, %v2965_v56 }
 0x201   : > { %2397 = vst.msk [vmem:[%s4138_s22 + $0x34] sm:$0x3] %vm2384_vm3, %v2787_v5  ;;  %v2570_v15 = vsel %vm2382_vm1, %v2481_v39, 0.0  ;;  %v2237_v3 = vcombine.high %v2966_v53, %v2966_v53  ;;  %v2483_v28 = vmul.f32 %v2966_v53, %v2966_v53 }
 0x202   : > { %v2571_v48 = vadd.f32 %v2570_v15, %v2569_v51  ;;  %v2269_v30 = vcombine.low %v2236_v38, %v2966_v53  ;;  %v2482_v31 = vmul.f32 %v2236_v38, %v2236_v38 }
 0x203   : > { %v2789_v4 = vpack.c.bf16 %v2237_v3, %v2237_v3  ;;  %v2484_v45 = vmul.f32 %v2237_v3, %v2237_v3  ;;  %v2437_v16 = vsel %vm2382_vm1, %v2237_v3, 0.0 }
 0x204   : > { %v2788_v33 = vpack.c.bf16 %v2269_v30, %v2269_v30  ;;  %v2435_v52 = vsel %vm466_vm2, %v2269_v30, 0.0  ;;  %v2528_v44 = vcombine.low %v2482_v31, %v2483_v28  ;;  %v1739_v54 = vpop.f32.mrb[24].mxu1  ;;  %v2175_v46 = vpop.f32.mrb[28].mxu0 }
 0x205   : > { %2399 = vst.msk [vmem:[%s4138_s22 + $0x3c] sm:$0x3] %vm2384_vm3, %v2789_v4  ;;  %v2436_v59 = vadd.f32 %v2435_v52, %v2434_v23  ;;  %v2967_v60 = vadd.f32 %v2167_v22, %v1739_v54  ;;  %v2901_v43 = vpop.f32.mrb[25].mxu1  ;;  %v2945_v18 = vpop.f32.mrb[29].mxu0  ;;  %v2574_v29 = vsel %vm2382_vm1, %v2484_v45, 0.0 }
 0x206   : > { %2398 = vst.msk [vmem:[%s4138_s22 + $0x38] sm:$0xf] %vm2382_vm1, %v2788_v33  ;;  %v2572_v32 = vsel %vm466_vm2, %v2528_v44, 0.0  ;;  %v1742_v35 = vpop.f32.mrb[26].mxu1  ;;  %v2178_v27 = vpop.f32.mrb[30].mxu0 }
 0x207   : > { %v2573_v26 = vadd.f32 %v2572_v32, %v2571_v48  ;;  %v2238_v40 = vcombine.high %v2967_v60, %v2967_v60  ;;  %v2438_v8 = vadd.f32 %v2437_v16, %v2436_v59  ;;  %v2902_v62 = vpop.f32.mrb[27].mxu1  ;;  %v2968_v11 = vadd.f32 %v2170_v10, %v1742_v35  ;;  %v2946_v14 = vpop.f32.mrb[31].mxu0 }
 0x208   : > { %v2485_v34 = vmul.f32 %v2967_v60, %v2967_v60 }
 0x209   : > { %v2270_v63 = vcombine.low %v2967_v60, %v2238_v40  ;;  %v2486_v12 = vmul.f32 %v2238_v40, %v2238_v40  ;;  %v2575_v25 = vadd.f32 %v2574_v29, %v2573_v26  ;;  %v2791_v19 = vpack.c.bf16 %v2968_v11, %v2968_v11 }
 0x20a   : > { %v2487_v21 = vmul.f32 %v2968_v11, %v2968_v11  ;;  %v2239_v17 = vcombine.high %v2968_v11, %v2968_v11  ;;  %v2441_v41 = vsel %vm2382_vm1, %v2968_v11, 0.0 }
 0x20b   : > { %v2790_v2 = vpack.c.bf16 %v2270_v63, %v2270_v63  ;;  %v2439_v42 = vsel %vm466_vm2, %v2270_v63, 0.0  ;;  %v2529_v49 = vcombine.low %v2485_v34, %v2486_v12  ;;  %2401 = vst.msk [vmem:[%s4138_s22 + $0x44] sm:$0x3] %vm2384_vm3, %v2791_v19 }
 0x20c   : > { %v2440_v7 = vadd.f32 %v2439_v42, %v2438_v8  ;;  %v1747_v58 = vpop.f32.mrb[28].mxu1  ;;  %v2578_v37 = vsel %vm2382_vm1, %v2487_v21, 0.0  ;;  %v2183_v9 = vpop.f32.mrb[32].mxu0  ;;  %v2488_v39 = vmul.f32 %v2239_v17, %v2239_v17 }
 0x20d   : > { %2400 = vst.msk [vmem:[%s4138_s22 + $0x40] sm:$0xf] %vm2382_vm1, %v2790_v2  ;;  %v2576_v55 = vsel %vm466_vm2, %v2529_v49, 0.0  ;;  %v2969_v1 = vadd.f32 %v2175_v46, %v1747_v58  ;;  %v2905_v6 = vpop.f32.mrb[29].mxu1  ;;  %v2949_v5 = vpop.f32.mrb[33].mxu0 }
 0x20e   : > { %v2577_v13 = vadd.f32 %v2576_v55, %v2575_v25  ;;  %v2442_v24 = vadd.f32 %v2441_v41, %v2440_v7  ;;  %v1750_v51 = vpop.f32.mrb[30].mxu1  ;;  %v2186_v53 = vpop.f32.mrb[34].mxu0 }
 0x20f   : > { %v2240_v57 = vcombine.high %v2969_v1, %v2969_v1  ;;  %v2271_v56 = vcombine.low %v2239_v17, %v2969_v1  ;;  %v2489_v61 = vmul.f32 %v2969_v1, %v2969_v1  ;;  %v2970_v47 = vadd.f32 %v2178_v27, %v1750_v51  ;;  %v2906_v22 = vpop.f32.mrb[31].mxu1  ;;  %v2950_v38 = vpop.f32.mrb[35].mxu0 }
 0x210   : > { %v2579_v36 = vadd.f32 %v2578_v37, %v2577_v13 }
 0x211   : > { %v2792_v20 = vpack.c.bf16 %v2271_v56, %v2271_v56  ;;  %v2793_v50 = vpack.c.bf16 %v2240_v57, %v2240_v57  ;;  %v2443_v23 = vsel %vm466_vm2, %v2271_v56, 0.0  ;;  %v2490_v15 = vmul.f32 %v2240_v57, %v2240_v57 }
 0x212   : > { %v2444_v10 = vadd.f32 %v2443_v23, %v2442_v24  ;;  %v2530_v3 = vcombine.low %v2488_v39, %v2489_v61  ;;  %v2241_v28 = vcombine.high %v2970_v47, %v2970_v47  ;;  %v2445_v0 = vsel %vm2382_vm1, %v2240_v57, 0.0 }
 0x213   : > { %2402 = vst.msk [vmem:[%s4138_s22 + $0x48] sm:$0xf] %vm2382_vm1, %v2792_v20  ;;  %v2491_v52 = vmul.f32 %v2970_v47, %v2970_v47  ;;  %v2582_v59 = vsel %vm2382_vm1, %v2490_v15, 0.0 }
 0x214   : > { %2403 = vst.msk [vmem:[%s4138_s22 + $0x4c] sm:$0x3] %vm2384_vm3, %v2793_v50  ;;  %v2580_v48 = vsel %vm466_vm2, %v2530_v3, 0.0  ;;  %v2272_v30 = vcombine.low %v2970_v47, %v2241_v28  ;;  %v2446_v31 = vadd.f32 %v2445_v0, %v2444_v10  ;;  %v1755_v4 = vpop.f32.mrb[32].mxu1  ;;  %v2492_v45 = vmul.f32 %v2241_v28, %v2241_v28 }
 0x215   : > { %v2581_v33 = vadd.f32 %v2580_v48, %v2579_v36  ;;  %v2971_v44 = vadd.f32 %v2183_v9, %v1755_v4  ;;  %v2909_v54 = vpop.f32.mrb[33].mxu1 }
 0x216   : > { %v2794_v60 = vpack.c.bf16 %v2272_v30, %v2272_v30  ;;  %v2447_v43 = vsel %vm466_vm2, %v2272_v30, 0.0  ;;  %v1758_v16 = vpop.f32.mrb[34].mxu1  ;;  %v2531_v35 = vcombine.low %v2491_v52, %v2492_v45 }
 0x217   : > { %v2448_v32 = vadd.f32 %v2447_v43, %v2446_v31  ;;  %v2583_v46 = vadd.f32 %v2582_v59, %v2581_v33  ;;  %v2795_v26 = vpack.c.bf16 %v2971_v44, %v2971_v44  ;;  %v2910_v40 = vpop.f32.mrb[35].mxu1  ;;  %v2449_v8 = vsel %vm2382_vm1, %v2971_v44, 0.0 }
 0x218   : > { %2404 = vst.msk [vmem:[%s4138_s22 + $0x50] sm:$0xf] %vm2382_vm1, %v2794_v60  ;;  %v2493_v62 = vmul.f32 %v2971_v44, %v2971_v44  ;;  %v2972_v18 = vadd.f32 %v2186_v53, %v1758_v16  ;;  %v2242_v29 = vcombine.high %v2971_v44, %v2971_v44  ;;  %v2584_v11 = vsel %vm466_vm2, %v2531_v35, 0.0 }
 0x219   : > { %2405 = vst.msk [vmem:[%s4138_s22 + $0x54] sm:$0x3] %vm2384_vm3, %v2795_v26  ;;  %v2450_v27 = vadd.f32 %v2449_v8, %v2448_v32  ;;  %v2585_v63 = vadd.f32 %v2584_v11, %v2583_v46 }
 0x21a   : > { %v2586_v34 = vsel %vm2382_vm1, %v2493_v62, 0.0  ;;  %v2243_v12 = vcombine.high %v2972_v18, %v2972_v18  ;;  %v2273_v25 = vcombine.low %v2242_v29, %v2972_v18  ;;  %v2494_v14 = vmul.f32 %v2242_v29, %v2242_v29 }
 0x21b   : > { %v2495_v19 = vmul.f32 %v2972_v18, %v2972_v18  ;;  %v2587_v21 = vadd.f32 %v2586_v34, %v2585_v63 }
 0x21c   : > { %v2796_v2 = vpack.c.bf16 %v2273_v25, %v2273_v25  ;;  %v2797_v42 = vpack.c.bf16 %v2243_v12, %v2243_v12  ;;  %v2451_v49 = vsel %vm466_vm2, %v2273_v25, 0.0  ;;  %v2496_v58 = vmul.f32 %v2243_v12, %v2243_v12 }
 0x21d   : > { %v2452_v7 = vadd.f32 %v2451_v49, %v2450_v27  ;;  %v2532_v17 = vcombine.low %v2494_v14, %v2495_v19  ;;  %v2453_v55 = vsel %vm2382_vm1, %v2243_v12, 0.0 }
 0x21e   : > { %2406 = vst.msk [vmem:[%s4138_s22 + $0x58] sm:$0xf] %vm2382_vm1, %v2796_v2  ;;  %v2590_v24 = vsel %vm2382_vm1, %v2496_v58, 0.0 }
 0x21f   : > { %2407 = vst.msk [vmem:[%s4138_s22 + $0x5c] sm:$0x3] %vm2384_vm3, %v2797_v42  ;;  %v2454_v41 = vadd.f32 %v2453_v55, %v2452_v7  ;;  %v2588_v1 = vsel %vm466_vm2, %v2532_v17, 0.0 }
 0x220   : > { %v2589_v6 = vadd.f32 %v2588_v1, %v2587_v21 }
 0x221   : > { %v2455_v13 = vrot.slane %v2454_v41, 4 }
 0x222   : > { %v2591_v37 = vadd.f32 %v2590_v24, %v2589_v6 }
 0x223   : > { %v2456_v51 = vadd.f32 %v2455_v13, %v2454_v41 }
 0x224   : > { %v2592_v9 = vrot.slane %v2591_v37, 4 }
 0x225   : > { %v2457_v57 = vrot.slane %v2456_v51, 2 }
 0x226   : > { %v2593_v56 = vadd.f32 %v2592_v9, %v2591_v37 }
 0x227   : > { %v2458_v61 = vadd.f32 %v2457_v57, %v2456_v51 }
 0x228   : > { %v2594_v47 = vrot.slane %v2593_v56, 2 }
 0x229   : > { %v2459_v22 = vrot.slane %v2458_v61, 1 }
 0x22a   : > { %v2595_v5 = vadd.f32 %v2594_v47, %v2593_v56 }
 0x22b   : > { %v2460_v36 = vadd.f32 %v2459_v22, %v2458_v61 }
 0x22c   : > { %v2596_v39 = vrot.slane %v2595_v5, 1 }
 0x22d   : > { %2599 = vst.msk [vmem:[%s235_s26] sm:$0x1] %vm2598_vm6, %v2460_v36 }
 0x22e   : > { %v2597_v53 = vadd.f32 %v2596_v39, %v2595_v5 }
 0x230   : > { %2600 = vst.msk [vmem:[%s235_s26 + $0x1] sm:$0x1] %vm2598_vm6, %v2597_v53 }
 0x231 PF: > { %s16_s18 = sadd.s32 1, %s3036_s18  }
 0x232   : > { %p13_p4 = scmp.ge.s32.totalorder %s16_s18, 4  }
 0x234   :  { %15 = sbr.rel (!%p13_p4) target bundleno = 1 (0x1), region = 80 }

// kernel: encoder_block_forward.3
= control target key start
LH: loop header
LB: loop body
LE: loop exit
PB: predicated region body
PF: predicated region fallthrough
CT: control target
= control target key end

     0   :  { %s6917_s12 = smov 0   ;;  %s9047_s0 = inlined_call_operand.vmem [shape: f32[2,16,16,4], index: 0, kind: input, shape index: {}]   ;;  %s9048_s1 = inlined_call_operand.vmem [shape: bf16[3,12,8], index: 1, kind: input, shape index: {}]   ;;  %s9049_s2 = inlined_call_operand.vmem [shape: bf16[2,14,14,8], index: 2, kind: output, shape index: {0}]   ;;  %s9050_s3 = inlined_call_operand.vmem [shape: f32[2,2,8], index: 3, kind: output, shape index: {1}]  }
   0x1 LB: > { %s6349_s13 = sadd.s32 4294967295, %s6889_s12   ;;  %p6353_p0 = scmp.ge.s32.totalorder %s6889_s12, 1  ;;  %s6889_s12 = sphi %s6917_s12, %s14_s12  }
   0x2   : > { %p140_p1 = scmp.lt.s32.totalorder %s6889_s12, 3 }
   0x4   : > { %p141_p2 = pnand %p6353_p0, %p140_p1 }
   0x6   : > { %144 = sbr.rel (%p141_p2) target bundleno = 689 (0x2b1), region = 28 }
   0xd   : > { %p168_p3 = scmp.lt.s32.totalorder %s6349_s13, 1  ;;  %s6891_s18 = smov 4   ;;  %v6880_v18 = vld [vmem:[%s9048_s1] sm:$0x3f]   ;;  %vm2540_vm0 = vcmask 1045504   ;;  %v9051_v21 = vmov 0.0   ;;  %v392_v52 = vlaneseq }
   0xe   : > { %s6892_s19 = smov 8   ;;  %6678 = vmatprep.subr.bf16.mxu0 %v9051_v21  ;;  %v6980_v22 = vsel %vm2540_vm0, %v6880_v18, 0  ;;  %6624 = vmatprep.subr.bf16.mxu1 %v9051_v21  ;;  %vm6894_vm1 = vmmov 0   ;;  %v6882_v32 = vld [vmem:[%s9048_s1 + $0x8] sm:$0x3f]   ;;  %vm302_vm2 = vcmask 31744  }
   0xf   : > { %s9279_s13 = smov (!%p168_p3, %s6349_s13), 1  ;;  %6679 = vmatpush3.bf16.msra.mxu0 %v6980_v22  ;;  %6680 = vmatprep.mubr.msk.bf16.mxu0 %vm6894_vm1, %v9051_v21  ;;  %v2542_v33 = vsel %vm2540_vm0, %v6882_v32, 0  ;;  %v6895_v50 = vmov 1966171168   ;;  %v7063_v56 = vshrl.u32 %v392_v52, 7  ;;  %vm345_vm3 = vcmask 64512  }
  0x10   : > { %s6553_s14 = sshll.u32 %s9279_s13, 8  ;;  %6732 = vmatprep.subr.bf16.mxu0 %v9051_v21  ;;  %6626 = vmatprep.mubr.msk.bf16.mxu1 %vm6894_vm1, %v9051_v21  ;;  %v390_v51 = vunpack.c.l.s4 %v6895_v50  ;;  %vm1076_vm4 = vsmask.f32 256  ;;  %vm1077_vm5 = vsmask.f32 1284  ;;  %s6865_s26 = smul.u32 112, %s9279_s13 }
  0x11   : > { %s6931_s17 = scalar_lea.vmem %s9047_s0, %s6553_s14  ;;  %6625 = vmatpush3.bf16.msra.mxu1 %v2542_v33  ;;  %9107 = vst [vmem:[#allocation3_spill] sm:$0xff] %v7063_v56  ;;  %vm1079_vm6 = vsmask.f32 2312  ;;  %vm1081_vm7 = vsmask.f32 3340  ;;  %vm7158_vm9 = vmor %vm1076_vm4, %vm1077_vm5  ;;  %s6357_s30 = sshll.u32 %s9279_s13, 1 }
  0x12   : > { %v187_v0 = vld [vmem:[%s6931_s17 + $0x20] sm:$0xff]  ;;  %v188_v1 = vld [vmem:[%s6931_s17 + $0x28] sm:$0xff]  ;;  %v185_v2 = vld [vmem:[%s6931_s17 + $0x10] sm:$0xff]  ;;  %6786 = vmatprep.subr.bf16.mxu1 %v9051_v21  ;;  %v391_v55 = vunpack.c.0.s8 %v390_v51  ;;  %vm1083_vm8 = vsmask.f32 4368  ;;  %s8689_s29 = scalar_lea.vmem %s9049_s2, %s6865_s26  ;;  %s181_s6 = scalar_lea.vmem %s9050_s3, %s6357_s30 }
  0x13   : > { %v6936_v3 = vpack.c.bf16 %v188_v1, %v187_v0  ;;  %v186_v4 = vld [vmem:[%s6931_s17 + $0x18] sm:$0xff]  ;;  %v189_v5 = vld [vmem:[%s6931_s17 + $0x30] sm:$0xff]  ;;  %v191_v9 = vld [vmem:[%s6931_s17 + $0x40] sm:$0xff]  ;;  %vm1085_vm10 = vsmask.f32 5396 }
  0x14   : > { %v190_v6 = vld [vmem:[%s6931_s17 + $0x38] sm:$0xff]  ;;  %v6941_v7 = vpack.c.bf16 %v186_v4, %v185_v2  ;;  %v192_v10 = vld [vmem:[%s6931_s17 + $0x48] sm:$0xff]  ;;  %v193_v12 = vld [vmem:[%s6931_s17 + $0x50] sm:$0xff]  ;;  %v7068_v61 = vsub.s32 %v391_v55, %v7063_v56  ;;  %vm1087_vm12 = vsmask.f32 6424 }
  0x15   : > { %247 = vrot.lane.b32.xlu1 %v6936_v3, %s6891_s18  ;;  %v6945_v8 = vpack.c.bf16 %v190_v6, %v189_v5  ;;  %v6953_v11 = vpack.c.bf16 %v192_v10, %v191_v9  ;;  %v194_v13 = vld [vmem:[%s6931_s17 + $0x58] sm:$0xff]  ;;  %v195_v15 = vld [vmem:[%s6931_s17 + $0x60] sm:$0xff]  ;;  %v196_v16 = vld [vmem:[%s6931_s17 + $0x68] sm:$0xff]  ;;  %vm1089_vm14 = vsmask.f32 7452 }
  0x16   : > { %245 = vrot.lane.b32.xlu0 %v6941_v7, %s6891_s18  ;;  %v6961_v14 = vpack.c.bf16 %v194_v13, %v193_v12  ;;  %v6969_v17 = vpack.c.bf16 %v196_v16, %v195_v15  ;;  %v197_v19 = vld [vmem:[%s6931_s17 + $0x70] sm:$0xff]  ;;  %v198_v20 = vld [vmem:[%s6931_s17 + $0x78] sm:$0xff]  ;;  %v199_v24 = vld [vmem:[%s6931_s17 + $0x80] sm:$0xff] }
  0x17   : > { %v6986_v23 = vpack.c.bf16 %v198_v20, %v197_v19  ;;  %v200_v25 = vld [vmem:[%s6931_s17 + $0x88] sm:$0xff]  ;;  %v201_v27 = vld [vmem:[%s6931_s17 + $0x90] sm:$0xff]  ;;  %v202_v28 = vld [vmem:[%s6931_s17 + $0x98] sm:$0xff] }
  0x18   : > { %v6999_v26 = vpack.c.bf16 %v200_v25, %v199_v24  ;;  %v7007_v29 = vpack.c.bf16 %v202_v28, %v201_v27  ;;  %v203_v30 = vld [vmem:[%s6931_s17 + $0xa0] sm:$0xff]  ;;  %v204_v31 = vld [vmem:[%s6931_s17 + $0xa8] sm:$0xff]  ;;  %v205_v35 = vld [vmem:[%s6931_s17 + $0xb0] sm:$0xff] }
  0x19   : > { %276 = vrot.lane.b32.xlu1 %v6945_v8, %s6892_s19  ;;  %v7019_v34 = vpack.c.bf16 %v204_v31, %v203_v30  ;;  %v206_v36 = vld [vmem:[%s6931_s17 + $0xb8] sm:$0xff]  ;;  %v207_v38 = vld [vmem:[%s6931_s17 + $0xc0] sm:$0xff]  ;;  %v208_v39 = vld [vmem:[%s6931_s17 + $0xc8] sm:$0xff] }
  0x1a   : > { %274 = vrot.lane.b32.xlu0 %v6936_v3, %s6892_s19  ;;  %v7028_v37 = vpack.c.bf16 %v206_v36, %v205_v35  ;;  %v7036_v40 = vpack.c.bf16 %v208_v39, %v207_v38  ;;  %v209_v41 = vld [vmem:[%s6931_s17 + $0xd0] sm:$0xff]  ;;  %v210_v42 = vld [vmem:[%s6931_s17 + $0xd8] sm:$0xff]  ;;  %v211_v44 = vld [vmem:[%s6931_s17 + $0xe0] sm:$0xff] }
  0x1b   : > { %v7044_v43 = vpack.c.bf16 %v210_v42, %v209_v41  ;;  %v212_v45 = vld [vmem:[%s6931_s17 + $0xe8] sm:$0xff]  ;;  %v213_v47 = vld [vmem:[%s6931_s17 + $0xf0] sm:$0xff]  ;;  %v214_v48 = vld [vmem:[%s6931_s17 + $0xf8] sm:$0xff] }
  0x1c   : > { %v229_v46 = vpack.c.bf16 %v212_v45, %v211_v44  ;;  %v230_v49 = vpack.c.bf16 %v214_v48, %v213_v47  ;;  %v183_v53 = vld [vmem:[%s6931_s17] sm:$0xff]  ;;  %v184_v54 = vld [vmem:[%s6931_s17 + $0x8] sm:$0xff]  ;;  %v6881_v25 = vld [vmem:[%s9048_s1 + $0x10] sm:$0x3f]  }
  0x1d   : > { %278 = vrot.lane.b32.xlu1 %v6953_v11, %s6892_s19  ;;  %9106 = vst [vmem:[#allocation2_spill] sm:$0xff] %v7044_v43  ;;  %v215_v59 = vpack.c.bf16 %v184_v54, %v183_v53  ;;  %v7120_v42 = vsel %vm2540_vm0, %v6881_v25, 0  ;;  %vm1080_vm11 = vmor %vm7158_vm9, %vm1079_vm6  ;;  %vm2500_vm0 = vcmask 97280  }
  0x1e   : > { %249 = vrot.lane.b32.xlu0 %v6945_v8, %s6891_s18  ;;  %vm7205_vm13 = vmor %vm1080_vm11, %vm1081_vm7  ;;  %vm5423_vm7 = vcmask 59392  }
  0x1f   : > { %vm7231_vm15 = vmor %vm7205_vm13, %vm1083_vm8 }
  0x20   : > { %vm1086_vm4 = vmor %vm7231_vm15, %vm1085_vm10 }
  0x21   : > { %280 = vrot.lane.b32.xlu1 %v6961_v14, %s6892_s19  ;;  %vm1088_vm5 = vmor %vm1086_vm4, %vm1087_vm12 }
  0x22   : > { %251 = vrot.lane.b32.xlu0 %v6953_v11, %s6891_s18  ;;  %vm7305_vm6 = vmor %vm1088_vm5, %vm1089_vm14 }
  0x25   : > { %282 = vrot.lane.b32.xlu1 %v6969_v17, %s6892_s19 }
  0x26   : > { %253 = vrot.lane.b32.xlu0 %v6961_v14, %s6891_s18 }
  0x29   : > { %284 = vrot.lane.b32.xlu1 %v6986_v23, %s6892_s19 }
  0x2a   : > { %255 = vrot.lane.b32.xlu0 %v6969_v17, %s6891_s18 }
  0x2d   : > { %286 = vrot.lane.b32.xlu1 %v6999_v26, %s6892_s19 }
  0x2e   : > { %257 = vrot.lane.b32.xlu0 %v6986_v23, %s6891_s18 }
  0x31   : > { %288 = vrot.lane.b32.xlu1 %v7007_v29, %s6892_s19 }
  0x32   : > { %259 = vrot.lane.b32.xlu0 %v6999_v26, %s6891_s18 }
  0x35   : > { %290 = vrot.lane.b32.xlu1 %v7019_v34, %s6892_s19 }
  0x36   : > { %261 = vrot.lane.b32.xlu0 %v7007_v29, %s6891_s18 }
  0x39   : > { %292 = vrot.lane.b32.xlu1 %v7028_v37, %s6892_s19 }
  0x3a   : > { %263 = vrot.lane.b32.xlu0 %v7019_v34, %s6891_s18 }
  0x3d   : > { %294 = vrot.lane.b32.xlu1 %v7036_v40, %s6892_s19 }
  0x3e   : > { %265 = vrot.lane.b32.xlu0 %v7028_v37, %s6891_s18 }
  0x41   : > { %296 = vrot.lane.b32.xlu1 %v7044_v43, %s6892_s19 }
  0x42   : > { %267 = vrot.lane.b32.xlu0 %v7036_v40, %s6891_s18 }
  0x45   : > { %298 = vrot.lane.b32.xlu1 %v229_v46, %s6892_s19 }
  0x46   : > { %269 = vrot.lane.b32.xlu0 %v7044_v43, %s6891_s18 }
  0x49   : > { %300 = vrot.lane.b32.xlu1 %v230_v49, %s6892_s19 }
  0x4a   : > { %271 = vrot.lane.b32.xlu0 %v229_v46, %s6891_s18 }
  0x87   : > { %v248_v57 = vpop.permute.xlu1 %247 }
  0x88   : > { %v246_v58 = vpop.permute.xlu0 %245  ;;  %v308_v60 = vsel %vm302_vm2, %v6941_v7, %v248_v57 }
  0x89   : > { %v305_v63 = vsel %vm302_vm2, %v215_v59, %v246_v58 }
  0x8b   : > { %v277_v62 = vpop.permute.xlu1 %276 }
  0x8c   : > { %v349_v0 = vsel %vm345_vm3, %v308_v60, %v277_v62  ;;  %v275_v1 = vpop.permute.xlu0 %274 }
  0x8d   : > { %v436_v2 = vcombine.high %v349_v0, %v349_v0  ;;  %v443_v4 = vrot.slane %v349_v0, %v7068_v61  ;;  %v347_v5 = vsel %vm345_vm3, %v305_v63, %v275_v1 }
  0x8e   : > { %v388_v6 = vcombine.high %v347_v5, %v347_v5  ;;  %v395_v9 = vrot.slane %v347_v5, %v7068_v61 }
  0x8f   : > { %v450_v7 = vrot.slane %v436_v2, %v7068_v61  ;;  %v451_v10 = vcombine.high %v443_v4, %v443_v4  ;;  %v7077_v12 = vrot.slane %v443_v4, %v7068_v61  ;;  %v279_v24 = vpop.permute.xlu1 %278 }
  0x90   : > { %v402_v13 = vrot.slane %v388_v6, %v7068_v61  ;;  %v403_v15 = vcombine.high %v395_v9, %v395_v9  ;;  %v7081_v16 = vrot.slane %v395_v9, %v7068_v61  ;;  %v250_v18 = vpop.permute.xlu0 %249 }
  0x91   : > { %9108 = vst [vmem:[#allocation4_spill] sm:$0xff] %v7077_v12  ;;  %v452_v19 = vcombine.high %v450_v7, %v450_v7  ;;  %v7084_v20 = vrot.slane %v451_v10, %v7068_v61  ;;  %v7091_v27 = vcombine.high %v7077_v12, %v7077_v12  ;;  %v7117_v39 = vrot.slane %v450_v7, %v7068_v61 }
  0x92   : > { %v404_v28 = vcombine.high %v402_v13, %v402_v13  ;;  %v7094_v30 = vrot.slane %v402_v13, %v7068_v61  ;;  %v7097_v31 = vrot.slane %v403_v15, %v7068_v61  ;;  %v7106_v35 = vcombine.high %v7081_v16, %v7081_v16 }
  0x93   : > { %9109 = vst [vmem:[#allocation5_spill] sm:$0xff] %v7117_v39  ;;  %v7123_v44 = vrot.slane %v452_v19, %v7068_v61  ;;  %v311_v51 = vsel %vm302_vm2, %v6936_v3, %v250_v18  ;;  %v281_v52 = vpop.permute.xlu1 %280  ;;  %v7372_v43 = vcombine.high %v7117_v39, %v7117_v39 }
  0x94   : > { %v7102_v33 = vrot.slane %v404_v28, %v7068_v61  ;;  %v7110_v36 = vcombine.high %v7094_v30, %v7094_v30  ;;  %v7114_v38 = vcombine.high %v7097_v31, %v7097_v31  ;;  %v252_v41 = vpop.permute.xlu0 %251  ;;  %v3469_v48 = vcombine.low %v7097_v31, %v7106_v35 }
  0x95   : > { %v351_v55 = vsel %vm345_vm3, %v311_v51, %v279_v24  ;;  %v314_v57 = vsel %vm302_vm2, %v6945_v8, %v252_v41  ;;  %v2680_v4 = vcombine.low %v7081_v16, %v7097_v31  ;;  %v6472_v41 = vcombine.high %v7081_v16, %v7097_v31 }
  0x96   : > { %v7129_v47 = vcombine.high %v7102_v33, %v7102_v33  ;;  %v3470_v49 = vcombine.low %v7114_v38, %v7094_v30  ;;  %v3471_v50 = vcombine.low %v7102_v33, %v7110_v36  ;;  %v7147_v59 = vrot.slane %v3469_v48, %v7068_v61 }
  0x97   : > { %v484_v3 = vcombine.high %v351_v55, %v351_v55  ;;  %v491_v1 = vrot.slane %v351_v55, %v7068_v61  ;;  %v353_v2 = vsel %vm345_vm3, %v314_v57, %v281_v52  ;;  %v283_v18 = vpop.permute.xlu1 %282  ;;  %v2683_v57 = vcombine.low %v7110_v36, %v7077_v12 }
  0x98   : > { %9110 = vst [vmem:[#allocation6_spill] sm:$0xff] %v7129_v47  ;;  %9111 = vst [vmem:[#allocation7_spill] sm:$0xff] %v7147_v59  ;;  %v7150_v60 = vrot.slane %v3470_v49, %v7068_v61  ;;  %v254_v62 = vpop.permute.xlu0 %253  ;;  %v532_v9 = vcombine.high %v353_v2, %v353_v2  ;;  %v539_v13 = vrot.slane %v353_v2, %v7068_v61  ;;  %v1129_v24 = vshll.u32 %v7102_v33, 16 }
  0x99   : > { %v498_v6 = vrot.slane %v484_v3, %v7068_v61  ;;  %v499_v7 = vcombine.high %v491_v1, %v491_v1  ;;  %v7168_v10 = vrot.slane %v491_v1, %v7068_v61  ;;  %v317_v15 = vsel %vm302_vm2, %v6953_v11, %v254_v62 }
  0x9a   : > { %9112 = vst [vmem:[#allocation8_spill] sm:$0xff] %v7150_v60  ;;  %v2682_v49 = vcombine.low %v7094_v30, %v7102_v33  ;;  %v7193_v51 = vrot.slane %v3471_v50, %v7068_v61  ;;  %v546_v52 = vrot.slane %v532_v9, %v7068_v61  ;;  %v355_v55 = vsel %vm345_vm3, %v317_v15, %v283_v18 }
  0x9b   : > { %v500_v25 = vcombine.high %v498_v6, %v498_v6  ;;  %v7176_v28 = vrot.slane %v498_v6, %v7068_v61  ;;  %v7184_v48 = vrot.slane %v499_v7, %v7068_v61  ;;  %v7188_v11 = vcombine.high %v7168_v10, %v7168_v10 }
  0x9c   : > { %9116 = vst [vmem:[#allocation10_spill] sm:$0xff] %v7193_v51  ;;  %v547_v1 = vcombine.high %v539_v13, %v539_v13  ;;  %v2690_v2 = vrot.slane %v2680_v4, %v7068_v61  ;;  %v7216_v7 = vrot.slane %v539_v13, %v7068_v61  ;;  %v548_v32 = vcombine.high %v546_v52, %v546_v52  ;;  %v256_v13 = vpop.permute.xlu0 %255 }
  0x9d   : > { %9115 = vst [vmem:[#allocation9_spill] sm:$0xff] %v7184_v48  ;;  %v7200_v3 = vrot.slane %v500_v25, %v7068_v61  ;;  %v7211_v50 = vcombine.high %v7176_v28, %v7176_v28  ;;  %v7220_v4 = vcombine.high %v7184_v48, %v7184_v48  ;;  %v580_v5 = vcombine.high %v355_v55, %v355_v55  ;;  %v285_v25 = vpop.permute.xlu1 %284 }
  0x9e   : > { %9120 = vst [vmem:[#allocation12_spill] sm:$0xff] %v7216_v7  ;;  %v587_v54 = vrot.slane %v355_v55, %v7068_v61  ;;  %v2697_v9 = vrot.slane %v6472_v41, %v7068_v61  ;;  %v7242_v62 = vrot.slane %v546_v52, %v7068_v61  ;;  %v7245_v41 = vrot.slane %v547_v1, %v7068_v61 }
  0x9f   : > { %9117 = vst [vmem:[#allocation11_spill] sm:$0xff] %v7200_v3  ;;  %v7237_v18 = vcombine.high %v7200_v3, %v7200_v3  ;;  %v594_v55 = vrot.slane %v580_v5, %v7068_v61  ;;  %v2704_v46 = vrot.slane %v2682_v49, %v7068_v61  ;;  %v7254_v45 = vcombine.high %v7216_v7, %v7216_v7 }
  0xa0   : > { %9124 = vst [vmem:[#allocation14_spill] sm:$0xff] %v7242_v62  ;;  %9125 = vst [vmem:[#allocation15_spill] sm:$0xff] %v7245_v41  ;;  %v595_v8 = vcombine.high %v587_v54, %v587_v54  ;;  %v7249_v53 = vrot.slane %v587_v54, %v7068_v61  ;;  %v2711_v52 = vrot.slane %v2683_v57, %v7068_v61  ;;  %v9138_v58 = vshrl.u32 %v7106_v35, 16 }
  0xa1   : > { %9123 = vst [vmem:[#allocation13_spill] sm:$0xff] %v7237_v18  ;;  %v2712_v15 = vcombine.low %v2690_v2, %v2697_v9  ;;  %v320_v1 = vsel %vm302_vm2, %v6961_v14, %v256_v13  ;;  %v7263_v54 = vrot.slane %v548_v32, %v7068_v61  ;;  %v596_v0 = vcombine.high %v594_v55, %v594_v55 }
  0xa2   : > { %v7270_v57 = vcombine.high %v7245_v41, %v7245_v41  ;;  %v7273_v2 = vrot.slane %v595_v8, %v7068_v61  ;;  %v2713_v14 = vcombine.low %v2704_v46, %v2711_v52  ;;  %v357_v6 = vsel %vm345_vm3, %v320_v1, %v285_v25 }
  0xa3   : > { %9126 = vst [vmem:[#allocation16_spill] sm:$0xff] %v7263_v54  ;;  %v7279_v13 = vrot.slane %v594_v55, %v7068_v61  ;;  %v7283_v5 = vcombine.high %v7249_v53, %v7249_v53  ;;  %v2720_v25 = vrot.slane %v2712_v15, %v7068_v61  ;;  %v1097_v52 = vshll.u32 %v7097_v31, 16 }
  0xa4   : > { %9127 = vst [vmem:[#allocation17_spill] sm:$0xff] %v7273_v2  ;;  %v7292_v1 = vrot.slane %v596_v0, %v7068_v61  ;;  %v2727_v32 = vrot.slane %v2713_v14, %v7068_v61  ;;  %v628_v9 = vcombine.high %v357_v6, %v357_v6  ;;  %v7301_v49 = vcombine.high %v7273_v2, %v7273_v2 }
  0xa5   : > { %9128 = vst [vmem:[#allocation18_spill] sm:$0xff] %v7279_v13  ;;  %9129 = vst [vmem:[#allocation19_spill] sm:$0xff] %v7283_v5  ;;  %v7296_v55 = vcombine.high %v7279_v13, %v7279_v13  ;;  %v635_v8 = vrot.slane %v357_v6, %v7068_v61  ;;  %v1100_v0 = vshrl.u32 %v7097_v31, 16  ;;  %v1113_v46 = vshll.u32 %v7114_v38, 16 }
  0xa6   : > { %9130 = vst [vmem:[#allocation20_spill] sm:$0xff] %v7292_v1  ;;  %9132 = vst [vmem:[#allocation22_spill] sm:$0xff] %v7301_v49  ;;  %v2728_v63 = vcombine.low %v2720_v25, %v2727_v32  ;;  %v1116_v14 = vshrl.u32 %v7114_v38, 16  ;;  %v7319_v56 = vrot.slane %v628_v9, %v7068_v61  ;;  %v7323_v31 = vcombine.high %v7292_v1, %v7292_v1 }
  0xa7   : > { %9131 = vst [vmem:[#allocation21_spill] sm:$0xff] %v7296_v55  ;;  %v643_v38 = vcombine.high %v635_v8, %v635_v8  ;;  %v9136_v25 = vshrl.u32 %v7081_v16, 16  ;;  %v9137_v9 = vshll.u32 %v7106_v35, 16  ;;  %v9139_v32 = vshll.u32 %v7094_v30, 16 }
  0xa8   : > { %9135 = vst [vmem:[#allocation23_spill] sm:$0xff] %v7323_v31  ;;  %6681 = vmatmul.mubr.msk.bf16.vlgmr.msra.gmra.mrb[0].mxu0 %vm2500_vm0, %v2728_v63  ;;  %v1115_v63 = vsel %vm7305_vm6, %v9138_v58, %v1113_v46  ;;  %v1132_v35 = vshrl.u32 %v7102_v33, 16  ;;  %v1137_v58 = vshll.u32 %v7110_v36, 16  ;;  %v644_v46 = vcombine.high %v7319_v56, %v7319_v56 }
  0xa9   : > { %v1099_v6 = vsel %vm7305_vm6, %v9136_v25, %v1097_v52  ;;  %6733 = vmatpush3.bf16.msra.mxu0 %v7120_v42  ;;  %v1107_v21 = vsel %vm7305_vm6, %v1100_v0, %v9137_v9  ;;  %v1123_v16 = vsel %vm7305_vm6, %v1116_v14, %v9139_v32  ;;  %v9140_v52 = vmov 0.0  }
  0xaa   : > { %6684 = vmatprep.mubr.msk.bf16.mxu0 %vm6894_vm1, %v9140_v52  ;;  %v7349_v42 = vrot.slane %v635_v8, %v7068_v61  ;;  %v9142_v25 = vshrl.u32 %v7094_v30, 16  ;;  %v7361_v14 = vrot.slane %v7319_v56, %v7068_v61  ;;  %v1140_v32 = vshrl.u32 %v7110_v36, 16  ;;  %v258_v36 = vpop.permute.xlu0 %257 }
  0xab   : > { %v1145_v8 = vshll.u32 %v7129_v47, 16  ;;  %v1139_v30 = vsel %vm7305_vm6, %v1132_v35, %v1137_v58  ;;  %v1892_v9 = vcombine.low %v1099_v6, %v1107_v21  ;;  %v1893_v33 = vcombine.low %v1115_v63, %v1123_v16  ;;  %v287_v16 = vpop.permute.xlu1 %286 }
  0xac   : > { %9141 = vst [vmem:[#allocation24_spill] sm:$0xff] %v7349_v42  ;;  %v1131_v0 = vsel %vm7305_vm6, %v9142_v25, %v1129_v24  ;;  %v1154_v24 = vshll.u32 %v7084_v20, 16  ;;  %v7376_v56 = vcombine.high %v7084_v20, %v7084_v20  ;;  %v9143_v60 = vshrl.u32 %v7077_v12, 16 }
  0xad   : > { %v1147_v25 = vsel %vm7305_vm6, %v1140_v32, %v1145_v8  ;;  %v1894_v19 = vcombine.low %v1131_v0, %v1139_v30  ;;  %v1902_v21 = vrot.slane %v1892_v9, %v7068_v61  ;;  %v1909_v6 = vrot.slane %v1893_v33, %v7068_v61 }
  0xae   : > { %v1156_v35 = vsel %vm7305_vm6, %v9143_v60, %v1154_v24  ;;  %v2729_v63 = vcombine.low %v7084_v20, %v7091_v27  ;;  %v2730_v32 = vcombine.low %v7376_v56, %v7117_v39  ;;  %v2731_v8 = vcombine.low %v7123_v44, %v7372_v43 }
  0xaf   : > { %v1895_v0 = vcombine.low %v1147_v25, %v1156_v35  ;;  %v1916_v58 = vrot.slane %v1894_v19, %v7068_v61  ;;  %v1924_v30 = vcombine.low %v1902_v21, %v1909_v6  ;;  %v9144_v24 = vcombine.low %v7168_v10, %v7184_v48 }
  0xb0   : > { %v2739_v60 = vrot.slane %v2729_v63, %v7068_v61  ;;  %v323_v33 = vsel %vm302_vm2, %v6969_v17, %v258_v36  ;;  %v2746_v19 = vrot.slane %v2730_v32, %v7068_v61  ;;  %v2753_v35 = vrot.slane %v2731_v8, %v7068_v61 }
  0xb1   : > { %v2760_v9 = vrot.slane %v9144_v24, %v7068_v61  ;;  %v1923_v25 = vrot.slane %v1895_v0, %v7068_v61  ;;  %v359_v12 = vsel %vm345_vm3, %v323_v33, %v287_v16  ;;  %v7403_v21 = vrot.slane %v643_v38, %v7068_v61 }
  0xb2   : > { %v7407_v6 = vcombine.high %v7349_v42, %v7349_v42  ;;  %v676_v63 = vcombine.high %v359_v12, %v359_v12  ;;  %v683_v24 = vrot.slane %v359_v12, %v7068_v61  ;;  %v1932_v17 = vrot.slane %v1924_v30, %v7068_v61 }
  0xb3   : > { %9145 = vst [vmem:[#allocation25_spill] sm:$0xff] %v7403_v21  ;;  %v1925_v59 = vcombine.low %v1916_v58, %v1923_v25  ;;  %v2761_v36 = vcombine.low %v2739_v60, %v2746_v19  ;;  %v2762_v0 = vcombine.low %v2753_v35, %v2760_v9  ;;  %v1157_v38 = vshrl.u32 %v7084_v20, 16 }
  0xb4   : > { %v690_v32 = vrot.slane %v676_v63, %v7068_v61  ;;  %v691_v8 = vcombine.high %v683_v24, %v683_v24  ;;  %v7413_v16 = vrot.slane %v683_v24, %v7068_v61  ;;  %v1170_v12 = vshll.u32 %v7376_v56, 16 }
  0xb5   : > { %v1939_v33 = vrot.slane %v1925_v59, %v7068_v61  ;;  %v2769_v51 = vrot.slane %v2761_v36, %v7068_v61  ;;  %v2776_v47 = vrot.slane %v2762_v0, %v7068_v61  ;;  %v7427_v25 = vrot.slane %v644_v46, %v7068_v61 }
  0xb6   : > { %v692_v60 = vcombine.high %v690_v32, %v690_v32  ;;  %v7424_v9 = vrot.slane %v690_v32, %v7068_v61  ;;  %v1063_v36 = vcombine.high %v7123_v44, %v7123_v44  ;;  %v9147_v0 = vshll.u32 %v7091_v27, 16 }
  0xb7   : > { %v1940_v19 = vcombine.low %v1932_v17, %v1939_v33  ;;  %v2777_v35 = vcombine.low %v2769_v51, %v2776_v47  ;;  %v7442_v46 = vrot.slane %v691_v8, %v7068_v61  ;;  %v7446_v47 = vcombine.high %v7413_v16, %v7413_v16 }
  0xb8   : > { %9146 = vst [vmem:[#allocation26_spill] sm:$0xff] %v7424_v9  ;;  %v1164_v32 = vsel %vm7305_vm6, %v1157_v38, %v9147_v0  ;;  %v9150_v17 = vshrl.u32 %v7091_v27, 16  ;;  %v7455_v38 = vrot.slane %v692_v60, %v7068_v61  ;;  %v7459_v8 = vcombine.high %v7424_v9, %v7424_v9 }
  0xb9   : > { %6627 = vmatmul.mubr.msk.bf16.vlgmr.msra.gmra.mrb[0].mxu1 %vm2500_vm0, %v1940_v19  ;;  %6685 = vmatmul.mubr.msk.bf16.gmra.mrb[4].mxu0 %vm2500_vm0, %v2777_v35  ;;  %9148 = vst [vmem:[#allocation27_spill] sm:$0xff] %v7442_v46  ;;  %9149 = vst [vmem:[#allocation28_spill] sm:$0xff] %v7446_v47  ;;  %v1173_v19 = vshrl.u32 %v7376_v56, 16  ;;  %v1178_v35 = vshll.u32 %v7117_v39, 16  ;;  %v1181_v27 = vshrl.u32 %v7117_v39, 16  ;;  %v1194_v60 = vshll.u32 %v7372_v43, 16 }
  0xba   : > { %v1172_v33 = vsel %vm7305_vm6, %v9150_v17, %v1170_v12  ;;  %6787 = vmatpush3.bf16.msra.mxu1 %v6980_v22  ;;  %9151 = vst [vmem:[#allocation29_spill] sm:$0xff] %v7455_v38  ;;  %6630 = vmatprep.mubr.msk.bf16.mxu1 %vm6894_vm1, %v9140_v52  ;;  %v1186_v12 = vshll.u32 %v7123_v44, 16  ;;  %v1189_v22 = vshrl.u32 %v7123_v44, 16  ;;  %v1197_v17 = vshrl.u32 %v7372_v43, 16 }
  0xbb   : > { %6688 = vmatprep.mubr.msk.bf16.mxu0 %vm6894_vm1, %v9140_v52  ;;  %v1180_v0 = vsel %vm7305_vm6, %v1173_v19, %v1178_v35  ;;  %v1202_v24 = vshll.u32 %v1063_v36, 16  ;;  %v1211_v56 = vshll.u32 %v7184_v48, 16  ;;  %v1214_v59 = vshrl.u32 %v7184_v48, 16  ;;  %v260_v35 = vpop.permute.xlu0 %259 }
  0xbc   : > { %v1188_v51 = vsel %vm7305_vm6, %v1181_v27, %v1186_v12  ;;  %v1196_v63 = vsel %vm7305_vm6, %v1189_v22, %v1194_v60  ;;  %v1941_v58 = vcombine.low %v1164_v32, %v1172_v33  ;;  %v9152_v39 = vshrl.u32 %v7168_v10, 16  ;;  %v289_v33 = vpop.permute.xlu1 %288 }
  0xbd   : > { %v1204_v30 = vsel %vm7305_vm6, %v1197_v17, %v1202_v24  ;;  %v1942_v36 = vcombine.low %v1180_v0, %v1188_v51  ;;  %v2779_v19 = vcombine.low %v7176_v28, %v7200_v3  ;;  %v9153_v27 = vshll.u32 %v7188_v11, 16 }
  0xbe   : > { %v1213_v43 = vsel %vm7305_vm6, %v9152_v39, %v1211_v56  ;;  %v1943_v22 = vcombine.low %v1196_v63, %v1204_v30  ;;  %v1951_v32 = vrot.slane %v1941_v58, %v7068_v61  ;;  %v2781_v24 = vcombine.low %v7245_v41, %v7254_v45 }
  0xbf   : > { %v1221_v12 = vsel %vm7305_vm6, %v1214_v59, %v9153_v27  ;;  %v1958_v39 = vrot.slane %v1942_v36, %v7068_v61  ;;  %v9154_v51 = vcombine.high %v7168_v10, %v7184_v48  ;;  %v2795_v17 = vrot.slane %v2779_v19, %v7068_v61 }
  0xc0   : > { %v1944_v60 = vcombine.low %v1213_v43, %v1221_v12  ;;  %v1965_v56 = vrot.slane %v1943_v22, %v7068_v61  ;;  %v9155_v58 = vcombine.low %v7211_v50, %v7216_v7  ;;  %v2809_v59 = vrot.slane %v2781_v24, %v7068_v61 }
  0xc1   : > { %v2788_v0 = vrot.slane %v9154_v51, %v7068_v61  ;;  %v326_v63 = vsel %vm302_vm2, %v6986_v23, %v260_v35  ;;  %v1973_v36 = vcombine.low %v1951_v32, %v1958_v39  ;;  %v7513_v19 = vcombine.high %v7442_v46, %v7442_v46 }
  0xc2   : > { %v2802_v30 = vrot.slane %v9155_v58, %v7068_v61  ;;  %v1972_v43 = vrot.slane %v1944_v60, %v7068_v61  ;;  %v361_v10 = vsel %vm345_vm3, %v326_v63, %v289_v33  ;;  %v1227_v23 = vshll.u32 %v7220_v4, 16 }
  0xc3   : > { %v2810_v27 = vcombine.low %v2788_v0, %v2795_v17  ;;  %9156 = vst [vmem:[#allocation30_spill] sm:$0xff] %v7513_v19  ;;  %v724_v22 = vcombine.high %v361_v10, %v361_v10  ;;  %v731_v51 = vrot.slane %v361_v10, %v7068_v61  ;;  %v1230_v60 = vshrl.u32 %v7220_v4, 16 }
  0xc4   : > { %v2811_v12 = vcombine.low %v2802_v30, %v2809_v59  ;;  %v1974_v24 = vcombine.low %v1965_v56, %v1972_v43  ;;  %v1981_v39 = vrot.slane %v1973_v36, %v7068_v61  ;;  %v1243_v56 = vshll.u32 %v7200_v3, 16 }
  0xc5   : > { %v2818_v48 = vrot.slane %v2810_v27, %v7068_v61  ;;  %v7522_v33 = vrot.slane %v724_v22, %v7068_v61  ;;  %v739_v17 = vcombine.high %v731_v51, %v731_v51  ;;  %v7530_v30 = vcombine.high %v7455_v38, %v7455_v38 }
  0xc6   : > { %v2825_v32 = vrot.slane %v2811_v12, %v7068_v61  ;;  %v1988_v0 = vrot.slane %v1974_v24, %v7068_v61  ;;  %v7538_v36 = vrot.slane %v731_v51, %v7068_v61  ;;  %v9159_v12 = vshrl.u32 %v7188_v11, 16 }
  0xc7   : > { %9157 = vst [vmem:[#allocation31_spill] sm:$0xff] %v7530_v30  ;;  %v1254_v59 = vshrl.u32 %v7211_v50, 16  ;;  %v578_v35 = vcombine.high %v7242_v62, %v7242_v62  ;;  %v2827_v58 = vcombine.low %v7270_v57, %v7242_v62  ;;  %v9164_v63 = vshrl.u32 %v7216_v7, 16 }
  0xc8   : > { %v2826_v43 = vcombine.low %v2818_v48, %v2825_v32  ;;  %v1989_v10 = vcombine.low %v1981_v39, %v1988_v0  ;;  %9158 = vst [vmem:[#allocation32_spill] sm:$0xff] %v7538_v36  ;;  %v1229_v22 = vsel %vm7305_vm6, %v9159_v12, %v1227_v23  ;;  %v7549_v48 = vrot.slane %v7522_v33, %v7068_v61 }
  0xc9   : > { %v9161_v32 = vshll.u32 %v7176_v28, 16  ;;  %v1246_v39 = vshrl.u32 %v7200_v3, 16  ;;  %v7558_v23 = vrot.slane %v739_v17, %v7068_v61  ;;  %v9163_v0 = vshrl.u32 %v7176_v28, 16 }
  0xca   : > { %6689 = vmatmul.mubr.msk.bf16.gmra.mrb[8].mxu0 %vm2500_vm0, %v2826_v43  ;;  %9160 = vst [vmem:[#allocation33_spill] sm:$0xff] %v7549_v48  ;;  %6631 = vmatmul.mubr.msk.bf16.gmra.mrb[4].mxu1 %vm2500_vm0, %v1989_v10  ;;  %v1251_v12 = vshll.u32 %v7211_v50, 16  ;;  %v1268_v17 = vshll.u32 %v7245_v41, 16  ;;  %v1271_v10 = vshrl.u32 %v7245_v41, 16  ;;  %v2837_v7 = vrot.slane %v2827_v58, %v7068_v61 }
  0xcb   : > { %v1237_v51 = vsel %vm7305_vm6, %v1230_v60, %v9161_v32  ;;  %9162 = vst [vmem:[#allocation34_spill] sm:$0xff] %v7558_v23  ;;  %v1245_v43 = vsel %vm7305_vm6, %v9163_v0, %v1243_v56  ;;  %6692 = vmatprep.mubr.msk.bf16.mxu0 %vm6894_vm1, %v9140_v52  ;;  %6634 = vmatprep.mubr.msk.bf16.mxu1 %vm6894_vm1, %v9140_v52  ;;  %v1259_v60 = vshll.u32 %v7237_v18, 16  ;;  %v1284_v32 = vshll.u32 %v7270_v57, 16 }
  0xcc   : > { %v1253_v56 = vsel %vm7305_vm6, %v1246_v39, %v1251_v12  ;;  %v1990_v0 = vcombine.low %v1229_v22, %v1237_v51  ;;  %v1270_v24 = vsel %vm7305_vm6, %v9164_v63, %v1268_v17  ;;  %v9165_v18 = vshll.u32 %v7254_v45, 16 }
  0xcd   : > { %v1261_v27 = vsel %vm7305_vm6, %v1254_v59, %v1259_v60  ;;  %v9166_v22 = vshrl.u32 %v7254_v45, 16  ;;  %v1991_v12 = vcombine.low %v1245_v43, %v1253_v56  ;;  %v2828_v60 = vcombine.low %v7263_v54, %v578_v35 }
  0xce   : > { %v1278_v39 = vsel %vm7305_vm6, %v1271_v10, %v9165_v18  ;;  %v1992_v41 = vcombine.low %v1261_v27, %v1270_v24  ;;  %v2000_v59 = vrot.slane %v1990_v0, %v7068_v61  ;;  %v9167_v63 = vcombine.low %v7249_v53, %v7273_v2 }
  0xcf   : > { %v1286_v51 = vsel %vm7305_vm6, %v9166_v22, %v1284_v32  ;;  %v9168_v45 = vcombine.high %v7249_v53, %v7273_v2  ;;  %v2007_v43 = vrot.slane %v1991_v12, %v7068_v61  ;;  %v1065_v10 = vcombine.high %v7263_v54, %v7263_v54 }
  0xd0   : > { %v1993_v3 = vcombine.low %v1278_v39, %v1286_v51  ;;  %v2851_v17 = vrot.slane %v9167_v63, %v7068_v61  ;;  %v2014_v27 = vrot.slane %v1992_v41, %v7068_v61  ;;  %v2844_v58 = vrot.slane %v2828_v60, %v7068_v61 }
  0xd1   : > { %v2858_v18 = vrot.slane %v9168_v45, %v7068_v61  ;;  %v1287_v56 = vshrl.u32 %v7270_v57, 16  ;;  %v1292_v0 = vshll.u32 %v7242_v62, 16  ;;  %v2022_v39 = vcombine.low %v2000_v59, %v2007_v43 }
  0xd2   : > { %v2021_v24 = vrot.slane %v1993_v3, %v7068_v61  ;;  %v1295_v51 = vshrl.u32 %v7242_v62, 16  ;;  %v1300_v12 = vshll.u32 %v7263_v54, 16  ;;  %v2859_v63 = vcombine.low %v2837_v7, %v2844_v58 }
  0xd3   : > { %v2860_v32 = vcombine.low %v2851_v17, %v2858_v18  ;;  %v1294_v3 = vsel %vm7305_vm6, %v1287_v56, %v1292_v0  ;;  %v1303_v45 = vshrl.u32 %v7263_v54, 16  ;;  %v2030_v60 = vrot.slane %v2022_v39, %v7068_v61  ;;  %v262_v0 = vpop.permute.xlu0 %261 }
  0xd4   : > { %v2023_v22 = vcombine.low %v2014_v27, %v2021_v24  ;;  %v1302_v59 = vsel %vm7305_vm6, %v1295_v51, %v1300_v12  ;;  %v1308_v17 = vshll.u32 %v578_v35, 16  ;;  %v2867_v18 = vrot.slane %v2859_v63, %v7068_v61 }
  0xd5   : > { %v2874_v41 = vrot.slane %v2860_v32, %v7068_v61  ;;  %v1311_v43 = vshrl.u32 %v578_v35, 16  ;;  %v1316_v27 = vshll.u32 %v1065_v10, 16  ;;  %v1325_v7 = vshll.u32 %v7273_v2, 16 }
  0xd6   : > { %v2037_v57 = vrot.slane %v2023_v22, %v7068_v61  ;;  %v1310_v58 = vsel %vm7305_vm6, %v1303_v45, %v1308_v17  ;;  %v1328_v32 = vshrl.u32 %v7273_v2, 16  ;;  %v1341_v56 = vshll.u32 %v7301_v49, 16 }
  0xd7   : > { %v2875_v39 = vcombine.low %v2867_v18, %v2874_v41  ;;  %v1318_v22 = vsel %vm7305_vm6, %v1311_v43, %v1316_v27  ;;  %v9169_v51 = vshrl.u32 %v7249_v53, 16  ;;  %v1344_v10 = vshrl.u32 %v7301_v49, 16 }
  0xd8   : > { %v2038_v24 = vcombine.low %v2030_v60, %v2037_v57  ;;  %v9170_v12 = vshll.u32 %v7283_v5, 16  ;;  %v9171_v45 = vshrl.u32 %v7283_v5, 16  ;;  %v2039_v60 = vcombine.low %v1294_v3, %v1302_v59 }
  0xd9   : > { %v1327_v35 = vsel %vm7305_vm6, %v9169_v51, %v1325_v7  ;;  %v2040_v57 = vcombine.low %v1310_v58, %v1318_v22  ;;  %6693 = vmatmul.mubr.msk.bf16.gmra.mrb[12].mxu0 %vm2500_vm0, %v2875_v39  ;;  %v9172_v17 = vshll.u32 %v7279_v13, 16  ;;  %v329_v27 = vsel %vm302_vm2, %v6999_v26, %v262_v0  ;;  %v291_v7 = vpop.permute.xlu1 %290 }
  0xda   : > { %6635 = vmatmul.mubr.msk.bf16.gmra.mrb[8].mxu1 %vm2500_vm0, %v2038_v24  ;;  %v1335_v63 = vsel %vm7305_vm6, %v1328_v32, %v9170_v12  ;;  %v1343_v41 = vsel %vm7305_vm6, %v9171_v45, %v1341_v56  ;;  %v2049_v3 = vrot.slane %v2039_v60, %v7068_v61  ;;  %6696 = vmatprep.mubr.msk.bf16.mxu0 %vm6894_vm1, %v9140_v52  ;;  %v264_v60 = vpop.permute.xlu0 %263  ;;  %v1385_v49 = vshrl.u32 %v7403_v21, 16 }
  0xdb   : > { %6638 = vmatprep.mubr.msk.bf16.mxu1 %vm6894_vm1, %v9140_v52  ;;  %v1351_v18 = vsel %vm7305_vm6, %v1344_v10, %v9172_v17  ;;  %v2041_v43 = vcombine.low %v1327_v35, %v1335_v63  ;;  %v2056_v59 = vrot.slane %v2040_v57, %v7068_v61  ;;  %v7661_v58 = vcombine.high %v7403_v21, %v7403_v21 }
  0xdc   : > { %v2042_v24 = vcombine.low %v1343_v41, %v1351_v18  ;;  %v2876_v56 = vcombine.low %v7279_v13, %v7292_v1  ;;  %v2878_v26 = vcombine.low %v7403_v21, %v7407_v6  ;;  %v9173_v0 = vcombine.low %v7296_v55, %v7349_v42 }
  0xdd   : > { %v2063_v32 = vrot.slane %v2041_v43, %v7068_v61  ;;  %v2071_v51 = vcombine.low %v2049_v3, %v2056_v59  ;;  %v2879_v35 = vcombine.low %v7661_v58, %v7361_v14  ;;  %v363_v10 = vsel %vm345_vm3, %v329_v27, %v291_v7 }
  0xde   : > { %v2893_v39 = vrot.slane %v9173_v0, %v7068_v61  ;;  %v2070_v22 = vrot.slane %v2042_v24, %v7068_v61  ;;  %v2886_v12 = vrot.slane %v2876_v56, %v7068_v61  ;;  %v2900_v63 = vrot.slane %v2878_v26, %v7068_v61  ;;  %v293_v0 = vpop.permute.xlu1 %292 }
  0xdf   : > { %v772_v45 = vcombine.high %v363_v10, %v363_v10  ;;  %v779_v41 = vrot.slane %v363_v10, %v7068_v61  ;;  %v7681_v57 = vcombine.high %v7538_v36, %v7538_v36  ;;  %v2079_v18 = vrot.slane %v2071_v51, %v7068_v61 }
  0xe0   : > { %v2072_v17 = vcombine.low %v2063_v32, %v2070_v22  ;;  %v2907_v43 = vrot.slane %v2879_v35, %v7068_v61  ;;  %v2908_v27 = vcombine.low %v2886_v12, %v2893_v39  ;;  %v332_v26 = vsel %vm302_vm2, %v7007_v29, %v264_v60 }
  0xe1   : > { %v786_v7 = vrot.slane %v772_v45, %v7068_v61  ;;  %v787_v3 = vcombine.high %v779_v41, %v779_v41  ;;  %v1357_v10 = vshll.u32 %v7292_v1, 16  ;;  %v7695_v39 = vrot.slane %v779_v41, %v7068_v61 }
  0xe2   : > { %v2086_v59 = vrot.slane %v2072_v17, %v7068_v61  ;;  %v2909_v56 = vcombine.low %v2900_v63, %v2907_v43  ;;  %v2916_v22 = vrot.slane %v2908_v27, %v7068_v61  ;;  %v9174_v35 = vcombine.high %v7522_v33, %v7522_v33  ;;  %v295_v5 = vpop.permute.xlu1 %294 }
  0xe3   : > { %v788_v51 = vcombine.high %v786_v7, %v786_v7  ;;  %v7705_v45 = vrot.slane %v786_v7, %v7068_v61  ;;  %v7711_v41 = vrot.slane %v787_v3, %v7068_v61  ;;  %v365_v43 = vsel %vm345_vm3, %v332_v26, %v293_v0 }
  0xe4   : > { %v7701_v12 = vrot.slane %v9174_v35, %v7068_v61  ;;  %v2087_v63 = vcombine.low %v2079_v18, %v2086_v59  ;;  %v2923_v29 = vrot.slane %v2909_v56, %v7068_v61  ;;  %v9179_v7 = vshrl.u32 %v7279_v13, 16 }
  0xe5   : > { %9176 = vst [vmem:[#allocation36_spill] sm:$0xff] %v7705_v45  ;;  %9177 = vst [vmem:[#allocation37_spill] sm:$0xff] %v7711_v41  ;;  %v7717_v27 = vrot.slane %v788_v51, %v7068_v61  ;;  %v7725_v56 = vcombine.high %v7695_v39, %v7695_v39  ;;  %v3023_v26 = vcombine.low %v7695_v39, %v7711_v41  ;;  %v1365_v17 = vshll.u32 %v7296_v55, 16 }
  0xe6   : > { %9175 = vst [vmem:[#allocation35_spill] sm:$0xff] %v7701_v12  ;;  %6639 = vmatmul.mubr.msk.bf16.gmra.mrb[12].mxu1 %vm2500_vm0, %v2087_v63  ;;  %v2924_v18 = vcombine.low %v2916_v22, %v2923_v29  ;;  %v1359_v59 = vsel %vm7305_vm6, %v9179_v7, %v1357_v10  ;;  %v6476_v0 = vcombine.high %v7695_v39, %v7711_v41  ;;  %v1360_v7 = vshrl.u32 %v7292_v1, 16 }
  0xe7   : > { %9178 = vst [vmem:[#allocation38_spill] sm:$0xff] %v7717_v27  ;;  %6642 = vmatprep.mubr.msk.bf16.mxu1 %vm6894_vm1, %v9140_v52  ;;  %v7737_v10 = vcombine.high %v7705_v45, %v7705_v45  ;;  %v3025_v22 = vcombine.low %v7705_v45, %v7717_v27  ;;  %v820_v51 = vcombine.high %v365_v43, %v365_v43  ;;  %v1382_v24 = vshll.u32 %v7403_v21, 16 }
  0xe8   : > { %6697 = vmatmul.mubr.msk.bf16.gmra.mrb[16].mxu0 %vm2500_vm0, %v2924_v18  ;;  %v827_v35 = vrot.slane %v365_v43, %v7068_v61  ;;  %v3033_v63 = vrot.slane %v3023_v26, %v7068_v61  ;;  %v3040_v29 = vrot.slane %v6476_v0, %v7068_v61  ;;  %v7750_v18 = vcombine.high %v7711_v41, %v7711_v41 }
  0xe9   : > { %9180 = vst [vmem:[#allocation39_spill] sm:$0xff] %v7737_v10  ;;  %6700 = vmatprep.mubr.msk.bf16.mxu0 %vm6894_vm1, %v9140_v52  ;;  %v834_v3 = vrot.slane %v820_v51, %v7068_v61  ;;  %v1368_v43 = vshrl.u32 %v7296_v55, 16  ;;  %v1373_v0 = vshll.u32 %v7323_v31, 16  ;;  %v7765_v51 = vcombine.high %v7717_v27, %v7717_v27 }
  0xea   : > { %9181 = vst [vmem:[#allocation40_spill] sm:$0xff] %v7750_v18  ;;  %v835_v33 = vcombine.high %v827_v35, %v827_v35  ;;  %v3055_v60 = vcombine.low %v3033_v63, %v3040_v29  ;;  %v7755_v26 = vrot.slane %v827_v35, %v7068_v61  ;;  %v7769_v35 = vrot.slane %v3025_v22, %v7068_v61 }
  0xeb   : > { %9182 = vst [vmem:[#allocation41_spill] sm:$0xff] %v7765_v51  ;;  %v1367_v29 = vsel %vm7305_vm6, %v1360_v7, %v1365_v17  ;;  %v836_v31 = vcombine.high %v834_v3, %v834_v3  ;;  %v7774_v32 = vrot.slane %v834_v3, %v7068_v61  ;;  %v1375_v17 = vsel %vm7305_vm6, %v1368_v43, %v1373_v0 }
  0xec   : > { %v7777_v1 = vrot.slane %v835_v33, %v7068_v61  ;;  %v7781_v53 = vcombine.high %v7755_v26, %v7755_v26  ;;  %v7784_v21 = vrot.slane %v3055_v60, %v7068_v61  ;;  %v3026_v22 = vcombine.low %v7737_v10, %v7755_v26  ;;  %v266_v33 = vpop.permute.xlu0 %265 }
  0xed   : > { %v9184_v7 = vshrl.u32 %v7349_v42, 16  ;;  %v9185_v63 = vshll.u32 %v7407_v6, 16  ;;  %v1398_v60 = vshll.u32 %v7661_v58, 16  ;;  %v1406_v13 = vshll.u32 %v7361_v14, 16 }
  0xee   : > { %9183 = vst [vmem:[#allocation42_spill] sm:$0xff] %v7784_v21  ;;  %v1401_v21 = vshrl.u32 %v7661_v58, 16  ;;  %v1409_v43 = vshrl.u32 %v7361_v14, 16  ;;  %v1414_v0 = vshll.u32 %v7427_v25, 16  ;;  %v2088_v42 = vcombine.low %v1359_v59, %v1367_v29 }
  0xef   : > { %v1384_v3 = vsel %vm7305_vm6, %v9184_v7, %v1382_v24  ;;  %v1392_v55 = vsel %vm7305_vm6, %v1385_v49, %v9185_v63  ;;  %v9186_v24 = vshrl.u32 %v7407_v6, 16  ;;  %v335_v58 = vsel %vm302_vm2, %v7019_v34, %v266_v33 }
  0xf0   : > { %v1408_v49 = vsel %vm7305_vm6, %v1401_v21, %v1406_v13  ;;  %v2089_v63 = vcombine.low %v1375_v17, %v1384_v3  ;;  %v3054_v2 = vrot.slane %v3026_v22, %v7068_v61  ;;  %v1416_v62 = vsel %vm7305_vm6, %v1409_v43, %v1414_v0 }
  0xf1   : > { %v1400_v7 = vsel %vm7305_vm6, %v9186_v24, %v1398_v60  ;;  %v2098_v59 = vrot.slane %v2088_v42, %v7068_v61  ;;  %v2091_v6 = vcombine.low %v1408_v49, %v1416_v62  ;;  %v674_v60 = vcombine.high %v7361_v14, %v7361_v14 }
  0xf2   : > { %v2090_v54 = vcombine.low %v1392_v55, %v1400_v7  ;;  %v2105_v29 = vrot.slane %v2089_v63, %v7068_v61  ;;  %v2928_v13 = vcombine.low %v7424_v9, %v7455_v38  ;;  %v9187_v21 = vcombine.low %v7413_v16, %v7442_v46 }
  0xf3   : > { %v9188_v55 = vcombine.high %v7413_v16, %v7442_v46  ;;  %v367_v42 = vsel %vm345_vm3, %v335_v58, %v295_v5  ;;  %v2119_v17 = vrot.slane %v2091_v6, %v7068_v61  ;;  %v2925_v33 = vcombine.low %v7427_v25, %v674_v60 }
  0xf4   : > { %v2112_v34 = vrot.slane %v2090_v54, %v7068_v61  ;;  %v2942_v22 = vrot.slane %v9187_v21, %v7068_v61  ;;  %v2120_v3 = vcombine.low %v2098_v59, %v2105_v29  ;;  %v2956_v43 = vrot.slane %v2928_v13, %v7068_v61 }
  0xf5   : > { %v2949_v62 = vrot.slane %v9188_v55, %v7068_v61  ;;  %v7835_v54 = vrot.slane %v836_v31, %v7068_v61  ;;  %v3056_v0 = vcombine.low %v7769_v35, %v3054_v2  ;;  %v868_v24 = vcombine.high %v367_v42, %v367_v42 }
  0xf6   : > { %v875_v7 = vrot.slane %v367_v42, %v7068_v61  ;;  %v2121_v49 = vcombine.low %v2112_v34, %v2119_v17  ;;  %v2128_v63 = vrot.slane %v2120_v3, %v7068_v61  ;;  %v2935_v5 = vrot.slane %v2925_v33, %v7068_v61 }
  0xf7   : > { %9189 = vst [vmem:[#allocation43_spill] sm:$0xff] %v7835_v54  ;;  %v2958_v58 = vcombine.low %v2949_v62, %v2956_v43  ;;  %v882_v59 = vrot.slane %v868_v24, %v7068_v61  ;;  %v1417_v31 = vshrl.u32 %v7427_v25, 16  ;;  %v1422_v21 = vshll.u32 %v674_v60, 16 }
  0xf8   : > { %v883_v6 = vcombine.high %v875_v7, %v875_v7  ;;  %v7843_v29 = vrot.slane %v875_v7, %v7068_v61  ;;  %v2135_v13 = vrot.slane %v2121_v49, %v7068_v61  ;;  %v2957_v2 = vcombine.low %v2935_v5, %v2942_v22 }
  0xf9   : > { %v2972_v35 = vrot.slane %v2958_v58, %v7068_v61  ;;  %v7850_v34 = vcombine.high %v7774_v32, %v7774_v32  ;;  %v884_v55 = vcombine.high %v882_v59, %v882_v59  ;;  %v7853_v62 = vrot.slane %v882_v59, %v7068_v61 }
  0xfa   : > { %v1067_v42 = vcombine.high %v7427_v25, %v7427_v25  ;;  %v7859_v17 = vcombine.high %v7777_v1, %v7777_v1  ;;  %v2136_v3 = vcombine.low %v2128_v63, %v2135_v13  ;;  %v2965_v33 = vrot.slane %v2957_v2, %v7068_v61 }
  0xfb   : > { %v7865_v24 = vrot.slane %v3056_v0, %v7068_v61  ;;  %v7868_v7 = vrot.slane %v883_v6, %v7068_v61  ;;  %v1425_v49 = vshrl.u32 %v674_v60, 16  ;;  %v7873_v58 = vcombine.high %v7843_v29, %v7843_v29 }
  0xfc   : > { %6643 = vmatmul.mubr.msk.bf16.gmra.mrb[16].mxu1 %vm2500_vm0, %v2136_v3  ;;  %v2973_v5 = vcombine.low %v2965_v33, %v2972_v35  ;;  %v1424_v59 = vsel %vm7305_vm6, %v1417_v31, %v1422_v21  ;;  %v7879_v13 = vrot.slane %v884_v55, %v7068_v61  ;;  %v7883_v0 = vcombine.high %v7853_v62, %v7853_v62 }
  0xfd   : > { %9190 = vst [vmem:[#allocation44_spill] sm:$0xff] %v7865_v24  ;;  %v7887_v60 = vcombine.high %v7868_v7, %v7868_v7  ;;  %6646 = vmatprep.mubr.msk.bf16.mxu1 %vm6894_vm1, %v9140_v52  ;;  %v1430_v6 = vshll.u32 %v1067_v42, 16  ;;  %v1439_v2 = vshll.u32 %v7442_v46, 16  ;;  %v1442_v31 = vshrl.u32 %v7442_v46, 16  ;;  %v268_v42 = vpop.permute.xlu0 %267 }
  0xfe   : > { %6701 = vmatmul.mubr.msk.bf16.gmra.mrb[20].mxu0 %vm2500_vm0, %v2973_v5  ;;  %v1455_v35 = vshll.u32 %v7513_v19, 16  ;;  %v1458_v21 = vshrl.u32 %v7513_v19, 16  ;;  %v1471_v3 = vshll.u32 %v7455_v38, 16  ;;  %v1474_v33 = vshrl.u32 %v7455_v38, 16 }
  0xff   : > { %v1432_v55 = vsel %vm7305_vm6, %v1425_v49, %v1430_v6  ;;  %v1479_v63 = vshll.u32 %v7459_v8, 16  ;;  %6704 = vmatprep.mubr.msk.bf16.mxu0 %vm6894_vm1, %v9140_v52  ;;  %v9191_v5 = vshrl.u32 %v7413_v16, 16  ;;  %v9192_v22 = vshll.u32 %v7446_v47, 16 }
 0x100   : > { %v9193_v6 = vshrl.u32 %v7446_v47, 16  ;;  %v9194_v38 = vshll.u32 %v7424_v9, 16  ;;  %v9195_v16 = vshrl.u32 %v7424_v9, 16  ;;  %v2137_v46 = vcombine.low %v1424_v59, %v1432_v55 }
 0x101   : > { %v1441_v43 = vsel %vm7305_vm6, %v9191_v5, %v1439_v2  ;;  %v1449_v49 = vsel %vm7305_vm6, %v1442_v31, %v9192_v22  ;;  %v1481_v5 = vsel %vm7305_vm6, %v1474_v33, %v1479_v63  ;;  %v9196_v63 = vcombine.low %v7459_v8, %v7538_v36 }
 0x102   : > { %v1457_v24 = vsel %vm7305_vm6, %v9193_v6, %v1455_v35  ;;  %v1465_v19 = vsel %vm7305_vm6, %v1458_v21, %v9194_v38  ;;  %v1473_v2 = vsel %vm7305_vm6, %v9195_v16, %v1471_v3  ;;  %v2138_v22 = vcombine.low %v1441_v43, %v1449_v49  ;;  %v297_v38 = vpop.permute.xlu1 %296 }
 0x103   : > { %v2139_v31 = vcombine.low %v1457_v24, %v1465_v19  ;;  %v2140_v47 = vcombine.low %v1473_v2, %v1481_v5  ;;  %v338_v35 = vsel %vm302_vm2, %v7028_v37, %v268_v42  ;;  %v7929_v6 = vcombine.high %v7549_v48, %v7549_v48 }
 0x104   : > { %v2147_v21 = vrot.slane %v2137_v46, %v7068_v61  ;;  %v2154_v9 = vrot.slane %v2138_v22, %v7068_v61  ;;  %v771_v3 = vcombine.high %v7558_v23, %v7558_v23  ;;  %v2975_v43 = vcombine.low %v7558_v23, %v7681_v57 }
 0x105   : > { %v2161_v19 = vrot.slane %v2139_v31, %v7068_v61  ;;  %v2168_v24 = vrot.slane %v2140_v47, %v7068_v61  ;;  %v2977_v37 = vcombine.low %v7701_v12, %v7929_v6  ;;  %v2984_v46 = vrot.slane %v9196_v63, %v7068_v61 }
 0x106   : > { %v2169_v59 = vcombine.low %v2147_v21, %v2154_v9  ;;  %v2976_v55 = vcombine.low %v771_v3, %v7549_v48  ;;  %v2991_v33 = vrot.slane %v2975_v43, %v7068_v61  ;;  %v369_v42 = vsel %vm345_vm3, %v338_v35, %v297_v38 }
 0x107   : > { %v2170_v49 = vcombine.low %v2161_v19, %v2168_v24  ;;  %v3005_v16 = vrot.slane %v2977_v37, %v7068_v61  ;;  %v916_v2 = vcombine.high %v369_v42, %v369_v42  ;;  %v923_v47 = vrot.slane %v369_v42, %v7068_v61 }
 0x108   : > { %v2177_v22 = vrot.slane %v2169_v59, %v7068_v61  ;;  %v2998_v31 = vrot.slane %v2976_v55, %v7068_v61  ;;  %v3006_v63 = vcombine.low %v2984_v46, %v2991_v33  ;;  %v1482_v24 = vshrl.u32 %v7459_v8, 16 }
 0x109   : > { %v2184_v9 = vrot.slane %v2170_v49, %v7068_v61  ;;  %v930_v21 = vrot.slane %v916_v2, %v7068_v61  ;;  %v931_v43 = vcombine.high %v923_v47, %v923_v47  ;;  %v7956_v35 = vrot.slane %v923_v47, %v7068_v61 }
 0x10a   : > { %v3007_v38 = vcombine.low %v2998_v31, %v3005_v16  ;;  %v3014_v19 = vrot.slane %v3006_v63, %v7068_v61  ;;  %v1487_v37 = vshll.u32 %v7530_v30, 16  ;;  %v7965_v42 = vcombine.high %v7879_v13, %v7879_v13  ;;  %v270_v30 = vpop.permute.xlu0 %269 }
 0x10b   : > { %v2185_v46 = vcombine.low %v2177_v22, %v2184_v9  ;;  %v932_v33 = vcombine.high %v930_v21, %v930_v21  ;;  %v7973_v47 = vrot.slane %v930_v21, %v7068_v61  ;;  %v7976_v31 = vrot.slane %v931_v43, %v7068_v61 }
 0x10c   : > { %9197 = vst [vmem:[#allocation45_spill] sm:$0xff] %v7965_v42  ;;  %v3021_v2 = vrot.slane %v3007_v38, %v7068_v61  ;;  %v7980_v22 = vcombine.high %v7956_v35, %v7956_v35  ;;  %v1069_v63 = vcombine.high %v7701_v12, %v7701_v12  ;;  %v1489_v21 = vsel %vm7305_vm6, %v1482_v24, %v1487_v37 }
 0x10d   : > { %6647 = vmatmul.mubr.msk.bf16.gmra.mrb[20].mxu1 %vm2500_vm0, %v2185_v46  ;;  %v7985_v16 = vrot.slane %v932_v33, %v7068_v61  ;;  %v1496_v43 = vshll.u32 %v7558_v23, 16  ;;  %v1499_v46 = vshrl.u32 %v7558_v23, 16  ;;  %v1512_v49 = vshll.u32 %v771_v3, 16 }
 0x10e   : > { %v3022_v9 = vcombine.low %v3014_v19, %v3021_v2  ;;  %6650 = vmatprep.mubr.msk.bf16.mxu1 %vm6894_vm1, %v9140_v52  ;;  %v1515_v55 = vshrl.u32 %v771_v3, 16  ;;  %v1520_v19 = vshll.u32 %v7549_v48, 16  ;;  %v1523_v33 = vshrl.u32 %v7549_v48, 16 }
 0x10f   : > { %v1528_v2 = vshll.u32 %v7701_v12, 16  ;;  %v1531_v38 = vshrl.u32 %v7701_v12, 16  ;;  %v9198_v59 = vshrl.u32 %v7538_v36, 16  ;;  %v9199_v37 = vshll.u32 %v7681_v57, 16  ;;  %v299_v12 = vpop.permute.xlu1 %298 }
 0x110   : > { %6705 = vmatmul.mubr.msk.bf16.gmra.mrb[24].mxu0 %vm2500_vm0, %v3022_v9  ;;  %v9200_v9 = vshrl.u32 %v7681_v57, 16  ;;  %v1536_v48 = vshll.u32 %v7929_v6, 16  ;;  %v1522_v36 = vsel %vm7305_vm6, %v1515_v55, %v1520_v19  ;;  %v8023_v23 = vcombine.high %v7973_v47, %v7973_v47 }
 0x111   : > { %v1498_v24 = vsel %vm7305_vm6, %v9198_v59, %v1496_v43  ;;  %v1506_v3 = vsel %vm7305_vm6, %v1499_v46, %v9199_v37  ;;  %6734 = vmatprep.mubr.msk.bf16.mxu0 %vm6894_vm1, %v9140_v52  ;;  %v1530_v59 = vsel %vm7305_vm6, %v1523_v33, %v1528_v2  ;;  %v1539_v43 = vshrl.u32 %v7929_v6, 16  ;;  %v9201_v6 = vld [vmem:[#allocation6_spill] sm:$0xff] }
 0x112   : > { %v1514_v5 = vsel %vm7305_vm6, %v9200_v9, %v1512_v49  ;;  %v1544_v46 = vshll.u32 %v1069_v63, 16  ;;  %v1538_v57 = vsel %vm7305_vm6, %v1531_v38, %v1536_v48  ;;  %v2186_v37 = vcombine.low %v1489_v21, %v1498_v24  ;;  %v9203_v24 = vld [vmem:[#allocation10_spill] sm:$0xff] }
 0x113   : > { %v2187_v49 = vcombine.low %v1506_v3, %v1514_v5  ;;  %v2188_v9 = vcombine.low %v1522_v36, %v1530_v59  ;;  %v341_v19 = vsel %vm302_vm2, %v7036_v40, %v270_v30  ;;  %v9202_v63 = vcombine.low %v9201_v6, %v7084_v20  ;;  %v9204_v30 = vld [vmem:[#allocation7_spill] sm:$0xff]  ;;  %v9205_v3 = vld [vmem:[#allocation8_spill] sm:$0xff] }
 0x114   : > { %v1546_v55 = vsel %vm7305_vm6, %v1539_v43, %v1544_v46  ;;  %v2196_v5 = vrot.slane %v2186_v37, %v7068_v61  ;;  %v8038_v21 = vcombine.high %v7976_v31, %v7976_v31  ;;  %v371_v2 = vsel %vm345_vm3, %v341_v19, %v299_v12 }
 0x115   : > { %v3500_v33 = vrot.slane %v9202_v63, %v7068_v61  ;;  %v2189_v48 = vcombine.low %v1538_v57, %v1546_v55  ;;  %v2203_v36 = vrot.slane %v2187_v49, %v7068_v61  ;;  %v2210_v38 = vrot.slane %v2188_v9, %v7068_v61 }
 0x116   : > { %v9206_v59 = vcombine.low %v9204_v30, %v9205_v3  ;;  %v964_v37 = vcombine.high %v371_v2, %v371_v2  ;;  %v971_v49 = vrot.slane %v371_v2, %v7068_v61  ;;  %v1553_v55 = vshll.u32 %v7711_v41, 16 }
 0x117   : > { %v3502_v40 = vcombine.low %v9203_v24, %v3500_v33  ;;  %v2217_v46 = vrot.slane %v2189_v48, %v7068_v61  ;;  %v2218_v57 = vcombine.low %v2196_v5, %v2203_v36  ;;  %v1556_v6 = vshrl.u32 %v7711_v41, 16  ;;  %v9213_v41 = vld [vmem:[#allocation5_spill] sm:$0xff] }
 0x118   : > { %v3509_v43 = vrot.slane %v9206_v59, %v7068_v61  ;;  %v1569_v12 = vshll.u32 %v7750_v18, 16  ;;  %v978_v33 = vrot.slane %v964_v37, %v7068_v61  ;;  %v979_v24 = vcombine.high %v971_v49, %v971_v49  ;;  %v301_v59 = vpop.permute.xlu1 %300 }
 0x119   : > { %v3516_v9 = vrot.slane %v3502_v40, %v7068_v61  ;;  %v2219_v19 = vcombine.low %v2210_v38, %v2217_v46  ;;  %v2226_v63 = vrot.slane %v2218_v57, %v7068_v61  ;;  %v8056_v5 = vrot.slane %v971_v49, %v7068_v61 }
 0x11a   : > { %v1572_v2 = vshrl.u32 %v7750_v18, 16  ;;  %v980_v30 = vcombine.high %v978_v33, %v978_v33  ;;  %v8061_v3 = vrot.slane %v978_v33, %v7068_v61  ;;  %v8064_v38 = vrot.slane %v979_v24, %v7068_v61  ;;  %v9212_v18 = vld [vmem:[#allocation2_spill] sm:$0xff] }
 0x11b   : > { %v3517_v36 = vcombine.low %v3509_v43, %v3516_v9  ;;  %v2233_v40 = vrot.slane %v2219_v19, %v7068_v61  ;;  %v8069_v46 = vcombine.high %v8056_v5, %v8056_v5  ;;  %v9207_v43 = vshrl.u32 %v7695_v39, 16 }
 0x11c   : > { %v1585_v37 = vshll.u32 %v7717_v27, 16  ;;  %v9208_v19 = vshll.u32 %v7725_v56, 16  ;;  %v9209_v24 = vshrl.u32 %v7725_v56, 16  ;;  %v8089_v39 = vrot.slane %v980_v30, %v7068_v61 }
 0x11d   : > { %6735 = vmatmul.mubr.msk.bf16.vlgmr.msra.gmra.mrb[0].mxu0 %vm2500_vm0, %v3517_v36  ;;  %v1555_v57 = vsel %vm7305_vm6, %v9207_v43, %v1553_v55  ;;  %v2234_v49 = vcombine.low %v2226_v63, %v2233_v40  ;;  %v8093_v55 = vcombine.high %v8061_v3, %v8061_v3  ;;  %v8097_v63 = vcombine.high %v8064_v38, %v8064_v38 }
 0x11e   : > { %v1563_v33 = vsel %vm7305_vm6, %v1556_v6, %v9208_v19  ;;  %v1571_v36 = vsel %vm7305_vm6, %v9209_v24, %v1569_v12  ;;  %6738 = vmatprep.mubr.msk.bf16.mxu0 %vm6894_vm1, %v9140_v52  ;;  %v9210_v6 = vshll.u32 %v7705_v45, 16  ;;  %v272_v12 = vpop.permute.xlu0 %271  ;;  %v9211_v24 = vshrl.u32 %v7705_v45, 16 }
 0x11f   : > { %6651 = vmatmul.mubr.msk.bf16.gmra.mrb[24].mxu1 %vm2500_vm0, %v2234_v49  ;;  %v1596_v49 = vshrl.u32 %v7737_v10, 16  ;;  %v1601_v43 = vshll.u32 %v7765_v51, 16  ;;  %v1610_v30 = vshll.u32 %v7777_v1, 16  ;;  %v2235_v19 = vcombine.low %v1555_v57, %v1563_v33 }
 0x120   : > { %v1579_v40 = vsel %vm7305_vm6, %v1572_v2, %v9210_v6  ;;  %v1587_v9 = vsel %vm7305_vm6, %v9211_v24, %v1585_v37  ;;  %6654 = vmatprep.mubr.msk.bf16.mxu1 %vm6894_vm1, %v9140_v52  ;;  %v1588_v2 = vshrl.u32 %v7717_v27, 16  ;;  %v1593_v6 = vshll.u32 %v7737_v10, 16 }
 0x121   : > { %v2236_v48 = vcombine.low %v1571_v36, %v1579_v40  ;;  %v344_v45 = vsel %vm302_vm2, %v9212_v18, %v272_v12  ;;  %v1603_v24 = vsel %vm7305_vm6, %v1596_v49, %v1601_v43  ;;  %v3519_v10 = vcombine.low %v9213_v41, %v7123_v44  ;;  %v9215_v49 = vld [vmem:[#allocation9_spill] sm:$0xff] }
 0x122   : > { %v1595_v37 = vsel %vm7305_vm6, %v1588_v2, %v1593_v6  ;;  %v373_v27 = vsel %vm345_vm3, %v344_v45, %v301_v59  ;;  %v9214_v51 = vshrl.u32 %v7755_v26, 16  ;;  %v2245_v36 = vrot.slane %v2235_v19, %v7068_v61 }
 0x123   : > { %v2237_v33 = vcombine.low %v1587_v9, %v1595_v37  ;;  %v2252_v18 = vrot.slane %v2236_v48, %v7068_v61  ;;  %v1012_v2 = vcombine.high %v373_v27, %v373_v27  ;;  %v1019_v43 = vrot.slane %v373_v27, %v7068_v61  ;;  %v9216_v37 = vld [vmem:[#allocation4_spill] sm:$0xff] }
 0x124   : > { %v1612_v57 = vsel %vm7305_vm6, %v9214_v51, %v1610_v30  ;;  %v6496_v6 = vcombine.high %v9213_v41, %v7123_v44  ;;  %v3521_v51 = vcombine.low %v9215_v49, %v7188_v11  ;;  %v8147_v27 = vcombine.high %v8089_v39, %v8089_v39 }
 0x125   : > { %v2238_v12 = vcombine.low %v1603_v24, %v1612_v57  ;;  %v2259_v45 = vrot.slane %v2237_v33, %v7068_v61  ;;  %v2267_v59 = vcombine.low %v2245_v36, %v2252_v18  ;;  %v1026_v30 = vrot.slane %v1012_v2, %v7068_v61 }
 0x126   : > { %v1027_v48 = vcombine.high %v1019_v43, %v1019_v43  ;;  %v8143_v19 = vrot.slane %v1019_v43, %v7068_v61  ;;  %v9217_v24 = vcombine.high %v9216_v37, %v7084_v20  ;;  %v3535_v41 = vrot.slane %v3519_v10, %v7068_v61 }
 0x127   : > { %v2266_v9 = vrot.slane %v2238_v12, %v7068_v61  ;;  %v3549_v11 = vrot.slane %v3521_v51, %v7068_v61  ;;  %v2275_v33 = vrot.slane %v2267_v59, %v7068_v61  ;;  %v1028_v36 = vcombine.high %v1026_v30, %v1026_v30 }
 0x128   : > { %v3528_v44 = vrot.slane %v9217_v24, %v7068_v61  ;;  %v8157_v18 = vrot.slane %v1027_v48, %v7068_v61  ;;  %v8160_v12 = vrot.slane %v1026_v30, %v7068_v61  ;;  %v8164_v2 = vcombine.high %v8143_v19, %v8143_v19 }
 0x129   : > { %v2268_v57 = vcombine.low %v2259_v45, %v2266_v9  ;;  %v3542_v20 = vrot.slane %v6496_v6, %v7068_v61  ;;  %v8169_v45 = vrot.slane %v1028_v36, %v7068_v61  ;;  %v1071_v37 = vcombine.high %v7835_v54, %v7835_v54 }
 0x12a   : > { %v3550_v43 = vcombine.low %v3528_v44, %v3535_v41  ;;  %v8173_v59 = vcombine.high %v8157_v18, %v8157_v18  ;;  %v1613_v24 = vshrl.u32 %v7777_v1, 16  ;;  %v1626_v44 = vshll.u32 %v7859_v17, 16 }
 0x12b   : > { %v2282_v10 = vrot.slane %v2268_v57, %v7068_v61  ;;  %v3551_v30 = vcombine.low %v3542_v20, %v3549_v11  ;;  %v1629_v57 = vshrl.u32 %v7859_v17, 16  ;;  %v1634_v36 = vshll.u32 %v7774_v32, 16 }
 0x12c   : > { %v3558_v48 = vrot.slane %v3550_v43, %v7068_v61  ;;  %v1637_v51 = vshrl.u32 %v7774_v32, 16  ;;  %v9218_v11 = vshll.u32 %v7781_v53, 16  ;;  %v9219_v20 = vshrl.u32 %v7781_v53, 16 }
 0x12d   : > { %v2283_v6 = vcombine.low %v2275_v33, %v2282_v10  ;;  %v3565_v41 = vrot.slane %v3551_v30, %v7068_v61  ;;  %v1642_v10 = vshll.u32 %v7835_v54, 16  ;;  %v1645_v30 = vshrl.u32 %v7835_v54, 16 }
 0x12e   : > { %v1620_v33 = vsel %vm7305_vm6, %v1613_v24, %v9218_v11  ;;  %v1628_v43 = vsel %vm7305_vm6, %v9219_v20, %v1626_v44  ;;  %v1650_v49 = vshll.u32 %v7850_v34, 16  ;;  %v1653_v24 = vshrl.u32 %v7850_v34, 16 }
 0x12f   : > { %6655 = vmatmul.mubr.msk.bf16.gmra.mrb[28].mxu1 %vm2500_vm0, %v2283_v6  ;;  %v3566_v9 = vcombine.low %v3558_v48, %v3565_v41  ;;  %v1636_v6 = vsel %vm7305_vm6, %v1629_v57, %v1634_v36  ;;  %v1644_v11 = vsel %vm7305_vm6, %v1637_v51, %v1642_v10  ;;  %v1658_v40 = vshll.u32 %v1071_v37, 16 }
 0x130   : > { %6658 = vmatprep.mubr.msk.bf16.mxu1 %vm6894_vm1, %v9140_v52  ;;  %v1667_v44 = vshll.u32 %v7868_v7, 16  ;;  %v1670_v20 = vshrl.u32 %v7868_v7, 16  ;;  %v1652_v48 = vsel %vm7305_vm6, %v1645_v30, %v1650_v49  ;;  %v2284_v41 = vcombine.low %v1620_v33, %v1628_v43  ;;  %v9222_v49 = vld [vmem:[#allocation11_spill] sm:$0xff] }
 0x131   : > { %6739 = vmatmul.mubr.msk.bf16.gmra.mrb[4].mxu0 %vm2500_vm0, %v3566_v9  ;;  %v2285_v54 = vcombine.low %v1636_v6, %v1644_v11  ;;  %v3567_v57 = vcombine.low %v7220_v4, %v7176_v28  ;;  %v1660_v36 = vsel %vm7305_vm6, %v1653_v24, %v1658_v40  ;;  %v9220_v51 = vshrl.u32 %v7843_v29, 16  ;;  %v9223_v30 = vld [vmem:[#allocation15_spill] sm:$0xff]  ;;  %v9224_v6 = vld [vmem:[#allocation13_spill] sm:$0xff] }
 0x132   : > { %v9221_v10 = vshll.u32 %v7873_v58, 16  ;;  %6742 = vmatprep.mubr.msk.bf16.mxu0 %vm6894_vm1, %v9140_v52  ;;  %v3568_v33 = vcombine.low %v9222_v49, %v7211_v50  ;;  %v2286_v28 = vcombine.low %v1652_v48, %v1660_v36  ;;  %v2294_v40 = vrot.slane %v2284_v41, %v7068_v61 }
 0x133   : > { %v1669_v37 = vsel %vm7305_vm6, %v9220_v51, %v1667_v44  ;;  %v2301_v43 = vrot.slane %v2285_v54, %v7068_v61  ;;  %v3569_v24 = vcombine.low %v9224_v6, %v9223_v30  ;;  %v3577_v11 = vrot.slane %v3567_v57, %v7068_v61 }
 0x134   : > { %v1677_v9 = vsel %vm7305_vm6, %v1670_v20, %v9221_v10  ;;  %v3584_v44 = vrot.slane %v3568_v33, %v7068_v61  ;;  %v9225_v20 = vld [vmem:[#allocation12_spill] sm:$0xff]  ;;  %v2308_v50 = vrot.slane %v2286_v28, %v7068_v61  ;;  %v1683_v41 = vshll.u32 %v7887_v60, 16 }
 0x135   : > { %v2287_v4 = vcombine.low %v1669_v37, %v1677_v9  ;;  %v9226_v51 = vcombine.high %v9225_v20, %v9223_v30  ;;  %v2316_v36 = vcombine.low %v2294_v40, %v2301_v43  ;;  %v3591_v54 = vrot.slane %v3569_v24, %v7068_v61 }
 0x136   : > { %v3599_v37 = vcombine.low %v3577_v11, %v3584_v44  ;;  %v1686_v9 = vshrl.u32 %v7887_v60, 16  ;;  %v1699_v57 = vshll.u32 %v7879_v13, 16  ;;  %v9227_v30 = vshrl.u32 %v7873_v58, 16 }
 0x137   : > { %v3598_v10 = vrot.slane %v9226_v51, %v7068_v61  ;;  %v2315_v48 = vrot.slane %v2287_v4, %v7068_v61  ;;  %v2324_v33 = vrot.slane %v2316_v36, %v7068_v61  ;;  %v1702_v4 = vshrl.u32 %v7879_v13, 16 }
 0x138   : > { %v1685_v28 = vsel %vm7305_vm6, %v9227_v30, %v1683_v41  ;;  %v3607_v43 = vrot.slane %v3599_v37, %v7068_v61  ;;  %v9228_v6 = vshll.u32 %v7853_v62, 16  ;;  %v9229_v11 = vshrl.u32 %v7853_v62, 16 }
 0x139   : > { %v2317_v49 = vcombine.low %v2308_v50, %v2315_v48  ;;  %v3600_v40 = vcombine.low %v3591_v54, %v3598_v10  ;;  %v1707_v51 = vshll.u32 %v7883_v0, 16  ;;  %v1710_v50 = vshrl.u32 %v7883_v0, 16 }
 0x13a   : > { %v1693_v24 = vsel %vm7305_vm6, %v1686_v9, %v9228_v6  ;;  %v1701_v44 = vsel %vm7305_vm6, %v9229_v11, %v1699_v57  ;;  %v1715_v10 = vshll.u32 %v7965_v42, 16  ;;  %v1724_v36 = vshll.u32 %v7976_v31, 16 }
 0x13b   : > { %v2331_v20 = vrot.slane %v2317_v49, %v7068_v61  ;;  %v3614_v48 = vrot.slane %v3600_v40, %v7068_v61  ;;  %v1727_v41 = vshrl.u32 %v7976_v31, 16  ;;  %v1740_v54 = vshll.u32 %v8038_v21, 16 }
 0x13c   : > { %v1709_v9 = vsel %vm7305_vm6, %v1702_v4, %v1707_v51  ;;  %v1717_v57 = vsel %vm7305_vm6, %v1710_v50, %v1715_v10  ;;  %v2333_v49 = vcombine.low %v1685_v28, %v1693_v24  ;;  %v9230_v6 = vshrl.u32 %v7956_v35, 16  ;;  %v9233_v51 = vld [vmem:[#allocation16_spill] sm:$0xff]  ;;  %v9234_v50 = vld [vmem:[#allocation14_spill] sm:$0xff] }
 0x13d   : > { %v2332_v37 = vcombine.low %v2324_v33, %v2331_v20  ;;  %v3615_v30 = vcombine.low %v3607_v43, %v3614_v48  ;;  %v9231_v11 = vshll.u32 %v7980_v22, 16  ;;  %v9232_v33 = vshrl.u32 %v7980_v22, 16 }
 0x13e   : > { %v1726_v40 = vsel %vm7305_vm6, %v9230_v6, %v1724_v36  ;;  %v2334_v20 = vcombine.low %v1701_v44, %v1709_v9  ;;  %v2343_v24 = vrot.slane %v2333_v49, %v7068_v61  ;;  %v3616_v10 = vcombine.low %v9234_v50, %v9233_v51  ;;  %v9235_v36 = vld [vmem:[#allocation19_spill] sm:$0xff]  ;;  %v9238_v49 = vld [vmem:[#allocation22_spill] sm:$0xff] }
 0x13f   : > { %v1734_v42 = vsel %vm7305_vm6, %v1727_v41, %v9231_v11  ;;  %v1742_v4 = vsel %vm7305_vm6, %v9232_v33, %v1740_v54  ;;  %6659 = vmatmul.mubr.msk.bf16.gmra.mrb[32].mxu1 %vm2500_vm0, %v2332_v37  ;;  %v2335_v28 = vcombine.low %v1717_v57, %v1726_v40  ;;  %6743 = vmatmul.mubr.msk.bf16.gmra.mrb[8].mxu0 %vm2500_vm0, %v3615_v30  ;;  %v9236_v41 = vld [vmem:[#allocation17_spill] sm:$0xff]  ;;  %v1743_v44 = vshrl.u32 %v8038_v21, 16  ;;  %v9237_v57 = vld [vmem:[#allocation18_spill] sm:$0xff] }
 0x140   : > { %v2336_v43 = vcombine.low %v1734_v42, %v1742_v4  ;;  %6662 = vmatprep.mubr.msk.bf16.mxu1 %vm6894_vm1, %v9140_v52  ;;  %v6498_v48 = vcombine.high %v9234_v50, %v9233_v51  ;;  %v3618_v54 = vcombine.low %v9236_v41, %v9235_v36  ;;  %v2350_v42 = vrot.slane %v2334_v20, %v7068_v61 }
 0x141   : > { %v2357_v37 = vrot.slane %v2335_v28, %v7068_v61  ;;  %6746 = vmatprep.mubr.msk.bf16.mxu0 %vm6894_vm1, %v9140_v52  ;;  %v3619_v30 = vcombine.low %v9238_v49, %v9237_v57  ;;  %v3626_v6 = vrot.slane %v3616_v10, %v7068_v61  ;;  %v1073_v33 = vcombine.high %v7985_v16, %v7985_v16 }
 0x142   : > { %v2364_v9 = vrot.slane %v2336_v43, %v7068_v61  ;;  %v3633_v40 = vrot.slane %v6498_v48, %v7068_v61  ;;  %v3640_v11 = vrot.slane %v3618_v54, %v7068_v61  ;;  %v2365_v4 = vcombine.low %v2343_v24, %v2350_v42 }
 0x143   : > { %v3647_v28 = vrot.slane %v3619_v30, %v7068_v61  ;;  %v1748_v43 = vshll.u32 %v7973_v47, 16  ;;  %v1751_v50 = vshrl.u32 %v7973_v47, 16  ;;  %v1756_v36 = vshll.u32 %v7985_v16, 16 }
 0x144   : > { %v2366_v20 = vcombine.low %v2357_v37, %v2364_v9  ;;  %v3648_v51 = vcombine.low %v3626_v6, %v3633_v40  ;;  %v1759_v10 = vshrl.u32 %v7985_v16, 16  ;;  %v2373_v48 = vrot.slane %v2365_v4, %v7068_v61 }
 0x145   : > { %v3649_v54 = vcombine.low %v3640_v11, %v3647_v28  ;;  %v1750_v24 = vsel %vm7305_vm6, %v1743_v44, %v1748_v43  ;;  %v1758_v37 = vsel %vm7305_vm6, %v1751_v50, %v1756_v36  ;;  %v1764_v9 = vshll.u32 %v8023_v23, 16 }
 0x146   : > { %v2380_v41 = vrot.slane %v2366_v20, %v7068_v61  ;;  %v3656_v42 = vrot.slane %v3648_v51, %v7068_v61  ;;  %v1767_v57 = vshrl.u32 %v8023_v23, 16  ;;  %v1772_v6 = vshll.u32 %v1073_v33, 16 }
 0x147   : > { %v3663_v30 = vrot.slane %v3649_v54, %v7068_v61  ;;  %v1781_v40 = vshll.u32 %v8064_v38, 16  ;;  %v1766_v11 = vsel %vm7305_vm6, %v1759_v10, %v1764_v9  ;;  %v1784_v44 = vshrl.u32 %v8064_v38, 16 }
 0x148   : > { %v2381_v49 = vcombine.low %v2373_v48, %v2380_v41  ;;  %v1797_v4 = vshll.u32 %v8097_v63, 16  ;;  %v1800_v20 = vshrl.u32 %v8097_v63, 16  ;;  %v1774_v43 = vsel %vm7305_vm6, %v1767_v57, %v1772_v6 }
 0x149   : > { %v3664_v28 = vcombine.low %v3656_v42, %v3663_v30  ;;  %v9239_v51 = vshrl.u32 %v8056_v5, 16  ;;  %v2382_v50 = vcombine.low %v1750_v24, %v1758_v37  ;;  %v9240_v36 = vshll.u32 %v8069_v46, 16  ;;  %v9244_v30 = vld [vmem:[#allocation20_spill] sm:$0xff] }
 0x14a   : > { %6663 = vmatmul.mubr.msk.bf16.gmra.mrb[36].mxu1 %vm2500_vm0, %v2381_v49  ;;  %v9241_v48 = vshrl.u32 %v8069_v46, 16  ;;  %v9242_v54 = vshll.u32 %v8061_v3, 16  ;;  %v2383_v9 = vcombine.low %v1766_v11, %v1774_v43  ;;  %v9243_v49 = vld [vmem:[#allocation21_spill] sm:$0xff]  ;;  %v3668_v11 = vcombine.low %v7361_v14, %v7427_v25 }
 0x14b   : > { %v1783_v33 = vsel %vm7305_vm6, %v9239_v51, %v1781_v40  ;;  %6666 = vmatprep.mubr.msk.bf16.mxu1 %vm6894_vm1, %v9140_v52  ;;  %v1791_v10 = vsel %vm7305_vm6, %v1784_v44, %v9240_v36  ;;  %6747 = vmatmul.mubr.msk.bf16.gmra.mrb[12].mxu0 %vm2500_vm0, %v3664_v28  ;;  %v2392_v57 = vrot.slane %v2382_v50, %v7068_v61  ;;  %v9245_v44 = vld [vmem:[#allocation25_spill] sm:$0xff]  ;;  %vm5421_vm2 = vcmask 60416  }
 0x14c   : > { %v1799_v41 = vsel %vm7305_vm6, %v9241_v48, %v1797_v4  ;;  %v1807_v42 = vsel %vm7305_vm6, %v1800_v20, %v9242_v54  ;;  %v2384_v24 = vcombine.low %v1783_v33, %v1791_v10  ;;  %v3665_v6 = vcombine.low %v9244_v30, %v9243_v49  ;;  %6750 = vmatprep.mubr.msk.bf16.mxu0 %vm6894_vm1, %v9140_v52  ;;  %v9246_v4 = vld [vmem:[#allocation23_spill] sm:$0xff]  ;;  %v9247_v20 = vld [vmem:[#allocation24_spill] sm:$0xff] }
 0x14d   : > { %v2385_v37 = vcombine.low %v1799_v41, %v1807_v42  ;;  %v2399_v40 = vrot.slane %v2383_v9, %v7068_v61  ;;  %v3666_v51 = vcombine.low %v9246_v4, %v9245_v44  ;;  %v9248_v28 = vcombine.high %v9247_v20, %v9245_v44 }
 0x14e   : > { %v2406_v33 = vrot.slane %v2384_v24, %v7068_v61  ;;  %v3675_v36 = vrot.slane %v3665_v6, %v7068_v61  ;;  %v1813_v10 = vshll.u32 %v8089_v39, 16  ;;  %v3696_v54 = vrot.slane %v3668_v11, %v7068_v61 }
 0x14f   : > { %v3689_v43 = vrot.slane %v9248_v28, %v7068_v61  ;;  %v2413_v50 = vrot.slane %v2385_v37, %v7068_v61  ;;  %v2414_v48 = vcombine.low %v2392_v57, %v2399_v40  ;;  %v3682_v41 = vrot.slane %v3666_v51, %v7068_v61 }
 0x150   : > { %v1816_v42 = vshrl.u32 %v8089_v39, 16  ;;  %v9249_v49 = vshrl.u32 %v8061_v3, 16  ;;  %v1821_v24 = vshll.u32 %v8093_v55, 16  ;;  %v1824_v37 = vshrl.u32 %v8093_v55, 16 }
 0x151   : > { %v2415_v9 = vcombine.low %v2406_v33, %v2413_v50  ;;  %v2422_v6 = vrot.slane %v2414_v48, %v7068_v61  ;;  %v3697_v44 = vcombine.low %v3675_v36, %v3682_v41  ;;  %v3698_v57 = vcombine.low %v3689_v43, %v3696_v54 }
 0x152   : > { %v1815_v30 = vsel %vm7305_vm6, %v9249_v49, %v1813_v10  ;;  %v1829_v40 = vshll.u32 %v8147_v27, 16  ;;  %v1823_v51 = vsel %vm7305_vm6, %v1816_v42, %v1821_v24  ;;  %v1838_v11 = vshll.u32 %v8157_v18, 16 }
 0x153   : > { %v2429_v4 = vrot.slane %v2415_v9, %v7068_v61  ;;  %v1841_v20 = vshrl.u32 %v8157_v18, 16  ;;  %v3705_v28 = vrot.slane %v3697_v44, %v7068_v61  ;;  %v3712_v33 = vrot.slane %v3698_v57, %v7068_v61 }
 0x154   : > { %v1831_v50 = vsel %vm7305_vm6, %v1824_v37, %v1829_v40  ;;  %v1854_v43 = vshll.u32 %v8173_v59, 16  ;;  %v9250_v10 = vshrl.u32 %v8143_v19, 16  ;;  %v9251_v41 = vshll.u32 %v8164_v2, 16 }
 0x155   : > { %v2430_v36 = vcombine.low %v2422_v6, %v2429_v4  ;;  %v1857_v42 = vshrl.u32 %v8173_v59, 16  ;;  %v3713_v9 = vcombine.low %v3705_v28, %v3712_v33  ;;  %v9252_v49 = vshrl.u32 %v8164_v2, 16  ;;  %v9253_v28 = vld [vmem:[#allocation28_spill] sm:$0xff]  ;;  %v9254_v33 = vld [vmem:[#allocation27_spill] sm:$0xff] }
 0x156   : > { %v1840_v48 = vsel %vm7305_vm6, %v9250_v10, %v1838_v11  ;;  %v1848_v54 = vsel %vm7305_vm6, %v1841_v20, %v9251_v41  ;;  %v1862_v37 = vshll.u32 %v8160_v12, 16  ;;  %v1865_v6 = vshrl.u32 %v8160_v12, 16  ;;  %v9255_v41 = vld [vmem:[#allocation26_spill] sm:$0xff] }
 0x157   : > { %v1856_v24 = vsel %vm7305_vm6, %v9252_v49, %v1854_v43  ;;  %6667 = vmatmul.mubr.msk.bf16.gmra.mrb[40].mxu1 %vm2500_vm0, %v2430_v36  ;;  %v1870_v44 = vshll.u32 %v8169_v45, 16  ;;  %v2431_v57 = vcombine.low %v1815_v30, %v1823_v51  ;;  %v2432_v40 = vcombine.low %v1831_v50, %v1840_v48  ;;  %6751 = vmatmul.mubr.msk.bf16.gmra.mrb[16].mxu0 %vm2500_vm0, %v3713_v9 }
 0x158   : > { %v2433_v4 = vcombine.low %v1848_v54, %v1856_v24  ;;  %6670 = vmatprep.mubr.msk.bf16.mxu1 %vm6894_vm1, %v9140_v52  ;;  %v1864_v11 = vsel %vm7305_vm6, %v1857_v42, %v1862_v37  ;;  %v6500_v20 = vcombine.high %v7361_v14, %v7427_v25  ;;  %v3715_v43 = vcombine.low %v9254_v33, %v9253_v28  ;;  %v9256_v14 = vld [vmem:[#allocation30_spill] sm:$0xff]  ;;  %v9257_v54 = vld [vmem:[#allocation29_spill] sm:$0xff] }
 0x159   : > { %v1873_v36 = vshrl.u32 %v8169_v45, 16  ;;  %v1872_v30 = vsel %vm7305_vm6, %v1865_v6, %v1870_v44  ;;  %v2441_v51 = vrot.slane %v2431_v57, %v7068_v61  ;;  %v2448_v50 = vrot.slane %v2432_v40, %v7068_v61  ;;  %6754 = vmatprep.mubr.msk.bf16.mxu0 %vm6894_vm1, %v9140_v52 }
 0x15a   : > { %v2455_v10 = vrot.slane %v2433_v4, %v7068_v61  ;;  %v2434_v48 = vcombine.low %v1864_v11, %v1872_v30  ;;  %v3716_v25 = vcombine.low %v9256_v14, %v9255_v41  ;;  %v3717_v42 = vcombine.low %v9257_v54, %v7459_v8  ;;  %v9259_v4 = vld [vmem:[#allocation34_spill] sm:$0xff]  ;;  %v9260_v8 = vld [vmem:[#allocation31_spill] sm:$0xff]  ;;  %v9262_v14 = vld [vmem:[#allocation33_spill] sm:$0xff] }
 0x15b   : > { %v3724_v9 = vrot.slane %v6500_v20, %v7068_v61  ;;  %v2463_v49 = vcombine.low %v2441_v51, %v2448_v50  ;;  %v3731_v24 = vrot.slane %v3715_v43, %v7068_v61  ;;  %v8430_v37 = vcombine.high %v8160_v12, %v8160_v12  ;;  %v9261_v41 = vld [vmem:[#allocation35_spill] sm:$0xff] }
 0x15c   : > { %v1075_v6 = vcombine.high %v8169_v45, %v8169_v45  ;;  %v2462_v44 = vrot.slane %v2434_v48, %v7068_v61  ;;  %v3738_v57 = vrot.slane %v3716_v25, %v7068_v61  ;;  %v3745_v40 = vrot.slane %v3717_v42, %v7068_v61 }
 0x15d   : > { %9258 = vst [vmem:[#allocation6_spill] sm:$0xff] %v8430_v37  ;;  %v3763_v11 = vcombine.low %v9260_v8, %v9259_v4  ;;  %v2471_v20 = vrot.slane %v2463_v49, %v7068_v61  ;;  %v3746_v28 = vcombine.low %v3724_v9, %v3731_v24  ;;  %v1878_v33 = vshll.u32 %v8430_v37, 16 }
 0x15e   : > { %v1881_v43 = vshrl.u32 %v8430_v37, 16  ;;  %v2464_v30 = vcombine.low %v2455_v10, %v2462_v44  ;;  %v3747_v51 = vcombine.low %v3738_v57, %v3745_v40  ;;  %v1886_v50 = vshll.u32 %v1075_v6, 16  ;;  %v9263_v6 = vld [vmem:[#allocation32_spill] sm:$0xff] }
 0x15f   : > { %v3765_v48 = vcombine.low %v9262_v14, %v9261_v41  ;;  %v3754_v25 = vrot.slane %v3746_v28, %v7068_v61  ;;  %v1880_v54 = vsel %vm7305_vm6, %v1873_v36, %v1878_v33  ;;  %v6502_v42 = vcombine.high %v9262_v14, %v9261_v41  ;;  %v9265_v28 = vld [vmem:[#allocation44_spill] sm:$0xff]  ;;  %v9266_v33 = vld [vmem:[#allocation42_spill] sm:$0xff] }
 0x160   : > { %v3773_v9 = vrot.slane %v3763_v11, %v7068_v61  ;;  %v2478_v49 = vrot.slane %v2464_v30, %v7068_v61  ;;  %v3761_v24 = vrot.slane %v3747_v51, %v7068_v61  ;;  %v1888_v10 = vsel %vm7305_vm6, %v1881_v43, %v1886_v50  ;;  %v9267_v51 = vld [vmem:[#allocation37_spill] sm:$0xff]  ;;  %v9268_v37 = vld [vmem:[#allocation36_spill] sm:$0xff] }
 0x161   : > { %v9264_v44 = vcombine.high %v9263_v6, %v9259_v4  ;;  %v2480_v40 = vcombine.low %v1880_v54, %v1888_v10  ;;  %v3787_v36 = vrot.slane %v3765_v48, %v7068_v61  ;;  %v3794_v8 = vrot.slane %v6502_v42, %v7068_v61  ;;  %v9269_v4 = vld [vmem:[#allocation40_spill] sm:$0xff]  ;;  %v9270_v54 = vld [vmem:[#allocation39_spill] sm:$0xff]  ;;  %v9271_v10 = vld [vmem:[#allocation38_spill] sm:$0xff] }
 0x162   : > { %v3071_v11 = vcombine.low %v9266_v33, %v9265_v28  ;;  %v2479_v41 = vcombine.low %v2471_v20, %v2478_v49  ;;  %v3762_v30 = vcombine.low %v3754_v25, %v3761_v24  ;;  %v3812_v15 = vcombine.low %v9267_v51, %v7725_v56  ;;  %v9272_v56 = vld [vmem:[#allocation41_spill] sm:$0xff] }
 0x163   : > { %v3780_v57 = vrot.slane %v9264_v44, %v7068_v61  ;;  %v2487_v43 = vrot.slane %v2480_v40, %v7068_v61  ;;  %v3796_v50 = vcombine.low %v3787_v36, %v3794_v8  ;;  %v3813_v6 = vcombine.low %v9269_v4, %v9268_v37  ;;  %v9273_v36 = vld [vmem:[#allocation43_spill] sm:$0xff] }
 0x164   : > { %v3814_v48 = vcombine.low %v9271_v10, %v9270_v54  ;;  %v6503_v42 = vcombine.high %v7755_v26, %v7777_v1  ;;  %6671 = vmatmul.mubr.msk.bf16.gmra.mrb[44].mxu1 %vm2500_vm0, %v2479_v41  ;;  %6755 = vmatmul.mubr.msk.bf16.gmra.mrb[20].mxu0 %vm2500_vm0, %v3762_v30  ;;  %v3815_v25 = vcombine.low %v9272_v56, %v7777_v1 }
 0x165   : > { %v3795_v14 = vcombine.low %v3773_v9, %v3780_v57  ;;  %6674 = vmatprep.mubr.msk.bf16.mxu1 %vm6894_vm1, %v9140_v52  ;;  %6758 = vmatprep.mubr.msk.bf16.mxu0 %vm6894_vm1, %v9140_v52  ;;  %v3810_v37 = vrot.slane %v3796_v50, %v7068_v61  ;;  %v3822_v9 = vrot.slane %v3812_v15, %v7068_v61 }
 0x166   : > { %v3829_v26 = vrot.slane %v3813_v6, %v7068_v61  ;;  %v3836_v49 = vrot.slane %v3814_v48, %v7068_v61  ;;  %v3843_v24 = vrot.slane %v3815_v25, %v7068_v61  ;;  %v3072_v44 = vcombine.low %v7777_v1, %v7781_v53 }
 0x167   : > { %v3803_v20 = vrot.slane %v3795_v14, %v7068_v61  ;;  %v3073_v57 = vcombine.low %v7859_v17, %v7774_v32  ;;  %v2494_v40 = vrot.slane %v2487_v43, %v7068_v61  ;;  %v3074_v8 = vcombine.low %v9273_v36, %v7850_v34 }
 0x168   : > { %v9274_v41 = vcombine.low %v7843_v29, %v7868_v7  ;;  %v3082_v51 = vrot.slane %v3072_v44, %v7068_v61  ;;  %v3862_v1 = vcombine.low %v7774_v32, %v9273_v36  ;;  %v3844_v53 = vcombine.low %v3822_v9, %v3829_v26 }
 0x169   : > { %v3811_v14 = vcombine.low %v3803_v20, %v3810_v37  ;;  %v3089_v15 = vrot.slane %v3073_v57, %v7068_v61  ;;  %v3096_v17 = vrot.slane %v3074_v8, %v7068_v61  ;;  %v6504_v43 = vcombine.high %v7774_v32, %v9273_v36 }
 0x16a   : > { %v3103_v30 = vrot.slane %v9274_v41, %v7068_v61  ;;  %v3864_v34 = vcombine.low %v7868_v7, %v7873_v58  ;;  %v3845_v50 = vcombine.low %v3836_v49, %v3843_v24  ;;  %v3871_v6 = vrot.slane %v6503_v42, %v7068_v61 }
 0x16b   : > { %v3104_v4 = vcombine.low %v3082_v51, %v3089_v15  ;;  %v3878_v54 = vrot.slane %v3862_v1, %v7068_v61  ;;  %v3885_v48 = vrot.slane %v6504_v43, %v7068_v61  ;;  %v3852_v25 = vrot.slane %v3844_v53, %v7068_v61 }
 0x16c   : > { %v3105_v10 = vcombine.low %v3096_v17, %v3103_v30  ;;  %v3892_v20 = vrot.slane %v3864_v34, %v7068_v61  ;;  %6675 = vmatmul.mubr.msk.bf16.gmra.mrb[48].mxu1 %vm2500_vm0, %v2494_v40  ;;  %6759 = vmatmul.mubr.msk.bf16.gmra.mrb[24].mxu0 %vm2500_vm0, %v3811_v14  ;;  %v3859_v37 = vrot.slane %v3845_v50, %v7068_v61  ;;  %v9275_v30 = vld [vmem:[#allocation45_spill] sm:$0xff] }
 0x16d   : > { %v3112_v32 = vrot.slane %v3104_v4, %v7068_v61  ;;  %v3893_v56 = vcombine.low %v3871_v6, %v3878_v54  ;;  %6708 = vmatprep.mubr.msk.bf16.mxu1 %vm6894_vm1, %v9140_v52  ;;  %6762 = vmatprep.mubr.msk.bf16.mxu0 %vm6894_vm1, %v9140_v52  ;;  %v6477_v26 = vcombine.high %v7843_v29, %v7868_v7 }
 0x16e   : > { %v3119_v58 = vrot.slane %v3105_v10, %v7068_v61  ;;  %v3894_v42 = vcombine.low %v3885_v48, %v3892_v20  ;;  %v3123_v44 = vcombine.low %v7883_v0, %v7956_v35  ;;  %v3122_v57 = vcombine.low %v7853_v62, %v7879_v13 }
 0x16f   : > { %v3901_v9 = vrot.slane %v3893_v56, %v7068_v61  ;;  %v3124_v40 = vcombine.low %v7976_v31, %v7980_v22  ;;  %v6505_v36 = vcombine.high %v7956_v35, %v7976_v31  ;;  %v3860_v41 = vcombine.low %v3852_v25, %v3859_v37 }
 0x170   : > { %v3120_v49 = vcombine.low %v3112_v32, %v3119_v58  ;;  %v3908_v24 = vrot.slane %v3894_v42, %v7068_v61  ;;  %v3910_v29 = vcombine.low %v7887_v60, %v7853_v62  ;;  %v3911_v7 = vcombine.low %v7879_v13, %v7883_v0 }
 0x171   : > { %v3912_v14 = vcombine.low %v9275_v30, %v7976_v31  ;;  %v3131_v51 = vrot.slane %v6477_v26, %v7068_v61  ;;  %v3138_v35 = vrot.slane %v3122_v57, %v7068_v61  ;;  %v3145_v22 = vrot.slane %v3123_v44, %v7068_v61 }
 0x172   : > { %v3909_v8 = vcombine.low %v3901_v9, %v3908_v24  ;;  %v3152_v62 = vrot.slane %v3124_v40, %v7068_v61  ;;  %v3920_v13 = vrot.slane %v3910_v29, %v7068_v61  ;;  %v3927_v0 = vrot.slane %v3911_v7, %v7068_v61 }
 0x173   : > { %v3934_v60 = vrot.slane %v3912_v14, %v7068_v61  ;;  %v3941_v31 = vrot.slane %v6505_v36, %v7068_v61  ;;  %v3172_v28 = vcombine.low %v8056_v5, %v8064_v38  ;;  %v6478_v33 = vcombine.high %v8056_v5, %v8064_v38 }
 0x174   : > { %6709 = vmatmul.mubr.msk.bf16.vlgmr.msra.gmra.mrb[28].mxu1 %vm2500_vm0, %v3071_v11  ;;  %6763 = vmatmul.mubr.msk.bf16.gmra.mrb[28].mxu0 %vm2500_vm0, %v3860_v41  ;;  %v3170_v11 = vcombine.low %v8038_v21, %v7973_v47  ;;  %v3171_v15 = vcombine.low %v7985_v16, %v8023_v23  ;;  %v3153_v1 = vcombine.low %v3131_v51, %v3138_v35 }
 0x175   : > { %6712 = vmatprep.mubr.msk.bf16.mxu1 %vm6894_vm1, %v9140_v52  ;;  %6766 = vmatprep.mubr.msk.bf16.mxu0 %vm6894_vm1, %v9140_v52  ;;  %v3154_v53 = vcombine.low %v3145_v22, %v3152_v62  ;;  %v3959_v17 = vcombine.low %v7973_v47, %v7985_v16  ;;  %v6506_v43 = vcombine.high %v7973_v47, %v7985_v16 }
 0x176   : > { %v3961_v34 = vcombine.low %v8064_v38, %v8069_v46  ;;  %v3962_v5 = vcombine.low %v8097_v63, %v8061_v3  ;;  %v3942_v50 = vcombine.low %v3920_v13, %v3927_v0  ;;  %v3943_v4 = vcombine.low %v3934_v60, %v3941_v31 }
 0x177   : > { %v3180_v21 = vrot.slane %v3170_v11, %v7068_v61  ;;  %v3187_v23 = vrot.slane %v3171_v15, %v7068_v61  ;;  %v3194_v6 = vrot.slane %v3172_v28, %v7068_v61  ;;  %v3201_v54 = vrot.slane %v6478_v33, %v7068_v61  ;;  %v9276_v15 = vld [vmem:[#allocation6_spill] sm:$0xff] }
 0x178   : > { %v3161_v16 = vrot.slane %v3153_v1, %v7068_v61  ;;  %v3168_v47 = vrot.slane %v3154_v53, %v7068_v61  ;;  %v3969_v38 = vrot.slane %v3959_v17, %v7068_v61  ;;  %v3976_v46 = vrot.slane %v6506_v43, %v7068_v61 }
 0x179   : > { %v3983_v63 = vrot.slane %v3961_v34, %v7068_v61  ;;  %v3990_v10 = vrot.slane %v3962_v5, %v7068_v61  ;;  %v3950_v48 = vrot.slane %v3942_v50, %v7068_v61  ;;  %v3957_v20 = vrot.slane %v3943_v4, %v7068_v61 }
 0x17a   : > { %v3220_v32 = vcombine.low %v8093_v55, %v8143_v19  ;;  %v3202_v56 = vcombine.low %v3180_v21, %v3187_v23  ;;  %v3203_v58 = vcombine.low %v3194_v6, %v3201_v54  ;;  %v6507_v42 = vcombine.high %v8143_v19, %v8157_v18 }
 0x17b   : > { %v3219_v25 = vcombine.low %v8061_v3, %v8089_v39  ;;  %v3221_v37 = vcombine.low %v8157_v18, %v8164_v2  ;;  %v6508_v9 = vcombine.high %v8160_v12, %v8169_v45  ;;  %v3169_v26 = vcombine.low %v3161_v16, %v3168_v47 }
 0x17c   : > { %6713 = vmatmul.mubr.msk.bf16.gmra.mrb[32].mxu1 %vm2500_vm0, %v3120_v49  ;;  %6767 = vmatmul.mubr.msk.bf16.gmra.mrb[32].mxu0 %vm2500_vm0, %v3909_v8  ;;  %v3991_v49 = vcombine.low %v3969_v38, %v3976_v46  ;;  %v3992_v24 = vcombine.low %v3983_v63, %v3990_v10  ;;  %v3222_v44 = vcombine.low %v8173_v59, %v8160_v12 }
 0x17d   : > { %6716 = vmatprep.mubr.msk.bf16.mxu1 %vm6894_vm1, %v9140_v52  ;;  %6770 = vmatprep.mubr.msk.bf16.mxu0 %vm6894_vm1, %v9140_v52  ;;  %v3958_v57 = vcombine.low %v3950_v48, %v3957_v20  ;;  %v4008_v40 = vcombine.low %v8089_v39, %v8093_v55  ;;  %v4009_v19 = vcombine.low %v8147_v27, %v8157_v18 }
 0x17e   : > { %v4011_v3 = vcombine.low %v8160_v12, %v8169_v45  ;;  %v3210_v2 = vrot.slane %v3202_v56, %v7068_v61  ;;  %v3217_v36 = vrot.slane %v3203_v58, %v7068_v61  ;;  %v3229_v59 = vrot.slane %v3219_v25, %v7068_v61 }
 0x17f   : > { %v3236_v8 = vrot.slane %v3220_v32, %v7068_v61  ;;  %v3243_v39 = vrot.slane %v3221_v37, %v7068_v61  ;;  %v3999_v55 = vrot.slane %v3991_v49, %v7068_v61  ;;  %v4006_v27 = vrot.slane %v3992_v24, %v7068_v61  ;;  %v9277_v49 = vld [vmem:[#allocation3_spill] sm:$0xff] }
 0x180   : > { %v3250_v18 = vrot.slane %v3222_v44, %v7068_v61  ;;  %v4018_v12 = vrot.slane %v4008_v40, %v7068_v61  ;;  %v4025_v41 = vrot.slane %v4009_v19, %v7068_v61  ;;  %v4032_v29 = vrot.slane %v6507_v42, %v7068_v61 }
 0x181   : > { %v4039_v7 = vrot.slane %v4011_v3, %v7068_v61  ;;  %v3218_v30 = vcombine.low %v3210_v2, %v3217_v36  ;;  %v3251_v14 = vcombine.low %v3229_v59, %v3236_v8  ;;  %v4007_v51 = vcombine.low %v3999_v55, %v4006_v27 }
 0x182   : > { %v3252_v35 = vcombine.low %v3243_v39, %v3250_v18  ;;  %v4040_v22 = vcombine.low %v4018_v12, %v4025_v41  ;;  %v3268_v1 = vcombine.low %v8169_v45, %v9276_v15  ;;  %v4064_v5 = vrot.slane %v6508_v9, %v7068_v61 }
 0x183   : > { %v4041_v62 = vcombine.low %v4032_v29, %v4039_v7  ;;  %v3259_v13 = vrot.slane %v3251_v14, %v7068_v61  ;;  %v6896_v37 = vmov 1983009808  }
 0x184   : > { %6717 = vmatmul.mubr.msk.bf16.gmra.mrb[36].mxu1 %vm2500_vm0, %v3169_v26  ;;  %6771 = vmatmul.mubr.msk.bf16.gmra.mrb[36].mxu0 %vm2500_vm0, %v3958_v57  ;;  %v3266_v0 = vrot.slane %v3252_v35, %v7068_v61  ;;  %v4048_v60 = vrot.slane %v4040_v22, %v7068_v61  ;;  %v3275_v34 = vrot.slane %v3268_v1, %v7068_v61  ;;  %v4307_v9 = vunpack.c.l.s4 %v6896_v37 }
 0x185   : > { %6720 = vmatprep.mubr.msk.bf16.mxu1 %vm6894_vm1, %v9140_v52  ;;  %6774 = vmatprep.mubr.msk.bf16.mxu0 %vm6894_vm1, %v9140_v52  ;;  %v4055_v31 = vrot.slane %v4041_v62, %v7068_v61  ;;  %v4071_v45 = vrot.slane %v4064_v5, %v7068_v61 }
 0x186   : > { %v3267_v33 = vcombine.low %v3259_v13, %v3266_v0  ;;  %v3282_v50 = vrot.slane %v3275_v34, %v7068_v61  ;;  %v4308_v26 = vunpack.c.0.s8 %v4307_v9 }
 0x187   : > { %v4056_v11 = vcombine.low %v4048_v60, %v4055_v31 }
 0x188   : > { %v8669_v24 = vsub.s32 %v4308_v26, %v9277_v49 }
 0x18c   : > { %6721 = vmatmul.mubr.msk.bf16.gmra.mrb[40].mxu1 %vm2500_vm0, %v3218_v30  ;;  %6775 = vmatmul.mubr.msk.bf16.gmra.mrb[40].mxu0 %vm2500_vm0, %v4007_v51  ;;  %v2578_v28 = vpop.f32.mrb[0].mxu1 }
 0x18d   : > { %6724 = vmatprep.mubr.msk.bf16.mxu1 %vm6894_vm1, %v9140_v52  ;;  %6778 = vmatprep.mubr.msk.bf16.mxu0 %vm6894_vm1, %v9140_v52  ;;  %v6628_v53 = vpop.f32.mrb[1].mxu1 }
 0x18e   : > { %v2581_v17 = vpop.f32.mrb[2].mxu1 }
 0x18f   : > { %v6629_v43 = vpop.f32.mrb[3].mxu1 }
 0x194   : > { %6725 = vmatmul.mubr.msk.bf16.gmra.mrb[44].mxu1 %vm2500_vm0, %v3267_v33  ;;  %6779 = vmatmul.mubr.msk.bf16.gmra.mrb[44].mxu0 %vm2500_vm0, %v4056_v11 }
 0x195   : > { %6728 = vmatprep.mubr.msk.bf16.mxu1 %vm6894_vm1, %v9140_v52  ;;  %6782 = vmatprep.mubr.msk.bf16.mxu0 %vm6894_vm1, %v9140_v52  ;;  %vm5452_vm1 = vcmask 62464  }
 0x19c   : > { %6729 = vmatmul.mubr.msk.bf16.gmra.mrb[48].mxu1 %vm2500_vm0, %v3282_v50  ;;  %6783 = vmatmul.mubr.msk.bf16.gmra.mrb[48].mxu0 %vm2500_vm0, %v4071_v45 }
 0x19d   : > { %v8648_v4 = vpop.f32.mrb[4].mxu1 }
 0x19e   : > { %v6632_v21 = vpop.f32.mrb[5].mxu1 }
 0x19f   : > { %v8650_v23 = vpop.f32.mrb[6].mxu1 }
 0x1a0   : > { %v6633_v6 = vpop.f32.mrb[7].mxu1 }
 0x1ad   : > { %v8652_v54 = vpop.f32.mrb[8].mxu1 }
 0x1ae   : > { %v6636_v52 = vpop.f32.mrb[9].mxu1 }
 0x1af   : > { %v8654_v16 = vpop.f32.mrb[10].mxu1 }
 0x1b0   : > { %v6637_v47 = vpop.f32.mrb[11].mxu1 }
 0x1b9   : > { %v8656_v38 = vpop.f32.mrb[12].mxu1 }
 0x1ba   : > { %v6640_v46 = vpop.f32.mrb[13].mxu1 }
 0x1bb   : > { %v8658_v61 = vpop.f32.mrb[14].mxu1 }
 0x1bc   : > { %v6641_v63 = vpop.f32.mrb[15].mxu1 }
 0x1cf   : > { %v8660_v10 = vpop.f32.mrb[16].mxu1 }
 0x1d0   : > { %v6644_v48 = vpop.f32.mrb[17].mxu1 }
 0x1d1   : > { %v8662_v20 = vpop.f32.mrb[18].mxu1 }
 0x1d2   : > { %v6645_v32 = vpop.f32.mrb[19].mxu1 }
 0x1e0   : > { %v8664_v56 = vpop.f32.mrb[20].mxu1 }
 0x1e1   : > { %v6648_v58 = vpop.f32.mrb[21].mxu1 }
 0x1e2   : > { %v8666_v42 = vpop.f32.mrb[22].mxu1 }
 0x1e3   : > { %v6649_v25 = vpop.f32.mrb[23].mxu1 }
 0x1f0   : > { %v4153_v44 = vpop.f32.mrb[0].mxu0 }
 0x1f1   : > { %v6788_v57 = vadd.f32 %v4153_v44, %v2578_v28  ;;  %v6736_v40 = vpop.f32.mrb[1].mxu0 }
 0x1f2   : > { %v4156_v19 = vpop.f32.mrb[2].mxu0  ;;  %v8671_v3 = vpop.f32.mrb[24].mxu1 }
 0x1f3   : > { %v4305_v2 = vcombine.high %v6788_v57, %v6788_v57  ;;  %v4312_v36 = vrot.slane %v6788_v57, %v8669_v24  ;;  %v6789_v59 = vadd.f32 %v4156_v19, %v2581_v17  ;;  %v6737_v8 = vpop.f32.mrb[3].mxu0  ;;  %v6652_v39 = vpop.f32.mrb[25].mxu1 }
 0x1f4   : > { %v8674_v55 = vpop.f32.mrb[26].mxu1 }
 0x1f5   : > { %v4319_v27 = vrot.slane %v4305_v2, %v8669_v24  ;;  %v4320_v18 = vcombine.high %v4312_v36, %v4312_v36  ;;  %v4322_v12 = vcombine.high %v6789_v59, %v6789_v59  ;;  %v6653_v41 = vpop.f32.mrb[27].mxu1  ;;  %v4329_v29 = vrot.slane %v6789_v59, %v8669_v24 }
 0x1f6   : > { %v5513_v14 = vmul.f32 %v4312_v36, %v4312_v36 }
 0x1f7   : > { %v4321_v7 = vcombine.high %v4319_v27, %v4319_v27  ;;  %v4819_v30 = vcombine.low %v4312_v36, %v4320_v18  ;;  %v5514_v51 = vmul.f32 %v4320_v18, %v4320_v18  ;;  %v4336_v35 = vrot.slane %v4322_v12, %v8669_v24 }
 0x1f8   : > { %v4337_v22 = vcombine.high %v4329_v29, %v4329_v29  ;;  %v5515_v13 = vmul.f32 %v4319_v27, %v4319_v27  ;;  %v5517_v28 = vmul.f32 %v4329_v29, %v4329_v29 }
 0x1f9   : > { %v4820_v62 = vcombine.low %v4319_v27, %v4321_v7  ;;  %v5516_v0 = vmul.f32 %v4321_v7, %v4321_v7  ;;  %v5709_v60 = vcombine.low %v5513_v14, %v5514_v51  ;;  %v5519_v11 = vmul.f32 %v4336_v35, %v4336_v35 }
 0x1fa   : > { %v4836_v31 = vcombine.low %v4329_v29, %v4337_v22  ;;  %v5518_v33 = vmul.f32 %v4337_v22, %v4337_v22  ;;  %v4827_v15 = vrot.slane %v4819_v30, %v8669_v24  ;;  %v4850_v43 = vrot.slane %v4336_v35, %v8669_v24 }
 0x1fb   : > { %v4834_v1 = vrot.slane %v4820_v62, %v8669_v24  ;;  %v5710_v53 = vcombine.low %v5515_v13, %v5516_v0  ;;  %v5717_v50 = vrot.slane %v5709_v60, %v8669_v24  ;;  %v5740_v52 = vrot.slane %v5519_v11, %v8669_v24 }
 0x1fc   : > { %v4843_v17 = vrot.slane %v4836_v31, %v8669_v24  ;;  %v5726_v34 = vcombine.low %v5517_v28, %v5518_v33  ;;  %v4338_v40 = vcombine.high %v4336_v35, %v4336_v35 }
 0x1fd   : > { %v4835_v5 = vcombine.low %v4827_v15, %v4834_v1  ;;  %v5724_v45 = vrot.slane %v5710_v53, %v8669_v24 }
 0x1fe   : > { %v4851_v21 = vcombine.low %v4843_v17, %v4850_v43  ;;  %v5733_v6 = vrot.slane %v5726_v34, %v8669_v24  ;;  %v5520_v41 = vmul.f32 %v4338_v40, %v4338_v40 }
 0x1ff   : > { %v6554_v47 = vpack.c.bf16 %v4835_v5, %v4835_v5  ;;  %v5451_v46 = vsel %vm345_vm3, %v4835_v5, 0.0  ;;  %v5725_v63 = vcombine.low %v5717_v50, %v5724_v45 }
 0x200   : > { %v6555_v48 = vpack.c.bf16 %v4851_v21, %v4851_v21  ;;  %v5453_v32 = vsel %vm5452_vm1, %v4851_v21, 0.0  ;;  %v5741_v58 = vcombine.low %v5733_v6, %v5740_v52 }
 0x201   : > { %5422 = vst.msk [vmem:[%s8689_s29] sm:$0xf] %vm5421_vm2, %v6554_v47  ;;  %v6199_v25 = vsel %vm345_vm3, %v5725_v63, 0.0  ;;  %v5454_v37 = vadd.f32 %v5453_v32, %v5451_v46 }
 0x202   : > { %5424 = vst.msk [vmem:[%s8689_s29 + $0x4] sm:$0x7] %vm5423_vm7, %v6555_v48  ;;  %v6200_v9 = vsel %vm5452_vm1, %v5741_v58, 0.0 }
 0x203   : > { %v6201_v26 = vadd.f32 %v6200_v9, %v6199_v25 }
 0x204   : > { %v4161_v49 = vpop.f32.mrb[4].mxu0 }
 0x205   : > { %v6790_v44 = vadd.f32 %v4161_v49, %v8648_v4  ;;  %v6740_v57 = vpop.f32.mrb[5].mxu0 }
 0x206   : > { %v4164_v19 = vpop.f32.mrb[6].mxu0 }
 0x207   : > { %v4339_v2 = vcombine.high %v6790_v44, %v6790_v44  ;;  %v4346_v36 = vrot.slane %v6790_v44, %v8669_v24  ;;  %v6791_v59 = vadd.f32 %v4164_v19, %v8650_v23  ;;  %v6741_v8 = vpop.f32.mrb[7].mxu0 }
 0x209   : > { %v4353_v39 = vrot.slane %v4339_v2, %v8669_v24  ;;  %v4354_v27 = vcombine.high %v4346_v36, %v4346_v36  ;;  %v4852_v18 = vcombine.low %v4338_v40, %v4346_v36  ;;  %v5521_v12 = vmul.f32 %v4346_v36, %v4346_v36 }
 0x20a   : > { %v4356_v29 = vcombine.high %v6791_v59, %v6791_v59  ;;  %v4363_v7 = vrot.slane %v6791_v59, %v8669_v24 }
 0x20b   : > { %v4853_v30 = vcombine.low %v4354_v27, %v4353_v39  ;;  %v5522_v4 = vmul.f32 %v4354_v27, %v4354_v27  ;;  %v5523_v14 = vmul.f32 %v4353_v39, %v4353_v39  ;;  %v5742_v51 = vcombine.low %v5520_v41, %v5521_v12 }
 0x20c   : > { %v4355_v35 = vcombine.high %v4353_v39, %v4353_v39  ;;  %v4370_v22 = vrot.slane %v4356_v29, %v8669_v24  ;;  %v4371_v62 = vcombine.high %v4363_v7, %v4363_v7  ;;  %v4860_v23 = vrot.slane %v4852_v18, %v8669_v24 }
 0x20d   : > { %v4867_v13 = vrot.slane %v4853_v30, %v8669_v24  ;;  %v5743_v0 = vcombine.low %v5522_v4, %v5523_v14  ;;  %v5750_v60 = vrot.slane %v5742_v51, %v8669_v24  ;;  %v5525_v33 = vmul.f32 %v4363_v7, %v4363_v7 }
 0x20e   : > { %v4372_v31 = vcombine.high %v4370_v22, %v4370_v22  ;;  %v4869_v28 = vcombine.low %v4355_v35, %v4363_v7  ;;  %v5524_v1 = vmul.f32 %v4355_v35, %v4355_v35  ;;  %v5526_v53 = vmul.f32 %v4371_v62, %v4371_v62 }
 0x20f   : > { %v4868_v11 = vcombine.low %v4860_v23, %v4867_v13  ;;  %v5757_v15 = vrot.slane %v5743_v0, %v8669_v24  ;;  %v4883_v43 = vrot.slane %v4371_v62, %v8669_v24  ;;  %v5527_v34 = vmul.f32 %v4370_v22, %v4370_v22 }
 0x210   : > { %v4876_v17 = vrot.slane %v4869_v28, %v8669_v24  ;;  %v5528_v5 = vmul.f32 %v4372_v31, %v4372_v31  ;;  %v5759_v6 = vcombine.low %v5524_v1, %v5525_v33  ;;  %v4885_v63 = vcombine.low %v4370_v22, %v4372_v31 }
 0x211   : > { %v6556_v50 = vpack.c.bf16 %v4868_v11, %v4868_v11  ;;  %v5455_v45 = vsel %vm345_vm3, %v4868_v11, 0.0  ;;  %v5758_v21 = vcombine.low %v5750_v60, %v5757_v15  ;;  %v5773_v48 = vrot.slane %v5526_v53, %v8669_v24 }
 0x212   : > { %v4169_v52 = vpop.f32.mrb[8].mxu0  ;;  %v5456_v47 = vadd.f32 %v5455_v45, %v5454_v37  ;;  %v4884_v46 = vcombine.low %v4876_v17, %v4883_v43  ;;  %v5766_v25 = vrot.slane %v5759_v6, %v8669_v24  ;;  %v5775_v9 = vcombine.low %v5527_v34, %v5528_v5 }
 0x213   : > { %v6744_v32 = vpop.f32.mrb[9].mxu0  ;;  %5425 = vst.msk [vmem:[%s8689_s29 + $0x8] sm:$0xf] %vm5421_vm2, %v6556_v50  ;;  %v6202_v58 = vsel %vm345_vm3, %v5758_v21, 0.0  ;;  %v6792_v49 = vadd.f32 %v4169_v52, %v8652_v54  ;;  %v4893_v54 = vrot.slane %v4885_v63, %v8669_v24 }
 0x214   : > { %v4172_v44 = vpop.f32.mrb[10].mxu0  ;;  %v6203_v57 = vadd.f32 %v6202_v58, %v6201_v26  ;;  %v6557_v40 = vpack.c.bf16 %v4884_v46, %v4884_v46  ;;  %v5457_v37 = vsel %vm5452_vm1, %v4884_v46, 0.0  ;;  %v5774_v59 = vcombine.low %v5766_v25, %v5773_v48 }
 0x215   : > { %v6793_v19 = vadd.f32 %v4172_v44, %v8654_v16  ;;  %v6745_v2 = vpop.f32.mrb[11].mxu0  ;;  %v5458_v36 = vadd.f32 %v5457_v37, %v5456_v47  ;;  %v4373_v8 = vcombine.high %v6792_v49, %v6792_v49  ;;  %v4380_v39 = vrot.slane %v6792_v49, %v8669_v24 }
 0x216   : > { %5426 = vst.msk [vmem:[%s8689_s29 + $0xc] sm:$0x7] %vm5423_vm7, %v6557_v40  ;;  %v5783_v26 = vrot.slane %v5775_v9, %v8669_v24  ;;  %v6204_v12 = vsel %vm5452_vm1, %v5774_v59, 0.0 }
 0x217   : > { %v4390_v27 = vcombine.high %v6793_v19, %v6793_v19  ;;  %v4397_v18 = vrot.slane %v6793_v19, %v8669_v24  ;;  %v4387_v41 = vrot.slane %v4373_v8, %v8669_v24  ;;  %v6205_v16 = vadd.f32 %v6204_v12, %v6203_v57 }
 0x218   : > { %v4388_v29 = vcombine.high %v4380_v39, %v4380_v39  ;;  %v5529_v7 = vmul.f32 %v4380_v39, %v4380_v39 }
 0x219   : > { %v4404_v30 = vrot.slane %v4390_v27, %v8669_v24  ;;  %v4389_v4 = vcombine.high %v4387_v41, %v4387_v41  ;;  %v5531_v14 = vmul.f32 %v4387_v41, %v4387_v41  ;;  %v4405_v51 = vcombine.high %v4397_v18, %v4397_v18 }
 0x21a   : > { %v4916_v35 = vrot.slane %v4397_v18, %v8669_v24  ;;  %v4886_v22 = vcombine.low %v4380_v39, %v4388_v29  ;;  %v5530_v62 = vmul.f32 %v4388_v29, %v4388_v29  ;;  %v5533_v23 = vmul.f32 %v4397_v18, %v4397_v18 }
 0x21b   : > { %v5535_v13 = vmul.f32 %v4404_v30, %v4404_v30  ;;  %v4902_v0 = vcombine.low %v4387_v41, %v4389_v4  ;;  %v5532_v60 = vmul.f32 %v4389_v4, %v4389_v4  ;;  %v4918_v31 = vcombine.low %v4405_v51, %v4404_v30 }
 0x21c   : > { %v5534_v28 = vmul.f32 %v4405_v51, %v4405_v51  ;;  %v4900_v33 = vrot.slane %v4886_v22, %v8669_v24  ;;  %v5776_v11 = vcombine.low %v5529_v7, %v5530_v62  ;;  %v5806_v15 = vrot.slane %v5533_v23, %v8669_v24 }
 0x21d   : > { %v4406_v53 = vcombine.high %v4404_v30, %v4404_v30  ;;  %v5792_v17 = vcombine.low %v5531_v14, %v5532_v60  ;;  %v4909_v43 = vrot.slane %v4902_v0, %v8669_v24  ;;  %v4926_v34 = vrot.slane %v4918_v31, %v8669_v24 }
 0x21e   : > { %v4177_v1 = vpop.f32.mrb[12].mxu0  ;;  %v5808_v5 = vcombine.low %v5534_v28, %v5535_v13  ;;  %v4901_v45 = vcombine.low %v4893_v54, %v4900_v33  ;;  %v5790_v21 = vrot.slane %v5776_v11, %v8669_v24 }
 0x21f   : > { %v6748_v50 = vpop.f32.mrb[13].mxu0  ;;  %v6794_v6 = vadd.f32 %v4177_v1, %v8656_v38  ;;  %v5536_v52 = vmul.f32 %v4406_v53, %v4406_v53  ;;  %v4917_v46 = vcombine.low %v4909_v43, %v4916_v35  ;;  %v5799_v63 = vrot.slane %v5792_v17, %v8669_v24 }
 0x220   : > { %v4180_v47 = vpop.f32.mrb[14].mxu0  ;;  %v8740_v48 = vrot.slane %v5808_v5, %v8669_v24  ;;  %v6558_v25 = vpack.c.bf16 %v4901_v45, %v4901_v45  ;;  %v5459_v9 = vsel %vm345_vm3, %v4901_v45, 0.0  ;;  %v5791_v49 = vcombine.low %v5783_v26, %v5790_v21 }
 0x221   : > { %v6795_v32 = vadd.f32 %v4180_v47, %v8658_v61  ;;  %v6749_v58 = vpop.f32.mrb[15].mxu0  ;;  %v4407_v44 = vcombine.high %v6794_v6, %v6794_v6  ;;  %v6559_v57 = vpack.c.bf16 %v4917_v46, %v4917_v46  ;;  %v5460_v38 = vadd.f32 %v5459_v9, %v5458_v36 }
 0x222   : > { %v5461_v40 = vsel %vm5452_vm1, %v4917_v46, 0.0  ;;  %v5807_v37 = vcombine.low %v5799_v63, %v5806_v15  ;;  %5427 = vst.msk [vmem:[%s8689_s29 + $0x10] sm:$0xf] %vm5421_vm2, %v6558_v25  ;;  %v6206_v19 = vsel %vm345_vm3, %v5791_v49, 0.0  ;;  %v4414_v2 = vrot.slane %v6794_v6, %v8669_v24 }
 0x223   : > { %v4421_v59 = vrot.slane %v4407_v44, %v8669_v24  ;;  %v4424_v61 = vcombine.high %v6795_v32, %v6795_v32  ;;  %5428 = vst.msk [vmem:[%s8689_s29 + $0x14] sm:$0x7] %vm5423_vm7, %v6559_v57  ;;  %v5462_v8 = vadd.f32 %v5461_v40, %v5460_v38  ;;  %v6207_v39 = vadd.f32 %v6206_v19, %v6205_v16 }
 0x224   : > { %v6208_v27 = vsel %vm5452_vm1, %v5807_v37, 0.0  ;;  %v4431_v36 = vrot.slane %v6795_v32, %v8669_v24  ;;  %v4422_v18 = vcombine.high %v4414_v2, %v4414_v2  ;;  %v4919_v26 = vcombine.low %v4406_v53, %v4414_v2 }
 0x225   : > { %v4423_v54 = vcombine.high %v4421_v59, %v4421_v59  ;;  %v5537_v12 = vmul.f32 %v4414_v2, %v4414_v2  ;;  %v6209_v41 = vadd.f32 %v6208_v27, %v6207_v39  ;;  %v5539_v29 = vmul.f32 %v4421_v59, %v4421_v59 }
 0x226   : > { %v4438_v7 = vrot.slane %v4424_v61, %v8669_v24  ;;  %v4439_v30 = vcombine.high %v4431_v36, %v4431_v36  ;;  %v4933_v4 = vrot.slane %v4919_v26, %v8669_v24  ;;  %v4935_v14 = vcombine.low %v4422_v18, %v4421_v59 }
 0x227   : > { %v4949_v51 = vrot.slane %v4423_v54, %v8669_v24  ;;  %v5538_v35 = vmul.f32 %v4422_v18, %v4422_v18  ;;  %v5540_v16 = vmul.f32 %v4423_v54, %v4423_v54  ;;  %v5809_v22 = vcombine.low %v5536_v52, %v5537_v12 }
 0x228   : > { %v4440_v62 = vcombine.high %v4438_v7, %v4438_v7  ;;  %v4951_v23 = vcombine.low %v4431_v36, %v4439_v30  ;;  %v4934_v0 = vcombine.low %v4926_v34, %v4933_v4  ;;  %v4942_v60 = vrot.slane %v4935_v14, %v8669_v24 }
 0x229   : > { %v5825_v31 = vcombine.low %v5538_v35, %v5539_v29  ;;  %v5541_v28 = vmul.f32 %v4431_v36, %v4431_v36  ;;  %v5823_v11 = vrot.slane %v5809_v22, %v8669_v24  ;;  %v5839_v15 = vrot.slane %v5540_v16, %v8669_v24 }
 0x22a   : > { %v4185_v13 = vpop.f32.mrb[16].mxu0  ;;  %v4952_v1 = vcombine.low %v4438_v7, %v4440_v62  ;;  %v4959_v53 = vrot.slane %v4951_v23, %v8669_v24  ;;  %v4950_v43 = vcombine.low %v4942_v60, %v4949_v51  ;;  %v6560_v5 = vpack.c.bf16 %v4934_v0, %v4934_v0 }
 0x22b   : > { %v6752_v33 = vpop.f32.mrb[17].mxu0  ;;  %v5463_v50 = vsel %vm345_vm3, %v4934_v0, 0.0  ;;  %v5832_v34 = vrot.slane %v5825_v31, %v8669_v24  ;;  %v5824_v6 = vcombine.low %v8740_v48, %v5823_v11  ;;  %v5542_v47 = vmul.f32 %v4439_v30, %v4439_v30 }
 0x22c   : > { %v4188_v17 = vpop.f32.mrb[18].mxu0  ;;  %v5464_v21 = vadd.f32 %v5463_v50, %v5462_v8  ;;  %v4966_v52 = vrot.slane %v4952_v1, %v8669_v24  ;;  %v6561_v46 = vpack.c.bf16 %v4950_v43, %v4950_v43  ;;  %5429 = vst.msk [vmem:[%s8689_s29 + $0x18] sm:$0xf] %vm5421_vm2, %v6560_v5  ;;  %v5465_v63 = vsel %vm5452_vm1, %v4950_v43, 0.0 }
 0x22d   : > { %v6753_v45 = vpop.f32.mrb[19].mxu0  ;;  %v5840_v32 = vcombine.low %v5832_v34, %v5839_v15  ;;  %v5543_v58 = vmul.f32 %v4438_v7, %v4438_v7  ;;  %v6210_v25 = vsel %vm345_vm3, %v5824_v6, 0.0  ;;  %v5544_v44 = vmul.f32 %v4440_v62, %v4440_v62 }
 0x22e   : > { %v4967_v9 = vcombine.low %v4959_v53, %v4966_v52  ;;  %v5466_v49 = vadd.f32 %v5465_v63, %v5464_v21  ;;  %5430 = vst.msk [vmem:[%s8689_s29 + $0x1c] sm:$0x7] %vm5423_vm7, %v6561_v46  ;;  %v6211_v57 = vadd.f32 %v6210_v25, %v6209_v41  ;;  %v5841_v38 = vcombine.low %v5541_v28, %v5542_v47 }
 0x22f   : > { %v6212_v48 = vsel %vm5452_vm1, %v5840_v32, 0.0  ;;  %v6796_v40 = vadd.f32 %v4185_v13, %v8660_v10  ;;  %v5842_v2 = vcombine.low %v5543_v58, %v5544_v44  ;;  %v6797_v59 = vadd.f32 %v4188_v17, %v8662_v20 }
 0x230   : > { %v6562_v37 = vpack.c.bf16 %v4967_v9, %v4967_v9  ;;  %v5467_v19 = vsel %vm345_vm3, %v4967_v9, 0.0  ;;  %v5849_v8 = vrot.slane %v5841_v38, %v8669_v24  ;;  %v6213_v39 = vadd.f32 %v6212_v48, %v6211_v57 }
 0x231   : > { %v5468_v61 = vadd.f32 %v5467_v19, %v5466_v49  ;;  %v4441_v27 = vcombine.high %v6796_v40, %v6796_v40  ;;  %v5856_v36 = vrot.slane %v5842_v2, %v8669_v24  ;;  %v4448_v18 = vrot.slane %v6796_v40, %v8669_v24 }
 0x232   : > { %5431 = vst.msk [vmem:[%s8689_s29 + $0x20] sm:$0xf] %vm5421_vm2, %v6562_v37  ;;  %v4458_v54 = vcombine.high %v6797_v59, %v6797_v59  ;;  %v4465_v10 = vrot.slane %v6797_v59, %v8669_v24 }
 0x233   : > { %v4455_v26 = vrot.slane %v4441_v27, %v8669_v24  ;;  %v5857_v12 = vcombine.low %v5849_v8, %v5856_v36  ;;  %v4456_v41 = vcombine.high %v4448_v18, %v4448_v18  ;;  %v5545_v29 = vmul.f32 %v4448_v18, %v4448_v18 }
 0x234   : > { %v4472_v20 = vrot.slane %v4458_v54, %v8669_v24  ;;  %v4473_v51 = vcombine.high %v4465_v10, %v4465_v10  ;;  %v5549_v23 = vmul.f32 %v4465_v10, %v4465_v10 }
 0x235   : > { %v4982_v30 = vrot.slane %v4455_v26, %v8669_v24  ;;  %v5547_v4 = vmul.f32 %v4455_v26, %v4455_v26  ;;  %v4457_v14 = vcombine.high %v4455_v26, %v4455_v26  ;;  %v6214_v16 = vsel %vm345_vm3, %v5857_v12, 0.0 }
 0x236   : > { %v4968_v22 = vcombine.low %v4448_v18, %v4456_v41  ;;  %v5546_v62 = vmul.f32 %v4456_v41, %v4456_v41  ;;  %v6215_v0 = vadd.f32 %v6214_v16, %v6213_v39  ;;  %v4985_v28 = vcombine.low %v4473_v51, %v4472_v20 }
 0x237   : > { %v4193_v7 = vpop.f32.mrb[20].mxu0  ;;  %v5872_v60 = vrot.slane %v5547_v4, %v8669_v24  ;;  %v4984_v31 = vcombine.low %v4457_v14, %v4465_v10  ;;  %v5548_v1 = vmul.f32 %v4457_v14, %v4457_v14  ;;  %v5550_v53 = vmul.f32 %v4473_v51, %v4473_v51 }
 0x238   : > { %v6756_v35 = vpop.f32.mrb[21].mxu0  ;;  %v4975_v11 = vrot.slane %v4968_v22, %v8669_v24  ;;  %v5858_v15 = vcombine.low %v5545_v29, %v5546_v62  ;;  %v4999_v43 = vrot.slane %v4985_v28, %v8669_v24  ;;  %v5551_v5 = vmul.f32 %v4472_v20, %v4472_v20 }
 0x239   : > { %v4196_v13 = vpop.f32.mrb[22].mxu0  ;;  %v4992_v17 = vrot.slane %v4984_v31, %v8669_v24  ;;  %v6798_v50 = vadd.f32 %v4193_v7, %v8664_v56  ;;  %v5874_v21 = vcombine.low %v5548_v1, %v5549_v23  ;;  %v4474_v6 = vcombine.high %v4472_v20, %v4472_v20 }
 0x23a   : > { %v6757_v33 = vpop.f32.mrb[23].mxu0  ;;  %v4983_v34 = vcombine.low %v4975_v11, %v4982_v30  ;;  %v5865_v45 = vrot.slane %v5858_v15, %v8669_v24  ;;  %v5875_v47 = vcombine.low %v5550_v53, %v5551_v5  ;;  %v6799_v20 = vadd.f32 %v4196_v13, %v8666_v42 }
 0x23b   : > { %v5000_v52 = vcombine.low %v4992_v17, %v4999_v43  ;;  %v4475_v46 = vcombine.high %v6798_v50, %v6798_v50  ;;  %v4482_v63 = vrot.slane %v6798_v50, %v8669_v24  ;;  %v5882_v9 = vrot.slane %v5874_v21, %v8669_v24 }
 0x23c   : > { %v6563_v32 = vpack.c.bf16 %v4983_v34, %v4983_v34  ;;  %v5469_v58 = vsel %vm5452_vm1, %v4983_v34, 0.0  ;;  %v5873_v25 = vcombine.low %v5865_v45, %v5872_v60  ;;  %v5889_v48 = vrot.slane %v5875_v47, %v8669_v24 }
 0x23d   : > { %v5470_v56 = vadd.f32 %v5469_v58, %v5468_v61  ;;  %v6564_v44 = vpack.c.bf16 %v5000_v52, %v5000_v52  ;;  %v5471_v57 = vsel %vm345_vm3, %v5000_v52, 0.0  ;;  %v4489_v37 = vrot.slane %v4475_v46, %v8669_v24 }
 0x23e   : > { %5432 = vst.msk [vmem:[%s8689_s29 + $0x24] sm:$0x7] %vm5423_vm7, %v6563_v32  ;;  %v6216_v40 = vsel %vm5452_vm1, %v5873_v25, 0.0  ;;  %v4490_v19 = vcombine.high %v4482_v63, %v4482_v63  ;;  %v5001_v2 = vcombine.low %v4474_v6, %v4482_v63  ;;  %v5890_v61 = vcombine.low %v5882_v9, %v5889_v48 }
 0x23f   : > { %v4201_v49 = vpop.f32.mrb[24].mxu0  ;;  %v6217_v8 = vadd.f32 %v6216_v40, %v6215_v0  ;;  %5433 = vst.msk [vmem:[%s8689_s29 + $0x28] sm:$0xf] %vm5421_vm2, %v6564_v44  ;;  %v5472_v39 = vadd.f32 %v5471_v57, %v5470_v56  ;;  %v5552_v27 = vmul.f32 %v4474_v6, %v4474_v6  ;;  %v4491_v18 = vcombine.high %v4489_v37, %v4489_v37 }
 0x240   : > { %v6760_v38 = vpop.f32.mrb[25].mxu0  ;;  %v5008_v54 = vrot.slane %v5001_v2, %v8669_v24  ;;  %v5015_v10 = vrot.slane %v4490_v19, %v8669_v24  ;;  %v5553_v26 = vmul.f32 %v4482_v63, %v4482_v63  ;;  %v6218_v12 = vsel %vm345_vm3, %v5890_v61, 0.0 }
 0x241   : > { %v4204_v59 = vpop.f32.mrb[26].mxu0  ;;  %v5554_v41 = vmul.f32 %v4490_v19, %v4490_v19  ;;  %v5555_v29 = vmul.f32 %v4489_v37, %v4489_v37  ;;  %v6219_v7 = vadd.f32 %v6218_v12, %v6217_v8  ;;  %v5017_v4 = vcombine.low %v4489_v37, %v4491_v18 }
 0x242   : > { %v6761_v36 = vpop.f32.mrb[27].mxu0  ;;  %v5016_v30 = vcombine.low %v5008_v54, %v5015_v10  ;;  %v5556_v14 = vmul.f32 %v4491_v18, %v4491_v18  ;;  %v5891_v51 = vcombine.low %v5552_v27, %v5553_v26  ;;  %v4492_v16 = vcombine.high %v6799_v20, %v6799_v20 }
 0x243   : > { %v5905_v35 = vrot.slane %v5554_v41, %v8669_v24  ;;  %v4499_v22 = vrot.slane %v6799_v20, %v8669_v24  ;;  %v5025_v62 = vrot.slane %v5017_v4, %v8669_v24  ;;  %v6800_v43 = vadd.f32 %v4201_v49, %v8671_v3 }
 0x244   : > { %v6565_v23 = vpack.c.bf16 %v5016_v30, %v5016_v30  ;;  %v5473_v0 = vsel %vm5452_vm1, %v5016_v30, 0.0  ;;  %v5907_v60 = vcombine.low %v5555_v29, %v5556_v14  ;;  %v5898_v28 = vrot.slane %v5891_v51, %v8669_v24 }
 0x245   : > { %v5474_v13 = vadd.f32 %v5473_v0, %v5472_v39  ;;  %v4506_v33 = vrot.slane %v4492_v16, %v8669_v24  ;;  %v4507_v11 = vcombine.high %v4499_v22, %v4499_v22  ;;  %v5557_v17 = vmul.f32 %v4499_v22, %v4499_v22 }
 0x246   : > { %5434 = vst.msk [vmem:[%s8689_s29 + $0x2c] sm:$0x7] %vm5423_vm7, %v6565_v23  ;;  %v5915_v53 = vrot.slane %v5907_v60, %v8669_v24  ;;  %v6801_v5 = vadd.f32 %v4204_v59, %v8674_v55  ;;  %v5906_v45 = vcombine.low %v5898_v28, %v5905_v35  ;;  %v4509_v32 = vcombine.high %v6800_v43, %v6800_v43 }
 0x247   : > { %v8810_v31 = vpop.f32.mrb[28].mxu1  ;;  %v8812_v42 = vpop.f32.mrb[28].mxu0  ;;  %v4508_v21 = vcombine.high %v4506_v33, %v4506_v33  ;;  %v5018_v6 = vcombine.low %v4499_v22, %v4507_v11  ;;  %v5558_v52 = vmul.f32 %v4507_v11, %v4507_v11  ;;  %v5559_v63 = vmul.f32 %v4506_v33, %v4506_v33 }
 0x248   : > { %v6710_v15 = vpop.f32.mrb[29].mxu1  ;;  %v6764_v1 = vpop.f32.mrb[29].mxu0  ;;  %v4516_v58 = vrot.slane %v6800_v43, %v8669_v24  ;;  %v4526_v25 = vcombine.high %v6801_v5, %v6801_v5  ;;  %v6220_v9 = vsel %vm5452_vm1, %v5906_v45, 0.0  ;;  %v4523_v57 = vrot.slane %v4509_v32, %v8669_v24 }
 0x249   : > { %v8821_v50 = vpop.f32.mrb[30].mxu1  ;;  %v8823_v34 = vpop.f32.mrb[30].mxu0  ;;  %v5032_v3 = vrot.slane %v5018_v6, %v8669_v24  ;;  %v5034_v55 = vcombine.low %v4506_v33, %v4508_v21  ;;  %v5560_v49 = vmul.f32 %v4508_v21, %v4508_v21  ;;  %v6221_v56 = vadd.f32 %v6220_v9, %v6219_v7 }
 0x24a   : > { %v6711_v47 = vpop.f32.mrb[31].mxu1  ;;  %v6765_v46 = vpop.f32.mrb[31].mxu0  ;;  %v5908_v44 = vcombine.low %v5557_v17, %v5558_v52  ;;  %v4524_v48 = vcombine.high %v4516_v58, %v4516_v58  ;;  %v5048_v19 = vrot.slane %v4516_v58, %v8669_v24  ;;  %v5561_v8 = vmul.f32 %v4516_v58, %v4516_v58 }
 0x24b   : > { %v5033_v38 = vcombine.low %v5025_v62, %v5032_v3  ;;  %v5924_v40 = vcombine.low %v5559_v63, %v5560_v49  ;;  %v5041_v37 = vrot.slane %v5034_v55, %v8669_v24  ;;  %v5563_v10 = vmul.f32 %v4523_v57, %v4523_v57 }
 0x24c   : > { %v5922_v2 = vrot.slane %v5908_v44, %v8669_v24  ;;  %v5050_v59 = vcombine.low %v4524_v48, %v4523_v57  ;;  %v5562_v39 = vmul.f32 %v4524_v48, %v4524_v48  ;;  %v5938_v35 = vrot.slane %v5561_v8, %v8669_v24 }
 0x24d   : > { %v6566_v36 = vpack.c.bf16 %v5033_v38, %v5033_v38  ;;  %v5475_v18 = vsel %vm345_vm3, %v5033_v38, 0.0  ;;  %v5049_v54 = vcombine.low %v5041_v37, %v5048_v19  ;;  %v5931_v7 = vrot.slane %v5924_v40, %v8669_v24 }
 0x24e   : > { %v5923_v41 = vcombine.low %v5915_v53, %v5922_v2  ;;  %v5058_v29 = vrot.slane %v5050_v59, %v8669_v24  ;;  %v5476_v20 = vadd.f32 %v5475_v18, %v5474_v13  ;;  %v5940_v16 = vcombine.low %v5562_v39, %v5563_v10 }
 0x24f   : > { %v8832_v61 = vpop.f32.mrb[32].mxu1  ;;  %v8834_v27 = vpop.f32.mrb[32].mxu0  ;;  %5435 = vst.msk [vmem:[%s8689_s29 + $0x30] sm:$0xf] %vm5421_vm2, %v6566_v36  ;;  %v6567_v14 = vpack.c.bf16 %v5049_v54, %v5049_v54  ;;  %v5477_v51 = vsel %vm5452_vm1, %v5049_v54, 0.0  ;;  %v4525_v60 = vcombine.high %v4523_v57, %v4523_v57  ;;  %v4533_v13 = vrot.slane %v6801_v5, %v8669_v24 }
 0x250   : > { %v6714_v26 = vpop.f32.mrb[33].mxu1  ;;  %v6768_v12 = vpop.f32.mrb[33].mxu0  ;;  %v6222_v23 = vsel %vm345_vm3, %v5923_v41, 0.0  ;;  %v5478_v0 = vadd.f32 %v5477_v51, %v5476_v20  ;;  %v5939_v28 = vcombine.low %v5931_v7, %v5938_v35  ;;  %v5948_v33 = vrot.slane %v5940_v16, %v8669_v24 }
 0x251   : > { %v8839_v30 = vpop.f32.mrb[34].mxu1  ;;  %v8841_v4 = vpop.f32.mrb[34].mxu0  ;;  %5436 = vst.msk [vmem:[%s8689_s29 + $0x34] sm:$0x7] %vm5423_vm7, %v6567_v14  ;;  %v6223_v11 = vadd.f32 %v6222_v23, %v6221_v56  ;;  %v4540_v15 = vrot.slane %v4526_v25, %v8669_v24  ;;  %v4541_v1 = vcombine.high %v4533_v13, %v4533_v13  ;;  %v5051_v53 = vcombine.low %v4525_v60, %v4533_v13 }
 0x252   : > { %v6715_v22 = vpop.f32.mrb[35].mxu1  ;;  %v6769_v62 = vpop.f32.mrb[35].mxu0  ;;  %v5564_v17 = vmul.f32 %v4525_v60, %v4525_v60  ;;  %v5565_v43 = vmul.f32 %v4533_v13, %v4533_v13  ;;  %v6224_v45 = vsel %vm5452_vm1, %v5939_v28, 0.0  ;;  %v6802_v52 = vadd.f32 %v8812_v42, %v8810_v31 }
 0x253   : > { %v4542_v21 = vcombine.high %v4540_v15, %v4540_v15  ;;  %v5567_v6 = vmul.f32 %v4540_v15, %v4540_v15  ;;  %v6225_v5 = vadd.f32 %v6224_v45, %v6223_v11  ;;  %v5065_v47 = vrot.slane %v5051_v53, %v8669_v24 }
 0x254   : > { %v5067_v46 = vcombine.low %v4541_v1, %v4540_v15  ;;  %v5566_v63 = vmul.f32 %v4541_v1, %v4541_v1  ;;  %v5941_v3 = vcombine.low %v5564_v17, %v5565_v43  ;;  %v4543_v55 = vcombine.high %v6802_v52, %v6802_v52 }
 0x255   : > { %v5081_v25 = vrot.slane %v4542_v21, %v8669_v24  ;;  %v5568_v9 = vmul.f32 %v4542_v21, %v4542_v21  ;;  %v5066_v44 = vcombine.low %v5058_v29, %v5065_v47  ;;  %v4550_v42 = vrot.slane %v6802_v52, %v8669_v24 }
 0x256   : > { %v5074_v57 = vrot.slane %v5067_v46, %v8669_v24  ;;  %v5957_v31 = vcombine.low %v5566_v63, %v5567_v6  ;;  %v5955_v40 = vrot.slane %v5941_v3, %v8669_v24  ;;  %v4557_v19 = vrot.slane %v4543_v55, %v8669_v24 }
 0x257   : > { %v8857_v32 = vpop.f32.mrb[36].mxu1  ;;  %v8859_v58 = vpop.f32.mrb[36].mxu0  ;;  %v5971_v37 = vrot.slane %v5568_v9, %v8669_v24  ;;  %v6803_v2 = vadd.f32 %v8823_v34, %v8821_v50  ;;  %v6568_v36 = vpack.c.bf16 %v5066_v44, %v5066_v44  ;;  %v5479_v18 = vsel %vm345_vm3, %v5066_v44, 0.0 }
 0x258   : > { %v6718_v49 = vpop.f32.mrb[37].mxu1  ;;  %v6772_v56 = vpop.f32.mrb[37].mxu0  ;;  %v5082_v39 = vcombine.low %v5074_v57, %v5081_v25  ;;  %v5964_v54 = vrot.slane %v5957_v31, %v8669_v24  ;;  %v5480_v10 = vadd.f32 %v5479_v18, %v5478_v0  ;;  %v5956_v26 = vcombine.low %v5948_v33, %v5955_v40 }
 0x259   : > { %v8864_v48 = vpop.f32.mrb[38].mxu1  ;;  %v8866_v38 = vpop.f32.mrb[38].mxu0  ;;  %v4558_v12 = vcombine.high %v4550_v42, %v4550_v42  ;;  %v4559_v41 = vcombine.high %v4557_v19, %v4557_v19  ;;  %5437 = vst.msk [vmem:[%s8689_s29 + $0x38] sm:$0xf] %vm5421_vm2, %v6568_v36  ;;  %v5569_v50 = vmul.f32 %v4550_v42, %v4550_v42  ;;  %v5571_v23 = vmul.f32 %v4557_v19, %v4557_v19 }
 0x25a   : > { %v6719_v59 = vpop.f32.mrb[39].mxu1  ;;  %v6773_v8 = vpop.f32.mrb[39].mxu0  ;;  %v6569_v29 = vpack.c.bf16 %v5082_v39, %v5082_v39  ;;  %v5481_v20 = vsel %vm5452_vm1, %v5082_v39, 0.0  ;;  %v5972_v7 = vcombine.low %v5964_v54, %v5971_v37  ;;  %v6226_v34 = vsel %vm345_vm3, %v5956_v26, 0.0 }
 0x25b   : > { %v5083_v14 = vcombine.low %v4550_v42, %v4558_v12  ;;  %v5084_v51 = vcombine.low %v4557_v19, %v4559_v41  ;;  %v5482_v35 = vadd.f32 %v5481_v20, %v5480_v10  ;;  %v6227_v16 = vadd.f32 %v6226_v34, %v6225_v5 }
 0x25c   : > { %5438 = vst.msk [vmem:[%s8689_s29 + $0x3c] sm:$0x7] %vm5423_vm7, %v6569_v29  ;;  %v6228_v22 = vsel %vm5452_vm1, %v5972_v7, 0.0  ;;  %v5570_v62 = vmul.f32 %v4558_v12, %v4558_v12  ;;  %v5572_v33 = vmul.f32 %v4559_v41, %v4559_v41  ;;  %v4560_v11 = vcombine.high %v6803_v2, %v6803_v2 }
 0x25d   : > { %v5091_v13 = vrot.slane %v5083_v14, %v8669_v24  ;;  %v5098_v28 = vrot.slane %v5084_v51, %v8669_v24  ;;  %v6229_v17 = vadd.f32 %v6228_v22, %v6227_v16  ;;  %v4567_v43 = vrot.slane %v6803_v2, %v8669_v24 }
 0x25e   : > { %v5973_v53 = vcombine.low %v5569_v50, %v5570_v62  ;;  %v6804_v45 = vadd.f32 %v8834_v27, %v8832_v61  ;;  %v5974_v5 = vcombine.low %v5571_v23, %v5572_v33  ;;  %v4574_v47 = vrot.slane %v4560_v11, %v8669_v24 }
 0x25f   : > { %v8882_v0 = vpop.f32.mrb[40].mxu1  ;;  %v8884_v60 = vpop.f32.mrb[40].mxu0  ;;  %v5099_v52 = vcombine.low %v5091_v13, %v5098_v28  ;;  %v6805_v46 = vadd.f32 %v8841_v4, %v8839_v30  ;;  %v4575_v3 = vcombine.high %v4567_v43, %v4567_v43  ;;  %v5573_v55 = vmul.f32 %v4567_v43, %v4567_v43 }
 0x260   : > { %v6722_v15 = vpop.f32.mrb[41].mxu1  ;;  %v6776_v1 = vpop.f32.mrb[41].mxu0  ;;  %v5981_v9 = vrot.slane %v5973_v53, %v8669_v24  ;;  %v4577_v49 = vcombine.high %v6804_v45, %v6804_v45  ;;  %v5988_v56 = vrot.slane %v5974_v5, %v8669_v24  ;;  %v5114_v44 = vrot.slane %v4574_v47, %v8669_v24 }
 0x261   : > { %v8891_v21 = vpop.f32.mrb[42].mxu1  ;;  %v8893_v6 = vpop.f32.mrb[42].mxu0  ;;  %v6570_v61 = vpack.c.bf16 %v5099_v52, %v5099_v52  ;;  %v5483_v27 = vsel %vm345_vm3, %v5099_v52, 0.0  ;;  %v5100_v31 = vcombine.low %v4567_v43, %v4575_v3  ;;  %v5574_v42 = vmul.f32 %v4575_v3, %v4575_v3 }
 0x262   : > { %v6723_v63 = vpop.f32.mrb[43].mxu1  ;;  %v6777_v25 = vpop.f32.mrb[43].mxu0  ;;  %v5484_v57 = vadd.f32 %v5483_v27, %v5482_v35  ;;  %v5575_v40 = vmul.f32 %v4574_v47, %v4574_v47  ;;  %v5989_v30 = vcombine.low %v5981_v9, %v5988_v56  ;;  %v4576_v4 = vcombine.high %v4574_v47, %v4574_v47 }
 0x263   : > { %5439 = vst.msk [vmem:[%s8689_s29 + $0x40] sm:$0xf] %vm5421_vm2, %v6570_v61  ;;  %v4584_v37 = vrot.slane %v6804_v45, %v8669_v24  ;;  %v4591_v19 = vrot.slane %v4577_v49, %v8669_v24  ;;  %v5107_v2 = vrot.slane %v5100_v31, %v8669_v24  ;;  %v5990_v59 = vcombine.low %v5573_v55, %v5574_v42 }
 0x264   : > { %v6004_v8 = vrot.slane %v5575_v40, %v8669_v24  ;;  %v4594_v39 = vcombine.high %v6805_v46, %v6805_v46  ;;  %v6230_v54 = vsel %vm345_vm3, %v5989_v30, 0.0  ;;  %v5576_v12 = vmul.f32 %v4576_v4, %v4576_v4 }
 0x265   : > { %v4592_v10 = vcombine.high %v4584_v37, %v4584_v37  ;;  %v5116_v26 = vcombine.low %v4576_v4, %v4584_v37  ;;  %v6231_v20 = vadd.f32 %v6230_v54, %v6229_v17  ;;  %v5115_v7 = vcombine.low %v5107_v2, %v5114_v44 }
 0x266   : > { %v5997_v50 = vrot.slane %v5990_v59, %v8669_v24  ;;  %v5577_v34 = vmul.f32 %v4584_v37, %v4584_v37  ;;  %v5579_v62 = vmul.f32 %v4591_v19, %v4591_v19  ;;  %v4593_v43 = vcombine.high %v4591_v19, %v4591_v19 }
 0x267   : > { %v8908_v36 = vpop.f32.mrb[44].mxu1  ;;  %v8910_v18 = vpop.f32.mrb[44].mxu0  ;;  %v5117_v35 = vcombine.low %v4592_v10, %v4591_v19  ;;  %v5124_v16 = vrot.slane %v5116_v26, %v8669_v24  ;;  %v5578_v22 = vmul.f32 %v4592_v10, %v4592_v10  ;;  %v6571_v28 = vpack.c.bf16 %v5115_v7, %v5115_v7 }
 0x268   : > { %v6726_v41 = vpop.f32.mrb[45].mxu1  ;;  %v6780_v29 = vpop.f32.mrb[45].mxu0  ;;  %v5485_v33 = vsel %vm5452_vm1, %v5115_v7, 0.0  ;;  %v6005_v11 = vcombine.low %v5997_v50, %v6004_v8  ;;  %v6006_v15 = vcombine.low %v5576_v12, %v5577_v34  ;;  %v4601_v5 = vrot.slane %v6805_v46, %v8669_v24 }
 0x269   : > { %v8914_v14 = vpop.f32.mrb[46].mxu1  ;;  %v8916_v51 = vpop.f32.mrb[46].mxu0  ;;  %v5486_v1 = vadd.f32 %v5485_v33, %v5484_v57  ;;  %v5131_v53 = vrot.slane %v5117_v35, %v8669_v24  ;;  %v6007_v17 = vcombine.low %v5578_v22, %v5579_v62  ;;  %5440 = vst.msk [vmem:[%s8689_s29 + $0x44] sm:$0x7] %vm5423_vm7, %v6571_v28  ;;  %v4608_v47 = vrot.slane %v4594_v39, %v8669_v24 }
 0x26a   : > { %v6727_v23 = vpop.f32.mrb[47].mxu1  ;;  %v6781_v13 = vpop.f32.mrb[47].mxu0  ;;  %v6232_v45 = vsel %vm5452_vm1, %v6005_v11, 0.0  ;;  %v6014_v52 = vrot.slane %v6006_v15, %v8669_v24  ;;  %v5580_v3 = vmul.f32 %v4593_v43, %v4593_v43  ;;  %v4609_v55 = vcombine.high %v4601_v5, %v4601_v5 }
 0x26b   : > { %v6233_v63 = vadd.f32 %v6232_v45, %v6231_v20  ;;  %v5132_v25 = vcombine.low %v5124_v16, %v5131_v53  ;;  %v6021_v9 = vrot.slane %v6007_v17, %v8669_v24  ;;  %v4610_v49 = vcombine.high %v4608_v47, %v4608_v47 }
 0x26c   : > { %v5133_v61 = vcombine.low %v4593_v43, %v4601_v5  ;;  %v5581_v27 = vmul.f32 %v4601_v5, %v4601_v5  ;;  %v5583_v42 = vmul.f32 %v4608_v47, %v4608_v47  ;;  %v5147_v19 = vrot.slane %v4609_v55, %v8669_v24 }
 0x26d   : > { %v6572_v57 = vpack.c.bf16 %v5132_v25, %v5132_v25  ;;  %v5487_v31 = vsel %vm345_vm3, %v5132_v25, 0.0  ;;  %v6022_v46 = vcombine.low %v6014_v52, %v6021_v9  ;;  %v5149_v2 = vcombine.low %v4608_v47, %v4610_v49 }
 0x26e   : > { %v5488_v4 = vadd.f32 %v5487_v31, %v5486_v1  ;;  %v5140_v37 = vrot.slane %v5133_v61, %v8669_v24  ;;  %v5582_v54 = vmul.f32 %v4609_v55, %v4609_v55  ;;  %v5584_v10 = vmul.f32 %v4610_v49, %v4610_v49 }
 0x26f   : > { %v8928_v56 = vpop.f32.mrb[48].mxu1  ;;  %v8930_v44 = vpop.f32.mrb[48].mxu0  ;;  %5441 = vst.msk [vmem:[%s8689_s29 + $0x48] sm:$0xf] %vm5421_vm2, %v6572_v57  ;;  %v6234_v39 = vsel %vm345_vm3, %v6022_v46, 0.0  ;;  %v6023_v26 = vcombine.low %v5580_v3, %v5581_v27  ;;  %v5157_v7 = vrot.slane %v5149_v2, %v8669_v24  ;;  %v6806_v50 = vadd.f32 %v8859_v58, %v8857_v32 }
 0x270   : > { %v6730_v40 = vpop.f32.mrb[49].mxu1  ;;  %v6784_v30 = vpop.f32.mrb[49].mxu0  ;;  %v6235_v29 = vadd.f32 %v6234_v39, %v6233_v63  ;;  %v5148_v20 = vcombine.low %v5140_v37, %v5147_v19  ;;  %v6037_v35 = vrot.slane %v5582_v54, %v8669_v24  ;;  %v6039_v16 = vcombine.low %v5583_v42, %v5584_v10 }
 0x271   : > { %v3463_v59 = vpop.f32.mrb[50].mxu1  ;;  %v4252_v8 = vpop.f32.mrb[50].mxu0  ;;  %v6030_v34 = vrot.slane %v6023_v26, %v8669_v24  ;;  %v6807_v22 = vadd.f32 %v8866_v38, %v8864_v48  ;;  %v4611_v13 = vcombine.high %v6806_v50, %v6806_v50  ;;  %v4618_v28 = vrot.slane %v6806_v50, %v8669_v24 }
 0x272   : > { %v6731_v12 = vpop.f32.mrb[51].mxu1  ;;  %v6785_v41 = vpop.f32.mrb[51].mxu0  ;;  %v6573_v62 = vpack.c.bf16 %v5148_v20, %v5148_v20  ;;  %v5489_v23 = vsel %vm5452_vm1, %v5148_v20, 0.0  ;;  %v6047_v15 = vrot.slane %v6039_v16, %v8669_v24  ;;  %v6808_v43 = vadd.f32 %v8884_v60, %v8882_v0 }
 0x273   : > { %v5490_v33 = vadd.f32 %v5489_v23, %v5488_v4  ;;  %v6038_v11 = vcombine.low %v6030_v34, %v6037_v35  ;;  %v4628_v1 = vcombine.high %v6807_v22, %v6807_v22  ;;  %v4625_v32 = vrot.slane %v4611_v13, %v8669_v24 }
 0x274   : > { %5442 = vst.msk [vmem:[%s8689_s29 + $0x4c] sm:$0x7] %vm5423_vm7, %v6573_v62  ;;  %v4626_v58 = vcombine.high %v4618_v28, %v4618_v28  ;;  %v5585_v53 = vmul.f32 %v4618_v28, %v4618_v28  ;;  %v4635_v17 = vrot.slane %v6807_v22, %v8669_v24  ;;  %v8958_v45 = vadd.f32 %v8893_v6, %v8891_v21 }
 0x275   : > { %v6236_v48 = vsel %vm5452_vm1, %v6038_v11, 0.0  ;;  %v4642_v38 = vrot.slane %v4628_v1, %v8669_v24  ;;  %v4627_v5 = vcombine.high %v4625_v32, %v4625_v32  ;;  %v5587_v25 = vmul.f32 %v4625_v32, %v4625_v32 }
 0x276   : > { %v6237_v52 = vadd.f32 %v6236_v48, %v6235_v29  ;;  %v5150_v47 = vcombine.low %v4618_v28, %v4626_v58  ;;  %v5586_v63 = vmul.f32 %v4626_v58, %v4626_v58  ;;  %v4643_v9 = vcombine.high %v4635_v17, %v4635_v17 }
 0x277   : > { %v5180_v3 = vrot.slane %v4635_v17, %v8669_v24  ;;  %v5589_v55 = vmul.f32 %v4635_v17, %v4635_v17  ;;  %v5166_v61 = vcombine.low %v4625_v32, %v4627_v5  ;;  %v5588_v27 = vmul.f32 %v4627_v5, %v4627_v5 }
 0x278   : > { %v5164_v49 = vrot.slane %v5150_v47, %v8669_v24  ;;  %v6040_v57 = vcombine.low %v5585_v53, %v5586_v63  ;;  %v5182_v31 = vcombine.low %v4643_v9, %v4642_v38  ;;  %v5590_v0 = vmul.f32 %v4643_v9, %v4643_v9 }
 0x279   : > { %v5591_v60 = vmul.f32 %v4642_v38, %v4642_v38  ;;  %v6070_v21 = vrot.slane %v5589_v55, %v8669_v24  ;;  %v6056_v42 = vcombine.low %v5587_v25, %v5588_v27  ;;  %v5173_v40 = vrot.slane %v5166_v61, %v8669_v24 }
 0x27a   : > { %v5165_v6 = vcombine.low %v5157_v7, %v5164_v49  ;;  %v6054_v46 = vrot.slane %v6040_v57, %v8669_v24  ;;  %v5190_v30 = vrot.slane %v5182_v31, %v8669_v24  ;;  %v4644_v37 = vcombine.high %v4642_v38, %v4642_v38 }
 0x27b   : > { %v6072_v4 = vcombine.low %v5590_v0, %v5591_v60  ;;  %v4645_v19 = vcombine.high %v6808_v43, %v6808_v43  ;;  %v5181_v39 = vcombine.low %v5173_v40, %v5180_v3  ;;  %v6063_v10 = vrot.slane %v6056_v42, %v8669_v24 }
 0x27c   : > { %v6574_v2 = vpack.c.bf16 %v5165_v6, %v5165_v6  ;;  %v5491_v59 = vsel %vm345_vm3, %v5165_v6, 0.0  ;;  %v6055_v8 = vcombine.low %v6047_v15, %v6054_v46  ;;  %v4652_v12 = vrot.slane %v6808_v43, %v8669_v24 }
 0x27d   : > { %v5492_v54 = vadd.f32 %v5491_v59, %v5490_v33  ;;  %v6080_v26 = vrot.slane %v6072_v4, %v8669_v24  ;;  %v6575_v29 = vpack.c.bf16 %v5181_v39, %v5181_v39  ;;  %v5493_v20 = vsel %vm5452_vm1, %v5181_v39, 0.0 }
 0x27e   : > { %5443 = vst.msk [vmem:[%s8689_s29 + $0x50] sm:$0xf] %vm5421_vm2, %v6574_v2  ;;  %v6238_v41 = vsel %vm345_vm3, %v6055_v8, 0.0  ;;  %v4659_v7 = vrot.slane %v4645_v19, %v8669_v24  ;;  %v6071_v34 = vcombine.low %v6063_v10, %v6070_v21  ;;  %v4660_v16 = vcombine.high %v4652_v12, %v4652_v12 }
 0x27f   : > { %v5494_v50 = vadd.f32 %v5493_v20, %v5492_v54  ;;  %v6239_v35 = vadd.f32 %v6238_v41, %v6237_v52  ;;  %5444 = vst.msk [vmem:[%s8689_s29 + $0x54] sm:$0x7] %vm5423_vm7, %v6575_v29  ;;  %v5183_v62 = vcombine.low %v4644_v37, %v4652_v12  ;;  %v5592_v23 = vmul.f32 %v4644_v37, %v4644_v37 }
 0x280   : > { %v4661_v22 = vcombine.high %v4659_v7, %v4659_v7  ;;  %v5593_v13 = vmul.f32 %v4652_v12, %v4652_v12  ;;  %v6240_v28 = vsel %vm5452_vm1, %v6071_v34, 0.0  ;;  %v5199_v33 = vcombine.low %v4660_v16, %v4659_v7 }
 0x281   : > { %v5594_v11 = vmul.f32 %v4660_v16, %v4660_v16  ;;  %v5595_v15 = vmul.f32 %v4659_v7, %v4659_v7  ;;  %v6241_v1 = vadd.f32 %v6240_v28, %v6239_v35  ;;  %v5197_v32 = vrot.slane %v5183_v62, %v8669_v24 }
 0x282   : > { %v5213_v58 = vrot.slane %v4661_v22, %v8669_v24  ;;  %v5596_v53 = vmul.f32 %v4661_v22, %v4661_v22  ;;  %v5206_v17 = vrot.slane %v5199_v33, %v8669_v24  ;;  %v6073_v48 = vcombine.low %v5592_v23, %v5593_v13 }
 0x283   : > { %v6089_v38 = vcombine.low %v5594_v11, %v5595_v15  ;;  %v4662_v43 = vcombine.high %v8958_v45, %v8958_v45  ;;  %v5198_v52 = vcombine.low %v5190_v30, %v5197_v32  ;;  %v4669_v47 = vrot.slane %v8958_v45, %v8669_v24 }
 0x284   : > { %v6103_v5 = vrot.slane %v5596_v53, %v8669_v24  ;;  %v6810_v63 = vadd.f32 %v8910_v18, %v8908_v36  ;;  %v5214_v25 = vcombine.low %v5206_v17, %v5213_v58  ;;  %v6087_v9 = vrot.slane %v6073_v48, %v8669_v24 }
 0x285   : > { %v6096_v3 = vrot.slane %v6089_v38, %v8669_v24  ;;  %v4676_v55 = vrot.slane %v4662_v43, %v8669_v24  ;;  %v6576_v49 = vpack.c.bf16 %v5198_v52, %v5198_v52  ;;  %v5495_v61 = vsel %vm345_vm3, %v5198_v52, 0.0 }
 0x286   : > { %v4677_v27 = vcombine.high %v4669_v47, %v4669_v47  ;;  %v5597_v57 = vmul.f32 %v4669_v47, %v4669_v47  ;;  %v6577_v31 = vpack.c.bf16 %v5214_v25, %v5214_v25  ;;  %v5496_v0 = vadd.f32 %v5495_v61, %v5494_v50 }
 0x287   : > { %v5497_v45 = vsel %vm5452_vm1, %v5214_v25, 0.0  ;;  %v6088_v60 = vcombine.low %v6080_v26, %v6087_v9  ;;  %5445 = vst.msk [vmem:[%s8689_s29 + $0x58] sm:$0xf] %vm5421_vm2, %v6576_v49  ;;  %v6104_v36 = vcombine.low %v6096_v3, %v6103_v5  ;;  %v4678_v18 = vcombine.high %v4676_v55, %v4676_v55 }
 0x288   : > { %v5215_v21 = vcombine.low %v4669_v47, %v4677_v27  ;;  %v5598_v6 = vmul.f32 %v4677_v27, %v4677_v27  ;;  %5446 = vst.msk [vmem:[%s8689_s29 + $0x5c] sm:$0x7] %vm5423_vm7, %v6577_v31  ;;  %v5498_v42 = vadd.f32 %v5497_v45, %v5496_v0  ;;  %v5599_v40 = vmul.f32 %v4676_v55, %v4676_v55 }
 0x289   : > { %v6242_v46 = vsel %vm345_vm3, %v6088_v60, 0.0  ;;  %v4679_v30 = vcombine.high %v6810_v63, %v6810_v63  ;;  %v6244_v37 = vsel %vm5452_vm1, %v6104_v36, 0.0  ;;  %v5216_v19 = vcombine.low %v4676_v55, %v4678_v18 }
 0x28a   : > { %v6243_v4 = vadd.f32 %v6242_v46, %v6241_v1  ;;  %v5223_v2 = vrot.slane %v5215_v21, %v8669_v24  ;;  %v5600_v59 = vmul.f32 %v4678_v18, %v4678_v18  ;;  %v6105_v8 = vcombine.low %v5597_v57, %v5598_v6 }
 0x28b   : > { %v4686_v39 = vrot.slane %v6810_v63, %v8669_v24  ;;  %v4693_v54 = vrot.slane %v4679_v30, %v8669_v24  ;;  %v5230_v10 = vrot.slane %v5216_v19, %v8669_v24  ;;  %v6811_v12 = vadd.f32 %v8916_v51, %v8914_v14 }
 0x28c   : > { %v6245_v26 = vadd.f32 %v6244_v37, %v6243_v4  ;;  %v6812_v41 = vadd.f32 %v8930_v44, %v8928_v56  ;;  %v6106_v29 = vcombine.low %v5599_v40, %v5600_v59  ;;  %v6113_v20 = vrot.slane %v6105_v8, %v8669_v24 }
 0x28d   : > { %v4694_v7 = vcombine.high %v4686_v39, %v4686_v39  ;;  %v5246_v50 = vrot.slane %v4693_v54, %v8669_v24  ;;  %v5231_v34 = vcombine.low %v5223_v2, %v5230_v10  ;;  %v5601_v35 = vmul.f32 %v4686_v39, %v4686_v39 }
 0x28e   : > { %v5603_v16 = vmul.f32 %v4693_v54, %v4693_v54  ;;  %v4695_v22 = vcombine.high %v4693_v54, %v4693_v54  ;;  %v6120_v62 = vrot.slane %v6106_v29, %v8669_v24  ;;  %v4696_v28 = vcombine.high %v6811_v12, %v6811_v12 }
 0x28f   : > { %v5232_v23 = vcombine.low %v4686_v39, %v4694_v7  ;;  %v5602_v13 = vmul.f32 %v4694_v7, %v4694_v7  ;;  %v6578_v14 = vpack.c.bf16 %v5231_v34, %v5231_v34  ;;  %v5499_v51 = vsel %vm345_vm3, %v5231_v34, 0.0 }
 0x290   : > { %v6136_v56 = vrot.slane %v5603_v16, %v8669_v24  ;;  %v4703_v44 = vrot.slane %v6811_v12, %v8669_v24  ;;  %v5500_v33 = vadd.f32 %v5499_v51, %v5498_v42  ;;  %v6121_v11 = vcombine.low %v6113_v20, %v6120_v62 }
 0x291   : > { %v5239_v15 = vrot.slane %v5232_v23, %v8669_v24  ;;  %v6122_v1 = vcombine.low %v5601_v35, %v5602_v13  ;;  %5447 = vst.msk [vmem:[%s8689_s29 + $0x60] sm:$0xf] %vm5421_vm2, %v6578_v14  ;;  %v4710_v32 = vrot.slane %v4696_v28, %v8669_v24  ;;  %v5604_v17 = vmul.f32 %v4695_v22, %v4695_v22 }
 0x292   : > { %v4711_v58 = vcombine.high %v4703_v44, %v4703_v44  ;;  %v5248_v53 = vcombine.low %v4695_v22, %v4703_v44  ;;  %v6246_v48 = vsel %vm345_vm3, %v6121_v11, 0.0  ;;  %v5605_v52 = vmul.f32 %v4703_v44, %v4703_v44 }
 0x293   : > { %v5247_v38 = vcombine.low %v5239_v15, %v5246_v50  ;;  %v6129_v43 = vrot.slane %v6122_v1, %v8669_v24  ;;  %v6247_v5 = vadd.f32 %v6246_v48, %v6245_v26  ;;  %v5607_v49 = vmul.f32 %v4710_v32, %v4710_v32 }
 0x294   : > { %v5249_v47 = vcombine.low %v4711_v58, %v4710_v32  ;;  %v5256_v63 = vrot.slane %v5248_v53, %v8669_v24  ;;  %v5606_v25 = vmul.f32 %v4711_v58, %v4711_v58  ;;  %v6138_v57 = vcombine.low %v5604_v17, %v5605_v52 }
 0x295   : > { %v6579_v9 = vpack.c.bf16 %v5247_v38, %v5247_v38  ;;  %v5501_v3 = vsel %vm5452_vm1, %v5247_v38, 0.0  ;;  %v6137_v55 = vcombine.low %v6129_v43, %v6136_v56  ;;  %v4712_v31 = vcombine.high %v4710_v32, %v4710_v32 }
 0x296   : > { %v5502_v61 = vadd.f32 %v5501_v3, %v5500_v33  ;;  %v5263_v27 = vrot.slane %v5249_v47, %v8669_v24  ;;  %v6139_v45 = vcombine.low %v5606_v25, %v5607_v49  ;;  %v4719_v60 = vrot.slane %v6812_v41, %v8669_v24 }
 0x297   : > { %5448 = vst.msk [vmem:[%s8689_s29 + $0x64] sm:$0x7] %vm5423_vm7, %v6579_v9  ;;  %v6248_v0 = vsel %vm5452_vm1, %v6137_v55, 0.0  ;;  %v6146_v21 = vrot.slane %v6138_v57, %v8669_v24  ;;  %v5608_v37 = vmul.f32 %v4712_v31, %v4712_v31 }
 0x298   : > { %v6249_v36 = vadd.f32 %v6248_v0, %v6247_v5  ;;  %v5264_v18 = vcombine.low %v5256_v63, %v5263_v27  ;;  %v6153_v6 = vrot.slane %v6139_v45, %v8669_v24  ;;  %v4720_v46 = vcombine.high %v4719_v60, %v4719_v60 }
 0x299   : > { %v5265_v42 = vcombine.low %v4712_v31, %v4719_v60  ;;  %v5609_v40 = vmul.f32 %v4719_v60, %v4719_v60 }
 0x29a   : > { %v6580_v30 = vpack.c.bf16 %v5264_v18, %v5264_v18  ;;  %v5503_v4 = vsel %vm345_vm3, %v5264_v18, 0.0  ;;  %v6154_v2 = vcombine.low %v6146_v21, %v6153_v6  ;;  %v5279_v8 = vrot.slane %v4720_v46, %v8669_v24 }
 0x29b   : > { %v5504_v19 = vadd.f32 %v5503_v4, %v5502_v61  ;;  %v5272_v59 = vrot.slane %v5265_v42, %v8669_v24  ;;  %v5610_v39 = vmul.f32 %v4720_v46, %v4720_v46  ;;  %v6155_v54 = vcombine.low %v5608_v37, %v5609_v40 }
 0x29c   : > { %5449 = vst.msk [vmem:[%s8689_s29 + $0x68] sm:$0xf] %vm5421_vm2, %v6580_v30  ;;  %v6250_v10 = vsel %vm345_vm3, %v6154_v2, 0.0  ;;  %vm6260_vm3 = vcmask 57344  }
 0x29d   : > { %v5280_v26 = vcombine.low %v5272_v59, %v5279_v8  ;;  %v6251_v12 = vadd.f32 %v6250_v10, %v6249_v36  ;;  %v6162_v41 = vrot.slane %v6155_v54, %v8669_v24  ;;  %v6169_v29 = vrot.slane %v5610_v39, %v8669_v24 }
 0x29f   : > { %v6581_v20 = vpack.c.bf16 %v5280_v26, %v5280_v26  ;;  %v5505_v7 = vsel %vm5452_vm1, %v5280_v26, 0.0  ;;  %v6170_v34 = vcombine.low %v6162_v41, %v6169_v29 }
 0x2a0   : > { %v5506_v50 = vadd.f32 %v5505_v7, %v5504_v19 }
 0x2a1   : > { %5450 = vst.msk [vmem:[%s8689_s29 + $0x6c] sm:$0x7] %vm5423_vm7, %v6581_v20  ;;  %v6252_v16 = vsel %vm5452_vm1, %v6170_v34, 0.0 }
 0x2a2   : > { %v5507_v35 = vrot.slane %v5506_v50, 4  ;;  %v6253_v22 = vadd.f32 %v6252_v16, %v6251_v12 }
 0x2a4   : > { %v5508_v62 = vadd.f32 %v5507_v35, %v5506_v50  ;;  %v6254_v23 = vrot.slane %v6253_v22, 4 }
 0x2a6   : > { %v5509_v13 = vrot.slane %v5508_v62, 2  ;;  %v6255_v28 = vadd.f32 %v6254_v23, %v6253_v22 }
 0x2a8   : > { %v5510_v14 = vadd.f32 %v5509_v13, %v5508_v62  ;;  %v6256_v51 = vrot.slane %v6255_v28, 2 }
 0x2aa   : > { %v5511_v56 = vrot.slane %v5510_v14, 1  ;;  %v6257_v24 = vadd.f32 %v6256_v51, %v6255_v28 }
 0x2ac   : > { %v5512_v44 = vadd.f32 %v5511_v56, %v5510_v14  ;;  %v6258_v33 = vrot.slane %v6257_v24, 1 }
 0x2ae   : > { %6261 = vst.msk [vmem:[%s181_s6] sm:$0x1] %vm6260_vm3, %v5512_v44  ;;  %v6259_v11 = vadd.f32 %v6258_v33, %v6257_v24 }
 0x2b0   : > { %6262 = vst.msk [vmem:[%s181_s6 + $0x1] sm:$0x1] %vm6260_vm3, %v6259_v11 }
 0x2b1 PF: > { %s14_s12 = sadd.s32 1, %s6889_s12  }
 0x2b2   : > { %p11_p4 = scmp.ge.s32.totalorder %s14_s12, 4  }
 0x2b4   :  { %13 = sbr.rel (!%p11_p4) target bundleno = 1 (0x1), region = 72 }

</bundles_post_ra>
